<compile_context>
chip_gen: v6e
topology: v6e:2x2x1
jax: 0.10.0
libtpu: 0.0.40
codegen_flags: <defaults>
</compile_context>

<pallas_src>
import functools

import jax
import jax.numpy as jnp
from jax.experimental import pallas as pl
from jax.experimental.pallas import tpu as pltpu

EPS = 1e-3


def _bn_rows(h, p_ref, gamma_row, beta_row, inv_count, *, relu):
    """Training-mode BatchNorm (+ optional ReLU) in lane-dense row layout.

    h          : (N*H, W*C) f32 conv output, column order [w-block][channel].
    p_ref      : (W*C, W*C) 0/1 projector; (v @ P)[j] = sum of v over all
                 columns with the same channel as j, i.e. per-channel sums
                 already broadcast back to row layout (no reshape/tile).
    gamma_row / beta_row : (1, W*C) affine params pre-tiled in the wrapper.
    Single pass (sum & sum-of-squares), folded scale/shift, biased variance.
    """
    p = p_ref[...]
    sum_row = jnp.sum(jnp.dot(h, p, preferred_element_type=jnp.float32),
                      axis=0, keepdims=True)
    sq_row = jnp.sum(jnp.dot(h * h, p, preferred_element_type=jnp.float32),
                     axis=0, keepdims=True)
    mean_row = sum_row * inv_count
    var_row = sq_row * inv_count - mean_row * mean_row
    scale = gamma_row * jax.lax.rsqrt(var_row + EPS)
    shift = beta_row - mean_row * scale
    out = h * scale + shift
    return jnp.maximum(out, 0.0) if relu else out


def bottleneck_kernel(x_ref, w1_ref, w2b_ref, sprev_ref, snext_ref, w3_ref,
                      p1_ref, p3_ref, g1_ref, b1_ref, g2_ref, b2_ref,
                      g3_ref, b3_ref, o_ref, *, inv_count):
    f32, bf16 = jnp.float32, jnp.bfloat16

    x_rows = x_ref[...]                       # (NH, W*Cin) f32, residual path

    # ---- conv1 (1x1) as one lane-dense block-diagonal matmul + BN1 + ReLU --
    h1 = jnp.dot(x_rows.astype(bf16), w1_ref[...], preferred_element_type=f32)
    h1 = _bn_rows(h1, p1_ref, g1_ref[...], b1_ref[...], inv_count, relu=True)
    h1b = h1.astype(bf16)                     # (NH, W*Cmid)

    # ---- conv2 (3x3 'same') as 3 banded matmuls ----------------------------
    # Vertical taps via exact 0/1 shift matrices (rows at per-image borders
    # are zeroed -> implements the vertical zero padding exactly).
    up = jnp.dot(sprev_ref[...], h1b, preferred_element_type=f32).astype(bf16)
    dn = jnp.dot(snext_ref[...], h1b, preferred_element_type=f32).astype(bf16)
    h2 = jnp.dot(up, w2b_ref[0], preferred_element_type=f32)
    h2 = h2 + jnp.dot(h1b, w2b_ref[1], preferred_element_type=f32)
    h2 = h2 + jnp.dot(dn, w2b_ref[2], preferred_element_type=f32)
    h2 = _bn_rows(h2, p1_ref, g2_ref[...], b2_ref[...], inv_count, relu=True)

    # ---- conv3 (1x1) + BN3 + residual add + final ReLU ---------------------
    h3 = jnp.dot(h2.astype(bf16), w3_ref[...], preferred_element_type=f32)
    h3 = _bn_rows(h3, p3_ref, g3_ref[...], b3_ref[...], inv_count, relu=False)
    o_ref[...] = jnp.maximum(h3 + x_rows, 0.0)


_VMEM = pl.BlockSpec(memory_space=pltpu.MemorySpace.VMEM)


@jax.jit
def bottleneck_forward(x_nchw, w1_oihw, g1, b1, w2_oihw, g2, b2, w3_oihw, g3, b3):
    N, Cin, H, W = x_nchw.shape
    Cmid = w1_oihw.shape[0]
    Cout = w3_oihw.shape[0]
    assert Cout == Cin, "identity residual requires in_channels == 4*out_channels"
    NH = N * H
    M = N * H * W
    f32, bf16 = jnp.float32, jnp.bfloat16

    # --- activations: NCHW -> NHWC -> lane-dense rows (N*H, W*C) ------------
    x_rows = (jnp.transpose(x_nchw, (0, 2, 3, 1))
              .reshape(NH, W * Cin).astype(f32))

    # --- weight prep (wrapper-side glue; all constant-folded by XLA) --------
    w1 = jnp.transpose(w1_oihw.reshape(Cmid, Cin)).astype(f32)   # (Cin, Cmid)
    w3 = jnp.transpose(w3_oihw.reshape(Cout, Cmid)).astype(f32)  # (Cmid, Cout)
    w2 = jnp.transpose(w2_oihw, (2, 3, 1, 0)).astype(f32)        # (kh,kw,Ci,Co)

    eye_w = jnp.eye(W, dtype=f32)
    w1_bd = jnp.kron(eye_w, w1).astype(bf16)      # (W*Cin,  W*Cmid) block-diag
    w3_bd = jnp.kron(eye_w, w3).astype(bf16)      # (W*Cmid, W*Cout) block-diag

    # 3x3 conv: per vertical tap dy, a banded (W*Cmid, W*Cmid) matrix whose
    # band structure also implements the horizontal 'same' zero padding.
    bands = []
    for dy in range(3):
        b_dy = sum(jnp.kron(jnp.eye(W, W, k=1 - dx, dtype=f32), w2[dy, dx])
                   for dx in range(3))
        bands.append(b_dy)
    w2_bands = jnp.stack(bands).astype(bf16)      # (3, W*Cmid, W*Cmid)

    # Vertical-shift 0/1 matrices (zero rows at per-image top/bottom borders).
    ridx = jnp.arange(NH)
    s_prev = (jnp.eye(NH, NH, k=-1, dtype=f32)
              * ((ridx % H) != 0).astype(f32)[:, None]).astype(bf16)
    s_next = (jnp.eye(NH, NH, k=1, dtype=f32)
              * ((ridx % H) != (H - 1)).astype(f32)[:, None]).astype(bf16)

    # BN per-channel projectors + affine params pre-tiled to row layout.
    p1 = jnp.kron(jnp.ones((W, W), f32), jnp.eye(Cmid, dtype=f32))
    p3 = jnp.kron(jnp.ones((W, W), f32), jnp.eye(Cout, dtype=f32))
    g1r = jnp.tile(g1.reshape(1, Cmid).astype(f32), (1, W))
    b1r = jnp.tile(b1.reshape(1, Cmid).astype(f32), (1, W))
    g2r = jnp.tile(g2.reshape(1, Cmid).astype(f32), (1, W))
    b2r = jnp.tile(b2.reshape(1, Cmid).astype(f32), (1, W))
    g3r = jnp.tile(g3.reshape(1, Cout).astype(f32), (1, W))
    b3r = jnp.tile(b3.reshape(1, Cout).astype(f32), (1, W))

    kern = functools.partial(bottleneck_kernel, inv_count=1.0 / M)

    out_rows = pl.pallas_call(
        kern,
        out_shape=jax.ShapeDtypeStruct((NH, W * Cout), f32),
        in_specs=[_VMEM] * 14,
        out_specs=_VMEM,
    )(x_rows, w1_bd, w2_bands, s_prev, s_next, w3_bd,
      p1, p3, g1r, b1r, g2r, b2r, g3r, b3r)

    # lane-dense rows -> NHWC -> NCHW
    return jnp.transpose(out_rows.reshape(N, H, W, Cout), (0, 3, 1, 2))


# ----------------------------------------------------------------------------
# Pure-JAX reference (mirrors the PyTorch forward) for a correctness check.
# ----------------------------------------------------------------------------
def reference_forward(x, w1, g1, b1, w2, g2, b2, w3, g3, b3):
    def conv(x, w, pad):
        return jax.lax.conv_general_dilated(
            x, w, window_strides=(1, 1), padding=pad,
            dimension_numbers=("NCHW", "OIHW", "NCHW"))

    def bn(x, g, b):
        mean = jnp.mean(x, axis=(0, 2, 3), keepdims=True)
        var = jnp.mean((x - mean) ** 2, axis=(0, 2, 3), keepdims=True)
        return ((x - mean) * jax.lax.rsqrt(var + EPS)
                * g.reshape(1, -1, 1, 1) + b.reshape(1, -1, 1, 1))

    identity = x
    h = jnp.maximum(bn(conv(x, w1, "VALID"), g1, b1), 0.0)
    h = jnp.maximum(bn(conv(h, w2, "SAME"), g2, b2), 0.0)
    h = bn(conv(h, w3, "VALID"), g3, b3)
    return jnp.maximum(h + identity, 0.0)


if __name__ == "__main__":
    # Bottleneck(in_channels=32, out_channels=8) -> expansion 4 -> Cout = 32
    N, Cin, H, W = 2, 32, 16, 16
    Cmid = 8
    Cout = 4 * Cmid

    key = jax.random.PRNGKey(0)
    ks = jax.random.split(key, 10)
    x = jax.random.normal(ks[0], (N, Cin, H, W), jnp.float32)

    # conv weights (PyTorch OIHW shapes), deterministic init
    w1 = 0.1 * jax.random.normal(ks[1], (Cmid, Cin, 1, 1), jnp.float32)
    w2 = 0.1 * jax.random.normal(ks[2], (Cmid, Cmid, 3, 3), jnp.float32)
    w3 = 0.1 * jax.random.normal(ks[3], (Cout, Cmid, 1, 1), jnp.float32)
    # BatchNorm affine params
    g1 = 1.0 + 0.1 * jax.random.normal(ks[4], (Cmid,), jnp.float32)
    b1 = 0.1 * jax.random.normal(ks[5], (Cmid,), jnp.float32)
    g2 = 1.0 + 0.1 * jax.random.normal(ks[6], (Cmid,), jnp.float32)
    b2 = 0.1 * jax.random.normal(ks[7], (Cmid,), jnp.float32)
    g3 = 1.0 + 0.1 * jax.random.normal(ks[8], (Cout,), jnp.float32)
    b3 = 0.1 * jax.random.normal(ks[9], (Cout,), jnp.float32)

    out = bottleneck_forward(x, w1, g1, b1, w2, g2, b2, w3, g3, b3)
    out = jax.block_until_ready(out)

    ref = reference_forward(x, w1, g1, b1, w2, g2, b2, w3, g3, b3)
    assert out.shape == (N, Cout, H, W)
    # bf16 MXU operands (per perf review) -> slightly looser tolerance than a
    # pure-f32 comparison; BN renormalization keeps relative error ~1e-2.
    max_diff = float(jnp.max(jnp.abs(out - ref)))
    assert jnp.allclose(out, ref, atol=5e-2, rtol=5e-2), max_diff

    print("KERNEL_OK")
</pallas_src>

<mosaic_0001>
module attributes {stable_mosaic.version = 11 : i64} {
  func.func @bottleneck_kernel(%arg0: memref<32x512xf32, #tpu.memory_space<vmem>>, %arg1: memref<512x128xbf16, #tpu.memory_space<vmem>>, %arg2: memref<3x128x128xbf16, #tpu.memory_space<vmem>>, %arg3: memref<32x32xbf16, #tpu.memory_space<vmem>>, %arg4: memref<32x32xbf16, #tpu.memory_space<vmem>>, %arg5: memref<128x512xbf16, #tpu.memory_space<vmem>>, %arg6: memref<128x128xf32, #tpu.memory_space<vmem>>, %arg7: memref<512x512xf32, #tpu.memory_space<vmem>>, %arg8: memref<1x128xf32, #tpu.memory_space<vmem>>, %arg9: memref<1x128xf32, #tpu.memory_space<vmem>>, %arg10: memref<1x128xf32, #tpu.memory_space<vmem>>, %arg11: memref<1x128xf32, #tpu.memory_space<vmem>>, %arg12: memref<1x512xf32, #tpu.memory_space<vmem>>, %arg13: memref<1x512xf32, #tpu.memory_space<vmem>>, %arg14: memref<32x512xf32, #tpu.memory_space<vmem>>) attributes {dimension_semantics = [], scalar_prefetch = 0 : i64, scratch_operands = 0 : i64, tpu.core_type = #tpu.core_type<tc>} {
    %c0 = arith.constant 0 : index
    %c0_0 = arith.constant 0 : index
    %0 = vector.load %arg0[%c0, %c0_0] : memref<32x512xf32, #tpu.memory_space<vmem>>, vector<32x512xf32>
    %1 = arith.truncf %0 : vector<32x512xf32> to vector<32x512xbf16>
    %c0_1 = arith.constant 0 : index
    %c0_2 = arith.constant 0 : index
    %2 = vector.load %arg1[%c0_1, %c0_2] : memref<512x128xbf16, #tpu.memory_space<vmem>>, vector<512x128xbf16>
    %cst = arith.constant dense<0.000000e+00> : vector<32x128xf32>
    %3 = tpu.matmul %1, %2, %cst {dimension_numbers = #tpu.dot_dimension_numbers<[1], [0], [0], [1], [0, 0, 1, 1], [], []>} : vector<32x512xbf16>, vector<512x128xbf16>, vector<32x128xf32> -> vector<32x128xf32>
    %c0_3 = arith.constant 0 : index
    %c0_4 = arith.constant 0 : index
    %4 = vector.load %arg8[%c0_3, %c0_4] : memref<1x128xf32, #tpu.memory_space<vmem>>, vector<1x128xf32>
    %c0_5 = arith.constant 0 : index
    %c0_6 = arith.constant 0 : index
    %5 = vector.load %arg9[%c0_5, %c0_6] : memref<1x128xf32, #tpu.memory_space<vmem>>, vector<1x128xf32>
    %c0_7 = arith.constant 0 : index
    %c0_8 = arith.constant 0 : index
    %6 = vector.load %arg6[%c0_7, %c0_8] : memref<128x128xf32, #tpu.memory_space<vmem>>, vector<128x128xf32>
    %cst_9 = arith.constant dense<0.000000e+00> : vector<32x128xf32>
    %7 = tpu.matmul %3, %6, %cst_9 {dimension_numbers = #tpu.dot_dimension_numbers<[1], [0], [0], [1], [0, 0, 1, 1], [], []>} : vector<32x128xf32>, vector<128x128xf32>, vector<32x128xf32> -> vector<32x128xf32>
    %cst_10 = arith.constant dense<0.000000e+00> : vector<128xf32>
    %8 = vector.multi_reduction <add>, %7, %cst_10 [0] : vector<32x128xf32> to vector<128xf32>
    %9 = vector.shape_cast %8 : vector<128xf32> to vector<1x128xf32>
    %10 = arith.mulf %3, %3 : vector<32x128xf32>
    %cst_11 = arith.constant dense<0.000000e+00> : vector<32x128xf32>
    %11 = tpu.matmul %10, %6, %cst_11 {dimension_numbers = #tpu.dot_dimension_numbers<[1], [0], [0], [1], [0, 0, 1, 1], [], []>} : vector<32x128xf32>, vector<128x128xf32>, vector<32x128xf32> -> vector<32x128xf32>
    %cst_12 = arith.constant dense<0.000000e+00> : vector<128xf32>
    %12 = vector.multi_reduction <add>, %11, %cst_12 [0] : vector<32x128xf32> to vector<128xf32>
    %13 = vector.shape_cast %12 : vector<128xf32> to vector<1x128xf32>
    %cst_13 = arith.constant 0.001953125 : f32
    %14 = vector.broadcast %cst_13 : f32 to vector<1x128xf32>
    %15 = arith.mulf %9, %14 : vector<1x128xf32>
    %cst_14 = arith.constant 0.001953125 : f32
    %16 = vector.broadcast %cst_14 : f32 to vector<1x128xf32>
    %17 = arith.mulf %13, %16 : vector<1x128xf32>
    %18 = arith.mulf %15, %15 : vector<1x128xf32>
    %19 = arith.subf %17, %18 : vector<1x128xf32>
    %cst_15 = arith.constant 1.000000e-03 : f32
    %20 = vector.broadcast %cst_15 : f32 to vector<1x128xf32>
    %21 = arith.addf %19, %20 : vector<1x128xf32>
    %22 = math.rsqrt %21 : vector<1x128xf32>
    %23 = arith.mulf %4, %22 : vector<1x128xf32>
    %24 = arith.mulf %15, %23 : vector<1x128xf32>
    %25 = arith.subf %5, %24 : vector<1x128xf32>
    %26 = vector.broadcast %23 : vector<1x128xf32> to vector<32x128xf32>
    %27 = arith.mulf %3, %26 : vector<32x128xf32>
    %28 = vector.broadcast %25 : vector<1x128xf32> to vector<32x128xf32>
    %29 = arith.addf %27, %28 : vector<32x128xf32>
    %cst_16 = arith.constant 0.000000e+00 : f32
    %30 = vector.broadcast %cst_16 : f32 to vector<32x128xf32>
    %31 = arith.maximumf %29, %30 : vector<32x128xf32>
    %32 = arith.truncf %31 : vector<32x128xf32> to vector<32x128xbf16>
    %c0_17 = arith.constant 0 : index
    %c0_18 = arith.constant 0 : index
    %33 = vector.load %arg3[%c0_17, %c0_18] : memref<32x32xbf16, #tpu.memory_space<vmem>>, vector<32x32xbf16>
    %cst_19 = arith.constant dense<0.000000e+00> : vector<32x128xf32>
    %34 = tpu.matmul %33, %32, %cst_19 {dimension_numbers = #tpu.dot_dimension_numbers<[1], [0], [0], [1], [0, 0, 1, 1], [], []>} : vector<32x32xbf16>, vector<32x128xbf16>, vector<32x128xf32> -> vector<32x128xf32>
    %35 = arith.truncf %34 : vector<32x128xf32> to vector<32x128xbf16>
    %c0_20 = arith.constant 0 : index
    %c0_21 = arith.constant 0 : index
    %36 = vector.load %arg4[%c0_20, %c0_21] : memref<32x32xbf16, #tpu.memory_space<vmem>>, vector<32x32xbf16>
    %cst_22 = arith.constant dense<0.000000e+00> : vector<32x128xf32>
    %37 = tpu.matmul %36, %32, %cst_22 {dimension_numbers = #tpu.dot_dimension_numbers<[1], [0], [0], [1], [0, 0, 1, 1], [], []>} : vector<32x32xbf16>, vector<32x128xbf16>, vector<32x128xf32> -> vector<32x128xf32>
    %38 = arith.truncf %37 : vector<32x128xf32> to vector<32x128xbf16>
    %c0_23 = arith.constant 0 : index
    %c0_24 = arith.constant 0 : index
    %c0_25 = arith.constant 0 : index
    %39 = vector.load %arg2[%c0_23, %c0_24, %c0_25] : memref<3x128x128xbf16, #tpu.memory_space<vmem>>, vector<1x128x128xbf16>
    %40 = vector.shape_cast %39 : vector<1x128x128xbf16> to vector<128x128xbf16>
    %cst_26 = arith.constant dense<0.000000e+00> : vector<32x128xf32>
    %41 = tpu.matmul %35, %40, %cst_26 {dimension_numbers = #tpu.dot_dimension_numbers<[1], [0], [0], [1], [0, 0, 1, 1], [], []>} : vector<32x128xbf16>, vector<128x128xbf16>, vector<32x128xf32> -> vector<32x128xf32>
    %c1 = arith.constant 1 : index
    %c0_27 = arith.constant 0 : index
    %c0_28 = arith.constant 0 : index
    %42 = vector.load %arg2[%c1, %c0_27, %c0_28] : memref<3x128x128xbf16, #tpu.memory_space<vmem>>, vector<1x128x128xbf16>
    %43 = vector.shape_cast %42 : vector<1x128x128xbf16> to vector<128x128xbf16>
    %cst_29 = arith.constant dense<0.000000e+00> : vector<32x128xf32>
    %44 = tpu.matmul %32, %43, %cst_29 {dimension_numbers = #tpu.dot_dimension_numbers<[1], [0], [0], [1], [0, 0, 1, 1], [], []>} : vector<32x128xbf16>, vector<128x128xbf16>, vector<32x128xf32> -> vector<32x128xf32>
    %45 = arith.addf %41, %44 : vector<32x128xf32>
    %c2 = arith.constant 2 : index
    %c0_30 = arith.constant 0 : index
    %c0_31 = arith.constant 0 : index
    %46 = vector.load %arg2[%c2, %c0_30, %c0_31] : memref<3x128x128xbf16, #tpu.memory_space<vmem>>, vector<1x128x128xbf16>
    %47 = vector.shape_cast %46 : vector<1x128x128xbf16> to vector<128x128xbf16>
    %cst_32 = arith.constant dense<0.000000e+00> : vector<32x128xf32>
    %48 = tpu.matmul %38, %47, %cst_32 {dimension_numbers = #tpu.dot_dimension_numbers<[1], [0], [0], [1], [0, 0, 1, 1], [], []>} : vector<32x128xbf16>, vector<128x128xbf16>, vector<32x128xf32> -> vector<32x128xf32>
    %49 = arith.addf %45, %48 : vector<32x128xf32>
    %c0_33 = arith.constant 0 : index
    %c0_34 = arith.constant 0 : index
    %50 = vector.load %arg10[%c0_33, %c0_34] : memref<1x128xf32, #tpu.memory_space<vmem>>, vector<1x128xf32>
    %c0_35 = arith.constant 0 : index
    %c0_36 = arith.constant 0 : index
    %51 = vector.load %arg11[%c0_35, %c0_36] : memref<1x128xf32, #tpu.memory_space<vmem>>, vector<1x128xf32>
    %c0_37 = arith.constant 0 : index
    %c0_38 = arith.constant 0 : index
    %52 = vector.load %arg6[%c0_37, %c0_38] : memref<128x128xf32, #tpu.memory_space<vmem>>, vector<128x128xf32>
    %cst_39 = arith.constant dense<0.000000e+00> : vector<32x128xf32>
    %53 = tpu.matmul %49, %52, %cst_39 {dimension_numbers = #tpu.dot_dimension_numbers<[1], [0], [0], [1], [0, 0, 1, 1], [], []>} : vector<32x128xf32>, vector<128x128xf32>, vector<32x128xf32> -> vector<32x128xf32>
    %cst_40 = arith.constant dense<0.000000e+00> : vector<128xf32>
    %54 = vector.multi_reduction <add>, %53, %cst_40 [0] : vector<32x128xf32> to vector<128xf32>
    %55 = vector.shape_cast %54 : vector<128xf32> to vector<1x128xf32>
    %56 = arith.mulf %49, %49 : vector<32x128xf32>
    %cst_41 = arith.constant dense<0.000000e+00> : vector<32x128xf32>
    %57 = tpu.matmul %56, %52, %cst_41 {dimension_numbers = #tpu.dot_dimension_numbers<[1], [0], [0], [1], [0, 0, 1, 1], [], []>} : vector<32x128xf32>, vector<128x128xf32>, vector<32x128xf32> -> vector<32x128xf32>
    %cst_42 = arith.constant dense<0.000000e+00> : vector<128xf32>
    %58 = vector.multi_reduction <add>, %57, %cst_42 [0] : vector<32x128xf32> to vector<128xf32>
    %59 = vector.shape_cast %58 : vector<128xf32> to vector<1x128xf32>
    %cst_43 = arith.constant 0.001953125 : f32
    %60 = vector.broadcast %cst_43 : f32 to vector<1x128xf32>
    %61 = arith.mulf %55, %60 : vector<1x128xf32>
    %cst_44 = arith.constant 0.001953125 : f32
    %62 = vector.broadcast %cst_44 : f32 to vector<1x128xf32>
    %63 = arith.mulf %59, %62 : vector<1x128xf32>
    %64 = arith.mulf %61, %61 : vector<1x128xf32>
    %65 = arith.subf %63, %64 : vector<1x128xf32>
    %cst_45 = arith.constant 1.000000e-03 : f32
    %66 = vector.broadcast %cst_45 : f32 to vector<1x128xf32>
    %67 = arith.addf %65, %66 : vector<1x128xf32>
    %68 = math.rsqrt %67 : vector<1x128xf32>
    %69 = arith.mulf %50, %68 : vector<1x128xf32>
    %70 = arith.mulf %61, %69 : vector<1x128xf32>
    %71 = arith.subf %51, %70 : vector<1x128xf32>
    %72 = vector.broadcast %69 : vector<1x128xf32> to vector<32x128xf32>
    %73 = arith.mulf %49, %72 : vector<32x128xf32>
    %74 = vector.broadcast %71 : vector<1x128xf32> to vector<32x128xf32>
    %75 = arith.addf %73, %74 : vector<32x128xf32>
    %cst_46 = arith.constant 0.000000e+00 : f32
    %76 = vector.broadcast %cst_46 : f32 to vector<32x128xf32>
    %77 = arith.maximumf %75, %76 : vector<32x128xf32>
    %78 = arith.truncf %77 : vector<32x128xf32> to vector<32x128xbf16>
    %c0_47 = arith.constant 0 : index
    %c0_48 = arith.constant 0 : index
    %79 = vector.load %arg5[%c0_47, %c0_48] : memref<128x512xbf16, #tpu.memory_space<vmem>>, vector<128x512xbf16>
    %cst_49 = arith.constant dense<0.000000e+00> : vector<32x512xf32>
    %80 = tpu.matmul %78, %79, %cst_49 {dimension_numbers = #tpu.dot_dimension_numbers<[1], [0], [0], [1], [0, 0, 1, 1], [], []>} : vector<32x128xbf16>, vector<128x512xbf16>, vector<32x512xf32> -> vector<32x512xf32>
    %c0_50 = arith.constant 0 : index
    %c0_51 = arith.constant 0 : index
    %81 = vector.load %arg12[%c0_50, %c0_51] : memref<1x512xf32, #tpu.memory_space<vmem>>, vector<1x512xf32>
    %c0_52 = arith.constant 0 : index
    %c0_53 = arith.constant 0 : index
    %82 = vector.load %arg13[%c0_52, %c0_53] : memref<1x512xf32, #tpu.memory_space<vmem>>, vector<1x512xf32>
    %c0_54 = arith.constant 0 : index
    %c0_55 = arith.constant 0 : index
    %83 = vector.load %arg7[%c0_54, %c0_55] : memref<512x512xf32, #tpu.memory_space<vmem>>, vector<512x512xf32>
    %cst_56 = arith.constant dense<0.000000e+00> : vector<32x512xf32>
    %84 = tpu.matmul %80, %83, %cst_56 {dimension_numbers = #tpu.dot_dimension_numbers<[1], [0], [0], [1], [0, 0, 1, 1], [], []>} : vector<32x512xf32>, vector<512x512xf32>, vector<32x512xf32> -> vector<32x512xf32>
    %cst_57 = arith.constant dense<0.000000e+00> : vector<512xf32>
    %85 = vector.multi_reduction <add>, %84, %cst_57 [0] : vector<32x512xf32> to vector<512xf32>
    %86 = vector.shape_cast %85 : vector<512xf32> to vector<1x512xf32>
    %87 = arith.mulf %80, %80 : vector<32x512xf32>
    %cst_58 = arith.constant dense<0.000000e+00> : vector<32x512xf32>
    %88 = tpu.matmul %87, %83, %cst_58 {dimension_numbers = #tpu.dot_dimension_numbers<[1], [0], [0], [1], [0, 0, 1, 1], [], []>} : vector<32x512xf32>, vector<512x512xf32>, vector<32x512xf32> -> vector<32x512xf32>
    %cst_59 = arith.constant dense<0.000000e+00> : vector<512xf32>
    %89 = vector.multi_reduction <add>, %88, %cst_59 [0] : vector<32x512xf32> to vector<512xf32>
    %90 = vector.shape_cast %89 : vector<512xf32> to vector<1x512xf32>
    %cst_60 = arith.constant 0.001953125 : f32
    %91 = vector.broadcast %cst_60 : f32 to vector<1x512xf32>
    %92 = arith.mulf %86, %91 : vector<1x512xf32>
    %cst_61 = arith.constant 0.001953125 : f32
    %93 = vector.broadcast %cst_61 : f32 to vector<1x512xf32>
    %94 = arith.mulf %90, %93 : vector<1x512xf32>
    %95 = arith.mulf %92, %92 : vector<1x512xf32>
    %96 = arith.subf %94, %95 : vector<1x512xf32>
    %cst_62 = arith.constant 1.000000e-03 : f32
    %97 = vector.broadcast %cst_62 : f32 to vector<1x512xf32>
    %98 = arith.addf %96, %97 : vector<1x512xf32>
    %99 = math.rsqrt %98 : vector<1x512xf32>
    %100 = arith.mulf %81, %99 : vector<1x512xf32>
    %101 = arith.mulf %92, %100 : vector<1x512xf32>
    %102 = arith.subf %82, %101 : vector<1x512xf32>
    %103 = vector.broadcast %100 : vector<1x512xf32> to vector<32x512xf32>
    %104 = arith.mulf %80, %103 : vector<32x512xf32>
    %105 = vector.broadcast %102 : vector<1x512xf32> to vector<32x512xf32>
    %106 = arith.addf %104, %105 : vector<32x512xf32>
    %107 = arith.addf %106, %0 : vector<32x512xf32>
    %cst_63 = arith.constant 0.000000e+00 : f32
    %108 = vector.broadcast %cst_63 : f32 to vector<32x512xf32>
    %109 = arith.maximumf %107, %108 : vector<32x512xf32>
    %c0_64 = arith.constant 0 : index
    %c0_65 = arith.constant 0 : index
    %110 = vector.load %arg14[%c0_64, %c0_65] : memref<32x512xf32, #tpu.memory_space<vmem>>, vector<32x512xf32>
    tpu.vector_store %arg14[%c0_64, %c0_65], %109 {strides = array<i32>} : memref<32x512xf32, #tpu.memory_space<vmem>>, vector<32x512xf32>,
    return
  }
}

</mosaic_0001>

<bundles_post_ra>
// kernel: bottleneck_forward.1
= control target key start
LH: loop header
LB: loop body
LE: loop exit
PB: predicated region body
PF: predicated region fallthrough
CT: control target
= control target key end

     0   :  { %vm685_vm0 = vcmask 261120   ;;  %s6397_s1 = inlined_call_operand.vmem [shape: bf16[512,128], index: 1, kind: input, shape index: {}]   ;;  %s6398_s0 = inlined_call_operand.vmem [shape: f32[32,512], index: 0, kind: input, shape index: {}]   ;;  %s6399_s6 = inlined_call_operand.vmem [shape: f32[128,128], index: 6, kind: input, shape index: {}]   ;;  %s6400_s2 = inlined_call_operand.vmem [shape: bf16[3,128,128], index: 2, kind: input, shape index: {}]   ;;  %s6401_s3 = inlined_call_operand.vmem [shape: bf16[32,32], index: 3, kind: input, shape index: {}]   ;;  %s6402_s4 = inlined_call_operand.vmem [shape: bf16[32,32], index: 4, kind: input, shape index: {}]   ;;  %s6403_s8 = inlined_call_operand.vmem [shape: f32[1,128], index: 8, kind: input, shape index: {}]   ;;  %s6404_s9 = inlined_call_operand.vmem [shape: f32[1,128], index: 9, kind: input, shape index: {}]   ;;  %s6405_s5 = inlined_call_operand.vmem [shape: bf16[128,512], index: 5, kind: input, shape index: {}]   ;;  %s6406_s7 = inlined_call_operand.vmem [shape: f32[512,512], index: 7, kind: input, shape index: {}]   ;;  %s6407_s10 = inlined_call_operand.vmem [shape: f32[1,128], index: 10, kind: input, shape index: {}]   ;;  %s6408_s11 = inlined_call_operand.vmem [shape: f32[1,128], index: 11, kind: input, shape index: {}]   ;;  %s6409_s12 = inlined_call_operand.vmem [shape: f32[1,512], index: 12, kind: input, shape index: {}]   ;;  %s6410_s13 = inlined_call_operand.vmem [shape: f32[1,512], index: 13, kind: input, shape index: {}]   ;;  %s6411_s14 = inlined_call_operand.vmem [shape: f32[32,512], index: 14, kind: output, shape index: {}]  }
   0x1   :  { %v3490_v0 = vld [vmem:[%s6397_s1 + $0x78] sm:$0xff]   ;;  %v3494_v4 = vld [vmem:[%s6397_s1 + $0x70] sm:$0xff]   ;;  %v3498_v8 = vld [vmem:[%s6397_s1 + $0x68] sm:$0xff]  }
   0x2   :  { %v3491_v1 = vld [vmem:[%s6397_s1 + $0xf8] sm:$0xff]   ;;  %3086 = vmatprep.subr.bf16.mxu0 %v3490_v0  ;;  %v3495_v5 = vld [vmem:[%s6397_s1 + $0xf0] sm:$0xff]   ;;  %v3499_v9 = vld [vmem:[%s6397_s1 + $0xe8] sm:$0xff]  }
   0x3   :  { %v3492_v2 = vld [vmem:[%s6397_s1 + $0x38] sm:$0xff]   ;;  %3114 = vmatprep.subr.bf16.mxu1 %v3491_v1  ;;  %v3496_v6 = vld [vmem:[%s6397_s1 + $0x30] sm:$0xff]   ;;  %v3500_v10 = vld [vmem:[%s6397_s1 + $0x28] sm:$0xff]  }
   0x4   :  { %v3493_v3 = vld [vmem:[%s6397_s1 + $0xb8] sm:$0xff]   ;;  %3087 = vmatpush3.bf16.msra.mxu0 %v3492_v2  ;;  %v3497_v7 = vld [vmem:[%s6397_s1 + $0xb0] sm:$0xff]   ;;  %v3501_v11 = vld [vmem:[%s6397_s1 + $0xa8] sm:$0xff]  }
   0x5   :  { %3115 = vmatpush3.bf16.msra.mxu1 %v3493_v3  ;;  %3088 = vmatprep.subr.bf16.mxu0 %v3494_v4  ;;  %v3502_v12 = vld [vmem:[%s6397_s1 + $0x60] sm:$0xff]   ;;  %v3506_v16 = vld [vmem:[%s6397_s1 + $0x58] sm:$0xff]   ;;  %v3510_v20 = vld [vmem:[%s6397_s1 + $0x50] sm:$0xff]  }
   0x6   :  { %3116 = vmatprep.subr.bf16.mxu1 %v3495_v5  ;;  %v3503_v13 = vld [vmem:[%s6397_s1 + $0xe0] sm:$0xff]   ;;  %v3507_v17 = vld [vmem:[%s6397_s1 + $0xd8] sm:$0xff]   ;;  %v3511_v21 = vld [vmem:[%s6397_s1 + $0xd0] sm:$0xff]  }
   0x7   :  { %v3504_v14 = vld [vmem:[%s6397_s1 + $0x20] sm:$0xff]   ;;  %v3508_v18 = vld [vmem:[%s6397_s1 + $0x18] sm:$0xff]   ;;  %v3512_v22 = vld [vmem:[%s6397_s1 + $0x10] sm:$0xff]  }
   0x8   :  { %3089 = vmatpush3.bf16.msra.mxu0 %v3496_v6  ;;  %v3505_v15 = vld [vmem:[%s6397_s1 + $0xa0] sm:$0xff]   ;;  %v3509_v19 = vld [vmem:[%s6397_s1 + $0x98] sm:$0xff]   ;;  %v3513_v23 = vld [vmem:[%s6397_s1 + $0x90] sm:$0xff]  }
   0x9   :  { %3117 = vmatpush3.bf16.msra.mxu1 %v3497_v7  ;;  %3090 = vmatprep.subr.bf16.mxu0 %v3498_v8  ;;  %v3514_v24 = vld [vmem:[%s6397_s1 + $0x48] sm:$0xff]   ;;  %v3518_v28 = vld [vmem:[%s6397_s1 + $0x40] sm:$0xff]   ;;  %v51_v34 = vld [vmem:[%s6398_s0 + $0x18] sm:$0xff] }
   0xa   :  { %3118 = vmatprep.subr.bf16.mxu1 %v3499_v9  ;;  %v3515_v25 = vld [vmem:[%s6397_s1 + $0xc8] sm:$0xff]   ;;  %v3519_v29 = vld [vmem:[%s6397_s1 + $0xc0] sm:$0xff]   ;;  %v55_v36 = vld [vmem:[%s6398_s0 + $0x38] sm:$0xff] }
   0xb   :  { %v3516_v26 = vld [vmem:[%s6397_s1 + $0x8] sm:$0xff]   ;;  %v3520_v30 = vld [vmem:[%s6397_s1] sm:$0xff]   ;;  %v67_v39 = vpack.c.bf16 %v55_v36, %v51_v34  ;;  %v50_v41 = vld [vmem:[%s6398_s0 + $0x10] sm:$0xff] }
   0xc   :  { %3091 = vmatpush3.bf16.msra.mxu0 %v3500_v10  ;;  %v3517_v27 = vld [vmem:[%s6397_s1 + $0x88] sm:$0xff]   ;;  %v3521_v31 = vld [vmem:[%s6397_s1 + $0x80] sm:$0xff]   ;;  %v54_v42 = vld [vmem:[%s6398_s0 + $0x30] sm:$0xff] }
   0xd   :  { %3119 = vmatpush3.bf16.msra.mxu1 %v3501_v11  ;;  %3092 = vmatprep.subr.bf16.mxu0 %v3502_v12  ;;  %v49_v32 = vld [vmem:[%s6398_s0 + $0x8] sm:$0xff]  ;;  %v48_v37 = vld [vmem:[%s6398_s0] sm:$0xff]  ;;  %v66_v44 = vpack.c.bf16 %v54_v42, %v50_v41  ;;  %v59_v46 = vld [vmem:[%s6398_s0 + $0x58] sm:$0xff] }
   0xe   :  { %3120 = vmatprep.subr.bf16.mxu1 %v3503_v13  ;;  %v53_v33 = vld [vmem:[%s6398_s0 + $0x28] sm:$0xff]  ;;  %v52_v38 = vld [vmem:[%s6398_s0 + $0x20] sm:$0xff]  ;;  %v63_v47 = vld [vmem:[%s6398_s0 + $0x78] sm:$0xff]  ;;  %409 = vmatprep.mubr.bf16.mxu1 %v67_v39 }
   0xf   :  { %v65_v35 = vpack.c.bf16 %v53_v33, %v49_v32  ;;  %v64_v40 = vpack.c.bf16 %v52_v38, %v48_v37  ;;  %v57_v43 = vld [vmem:[%s6398_s0 + $0x48] sm:$0xff]  ;;  %v71_v49 = vpack.c.bf16 %v63_v47, %v59_v46  ;;  %v56_v50 = vld [vmem:[%s6398_s0 + $0x40] sm:$0xff]  ;;  %v3902_v52 = vld [vmem:[%s6399_s6 + $0x78] sm:$0xff] }
  0x10   :  { %3093 = vmatpush3.bf16.msra.mxu0 %v3504_v14  ;;  %v61_v45 = vld [vmem:[%s6398_s0 + $0x68] sm:$0xff]  ;;  %v60_v51 = vld [vmem:[%s6398_s0 + $0x60] sm:$0xff]  ;;  %v58_v53 = vld [vmem:[%s6398_s0 + $0x50] sm:$0xff] }
  0x11   :  { %3121 = vmatpush3.bf16.msra.mxu1 %v3505_v15  ;;  %3094 = vmatprep.subr.bf16.mxu0 %v3506_v16  ;;  %v69_v48 = vpack.c.bf16 %v61_v45, %v57_v43  ;;  %v62_v54 = vld [vmem:[%s6398_s0 + $0x70] sm:$0xff]  ;;  %v68_v56 = vpack.c.bf16 %v60_v51, %v56_v50  ;;  %v3922_v57 = vld [vmem:[%s6399_s6 + $0x68] sm:$0xff]  ;;  %v3932_v59 = vld [vmem:[%s6399_s6 + $0x60] sm:$0xff] }
  0x12   :  { %3122 = vmatprep.subr.bf16.mxu1 %v3507_v17  ;;  %360 = vmatprep.mubr.bf16.mxu0 %v65_v35  ;;  %v3913_v55 = vld [vmem:[%s6399_s6 + $0x70] sm:$0xff]  ;;  %v70_v58 = vpack.c.bf16 %v62_v54, %v58_v53  ;;  %v3940_v60 = vld [vmem:[%s6399_s6 + $0x58] sm:$0xff]  ;;  %v3958_v62 = vld [vmem:[%s6399_s6 + $0x48] sm:$0xff] }
  0x13   :  { %v3949_v61 = vld [vmem:[%s6399_s6 + $0x50] sm:$0xff]  ;;  %v3967_v63 = vld [vmem:[%s6399_s6 + $0x40] sm:$0xff]  ;;  %v3976_v0 = vld [vmem:[%s6399_s6 + $0x38] sm:$0xff] }
  0x14   :  { %3095 = vmatpush3.bf16.msra.mxu0 %v3508_v18  ;;  %v3985_v1 = vld [vmem:[%s6399_s6 + $0x30] sm:$0xff]  ;;  %v3994_v2 = vld [vmem:[%s6399_s6 + $0x28] sm:$0xff]  ;;  %v4007_v3 = vld [vmem:[%s6399_s6 + $0x20] sm:$0xff] }
  0x15   :  { %3123 = vmatpush3.bf16.msra.mxu1 %v3509_v19  ;;  %3096 = vmatprep.subr.bf16.mxu0 %v3510_v20  ;;  %v4015_v4 = vld [vmem:[%s6399_s6 + $0x18] sm:$0xff]  ;;  %v4024_v5 = vld [vmem:[%s6399_s6 + $0x10] sm:$0xff]  ;;  %v4033_v6 = vld [vmem:[%s6399_s6 + $0x8] sm:$0xff] }
  0x16   :  { %3124 = vmatprep.subr.bf16.mxu1 %v3511_v21  ;;  %v4042_v7 = vld [vmem:[%s6399_s6] sm:$0xff]  ;;  %v3523_v41 = vld [vmem:[%s6400_s2 + $0x70] sm:$0xff]   ;;  %v3524_v42 = vld [vmem:[%s6400_s2 + $0x68] sm:$0xff]  }
  0x17   :  { %v3525_v43 = vld [vmem:[%s6400_s2 + $0x60] sm:$0xff]   ;;  %v3527_v45 = vld [vmem:[%s6400_s2 + $0x50] sm:$0xff]   ;;  %v3528_v46 = vld [vmem:[%s6400_s2 + $0x48] sm:$0xff]  }
  0x18   :  { %3097 = vmatpush3.bf16.msra.mxu0 %v3512_v22  ;;  %v3529_v47 = vld [vmem:[%s6400_s2 + $0x40] sm:$0xff]  }
  0x19   :  { %3125 = vmatpush3.bf16.msra.mxu1 %v3513_v23  ;;  %3098 = vmatprep.subr.bf16.mxu0 %v3514_v24 }
  0x1a   :  { %3126 = vmatprep.subr.bf16.mxu1 %v3515_v25 }
  0x1c   :  { %3099 = vmatpush3.bf16.msra.mxu0 %v3516_v26 }
  0x1d   :  { %3127 = vmatpush3.bf16.msra.mxu1 %v3517_v27  ;;  %3100 = vmatprep.subr.bf16.mxu0 %v3518_v28 }
  0x1e   :  { %3128 = vmatprep.subr.bf16.mxu1 %v3519_v29 }
  0x20   :  { %3101 = vmatpush3.bf16.msra.mxu0 %v3520_v30 }
  0x21   :  { %3129 = vmatpush3.bf16.msra.mxu1 %v3521_v31  ;;  %3260 = vmatprep.subr.mxu0 %v3902_v52 }
  0x22   :  { %3298 = vmatprep.subr.mxu1 %v3902_v52 }
  0x23   :  { %361 = vmatmul.mubr.bf16.vlgmr.msra.gmra.mxu0 %v64_v40  ;;  %v3522_v40 = vld [vmem:[%s6400_s2 + $0x78] sm:$0xff]  }
  0x24   :  { %410 = vmatmul.mubr.bf16.vlgmr.msra.gmra.mxu1 %v66_v44  ;;  %368 = vmatprep.mubr.bf16.mxu0 %v69_v48  ;;  %v3526_v44 = vld [vmem:[%s6400_s2 + $0x58] sm:$0xff]   ;;  %v3530_v48 = vld [vmem:[%s6401_s3] sm:$0xff]  }
  0x25   :  { %417 = vmatprep.mubr.bf16.mxu1 %v71_v49  ;;  %3261 = vmatpush3.msra.mxu0 %v3902_v52  ;;  %v4100_v49 = vld [vmem:[%s6400_s2 + $0xb8] sm:$0xff]  }
  0x26   :  { %3299 = vmatpush3.msra.mxu1 %v3902_v52  ;;  %3262 = vmatprep.subr.mxu0 %v3913_v55 }
  0x27   :  { %3300 = vmatprep.subr.mxu1 %v3913_v55  ;;  %3263 = vmatpush3.msra.mxu0 %v3913_v55 }
  0x28   :  { %3301 = vmatpush3.msra.mxu1 %v3913_v55  ;;  %3264 = vmatprep.subr.mxu0 %v3922_v57 }
  0x29   :  { %3302 = vmatprep.subr.mxu1 %v3922_v57  ;;  %3265 = vmatpush3.msra.mxu0 %v3922_v57 }
  0x2a   :  { %3303 = vmatpush3.msra.mxu1 %v3922_v57  ;;  %3266 = vmatprep.subr.mxu0 %v3932_v59 }
  0x2b   :  { %369 = vmatmul.mubr.bf16.gmra.mxu0 %v68_v56  ;;  %3304 = vmatprep.subr.mxu1 %v3932_v59 }
  0x2c   :  { %418 = vmatmul.mubr.bf16.gmra.mxu1 %v70_v58  ;;  %3267 = vmatpush3.msra.mxu0 %v3932_v59 }
  0x2d   :  { %3305 = vmatpush3.msra.mxu1 %v3932_v59  ;;  %3268 = vmatprep.subr.mxu0 %v3940_v60 }
  0x2e   :  { %3306 = vmatprep.subr.mxu1 %v3940_v60  ;;  %3269 = vmatpush3.msra.mxu0 %v3940_v60 }
  0x2f   :  { %3307 = vmatpush3.msra.mxu1 %v3940_v60  ;;  %3270 = vmatprep.subr.mxu0 %v3949_v61 }
  0x30   :  { %3308 = vmatprep.subr.mxu1 %v3949_v61  ;;  %3271 = vmatpush3.msra.mxu0 %v3949_v61 }
  0x31   :  { %3309 = vmatpush3.msra.mxu1 %v3949_v61  ;;  %3272 = vmatprep.subr.mxu0 %v3958_v62 }
  0x32   :  { %3310 = vmatprep.subr.mxu1 %v3958_v62  ;;  %3273 = vmatpush3.msra.mxu0 %v3958_v62 }
  0x33   :  { %3311 = vmatpush3.msra.mxu1 %v3958_v62  ;;  %3274 = vmatprep.subr.mxu0 %v3967_v63 }
  0x34   :  { %3312 = vmatprep.subr.mxu1 %v3967_v63  ;;  %3275 = vmatpush3.msra.mxu0 %v3967_v63 }
  0x35   :  { %3313 = vmatpush3.msra.mxu1 %v3967_v63  ;;  %3276 = vmatprep.subr.mxu0 %v3976_v0 }
  0x36   :  { %3314 = vmatprep.subr.mxu1 %v3976_v0  ;;  %3277 = vmatpush3.msra.mxu0 %v3976_v0 }
  0x37   :  { %3315 = vmatpush3.msra.mxu1 %v3976_v0  ;;  %3278 = vmatprep.subr.mxu0 %v3985_v1 }
  0x38   :  { %3316 = vmatprep.subr.mxu1 %v3985_v1  ;;  %3279 = vmatpush3.msra.mxu0 %v3985_v1 }
  0x39   :  { %3317 = vmatpush3.msra.mxu1 %v3985_v1  ;;  %3280 = vmatprep.subr.mxu0 %v3994_v2 }
  0x3a   :  { %3318 = vmatprep.subr.mxu1 %v3994_v2  ;;  %3281 = vmatpush3.msra.mxu0 %v3994_v2 }
  0x3b   :  { %3319 = vmatpush3.msra.mxu1 %v3994_v2  ;;  %3282 = vmatprep.subr.mxu0 %v4007_v3 }
  0x3c   :  { %3320 = vmatprep.subr.mxu1 %v4007_v3  ;;  %3283 = vmatpush3.msra.mxu0 %v4007_v3 }
  0x3d   :  { %3321 = vmatpush3.msra.mxu1 %v4007_v3  ;;  %3284 = vmatprep.subr.mxu0 %v4015_v4 }
  0x3e   :  { %3322 = vmatprep.subr.mxu1 %v4015_v4  ;;  %3285 = vmatpush3.msra.mxu0 %v4015_v4 }
  0x3f   :  { %3323 = vmatpush3.msra.mxu1 %v4015_v4  ;;  %3286 = vmatprep.subr.mxu0 %v4024_v5 }
  0x40   :  { %3324 = vmatprep.subr.mxu1 %v4024_v5  ;;  %3287 = vmatpush3.msra.mxu0 %v4024_v5 }
  0x41   :  { %3325 = vmatpush3.msra.mxu1 %v4024_v5  ;;  %3288 = vmatprep.subr.mxu0 %v4033_v6 }
  0x42   :  { %3326 = vmatprep.subr.mxu1 %v4033_v6  ;;  %3289 = vmatpush3.msra.mxu0 %v4033_v6 }
  0x43   :  { %3327 = vmatpush3.msra.mxu1 %v4033_v6  ;;  %3290 = vmatprep.subr.mxu0 %v4042_v7 }
  0x44   :  { %3328 = vmatprep.subr.mxu1 %v4042_v7  ;;  %3291 = vmatpush3.msra.mxu0 %v4042_v7 }
  0x45   :  { %3329 = vmatpush3.msra.mxu1 %v4042_v7  ;;  %3352 = vmatprep.subr.bf16.mxu0 %v3522_v40 }
  0xe3   :  { %v3102_v8 = vpop.f32.mrf.mxu0 }
  0xe4   :  { %v3130_v9 = vpop.f32.mrf.mxu1 }
  0xe5   :  { %v3103_v10 = vpop.f32.mrf.mxu0 }
  0xe6   :  { %v3104_v11 = vadd.f32 %v3103_v10, %v3102_v8  ;;  %v3131_v12 = vpop.f32.mrf.mxu1 }
  0xe7   :  { %v3132_v13 = vadd.f32 %v3131_v12, %v3130_v9  ;;  %v3105_v14 = vpop.f32.mrf.mxu0 }
  0xe8   :  { %v3133_v15 = vpop.f32.mrf.mxu1 }
  0xe9   :  { %v4049_v16 = vadd.f32 %v3132_v13, %v3104_v11  ;;  %v3106_v17 = vpop.f32.mrf.mxu0 }
  0xea   :  { %v3107_v18 = vadd.f32 %v3106_v17, %v3105_v14  ;;  %v3134_v19 = vpop.f32.mrf.mxu1 }
  0xeb   :  { %v3135_v20 = vadd.f32 %v3134_v19, %v3133_v15  ;;  %3292 = vmatprep.mubr.f32.mxu0 %v4049_v16  ;;  %v3108_v21 = vpop.f32.mrf.mxu0  ;;  %v538_v22 = vmul.f32 %v4049_v16, %v4049_v16 }
  0xec   :  { %v3136_v23 = vpop.f32.mrf.mxu1 }
  0xed   :  { %v4054_v24 = vadd.f32 %v3135_v20, %v3107_v18  ;;  %3330 = vmatprep.mubr.f32.mxu1 %v538_v22  ;;  %v3109_v25 = vpop.f32.mrf.mxu0 }
  0xee   :  { %v3110_v26 = vadd.f32 %v3109_v25, %v3108_v21  ;;  %v3137_v27 = vpop.f32.mrf.mxu1 }
  0xef   :  { %v539_v28 = vmul.f32 %v4054_v24, %v4054_v24  ;;  %v3138_v29 = vadd.f32 %v3137_v27, %v3136_v23  ;;  %3293 = vmatmul.mubr.f32.vlgmr.msra.gmra.mxu0 %v4054_v24  ;;  %v3111_v30 = vpop.f32.mrf.mxu0 }
  0xf0   :  { %v3139_v31 = vpop.f32.mrf.mxu1  ;;  %3353 = vmatpush3.bf16.msra.mxu0 %v3522_v40 }
  0xf1   :  { %v4059_v32 = vadd.f32 %v3138_v29, %v3110_v26  ;;  %3331 = vmatmul.mubr.f32.vlgmr.msra.gmra.mxu1 %v539_v28  ;;  %v3112_v33 = vpop.f32.mrf.mxu0  ;;  %3354 = vmatprep.subr.bf16.mxu0 %v3523_v41 }
  0xf2   :  { %v3113_v34 = vadd.f32 %v3112_v33, %v3111_v30  ;;  %v3140_v35 = vpop.f32.mrf.mxu1 }
  0xf3   :  { %v3141_v36 = vadd.f32 %v3140_v35, %v3139_v31  ;;  %3295 = vmatprep.mubr.f32.mxu0 %v4059_v32  ;;  %v540_v37 = vmul.f32 %v4059_v32, %v4059_v32 }
  0xf4   :  { %3355 = vmatpush3.bf16.msra.mxu0 %v3523_v41 }
  0xf5   :  { %v4064_v38 = vadd.f32 %v3141_v36, %v3113_v34  ;;  %3333 = vmatprep.mubr.f32.mxu1 %v540_v37  ;;  %3356 = vmatprep.subr.bf16.mxu0 %v3524_v42  ;;  %v646_v36 = vlaneseq }
  0xf7   :  { %3296 = vmatmul.mubr.f32.gmra.mxu0 %v4064_v38  ;;  %v541_v39 = vmul.f32 %v4064_v38, %v4064_v38  ;;  %v4103_v37 = vshrl.u32 %v646_v36, 7 }
  0xf8   :  { %3357 = vmatpush3.bf16.msra.mxu0 %v3524_v42 }
  0xf9   :  { %3334 = vmatmul.mubr.f32.gmra.mxu1 %v541_v39  ;;  %3358 = vmatprep.subr.bf16.mxu0 %v3525_v43  ;;  %6587 = vst [vmem:[#allocation2_spill] sm:$0xff] %v4103_v37  ;;  %v426_v39 = vld [vmem:[%s6403_s8] sm:$0x1]  ;;  %v4109_v40 = vsub.s32 0, %v4103_v37  ;;  %v4924_v37 = vld [vmem:[%s6406_s7 + $0x628] sm:$0xff] }
  0xfa   :  { %3340 = vmatprep.mubr.msk.bf16.mxu1 %vm685_vm0, %v3530_v48  ;;  %6612 = vst [vmem:[#allocation27_spill] sm:$0xff] %v4924_v37 }
  0xfb   :  { %6588 = vst [vmem:[#allocation3_spill] sm:$0xff] %v4109_v40 }
  0xfc   :  { %3359 = vmatpush3.bf16.msra.mxu0 %v3525_v43  ;;  %v427_v43 = vld [vmem:[%s6404_s9] sm:$0x1] }
  0xfd   :  { %3360 = vmatprep.subr.bf16.mxu0 %v3526_v44 }
 0x100   :  { %3361 = vmatpush3.bf16.msra.mxu0 %v3526_v44 }
 0x101   :  { %3362 = vmatprep.subr.bf16.mxu0 %v3527_v45 }
 0x104   :  { %3363 = vmatpush3.bf16.msra.mxu0 %v3527_v45 }
 0x105   :  { %3364 = vmatprep.subr.bf16.mxu0 %v3528_v46 }
 0x108   :  { %3365 = vmatpush3.bf16.msra.mxu0 %v3528_v46 }
 0x109   :  { %3366 = vmatprep.subr.bf16.mxu0 %v3529_v47 }
 0x10c   :  { %3367 = vmatpush3.bf16.msra.mxu0 %v3529_v47 }
 0x10d   :  { %3392 = vmatprep.subr.bf16.mxu0 %v4100_v49 }
 0x1af   :  { %v3294_v50 = vpop.f32.mrf.mxu0 }
 0x1b1   :  { %v3332_v51 = vpop.f32.mrf.mxu1  ;;  %v510_v53 = vpop.f32.mrf.mxu0 }
 0x1b2   :  { %v529_v58 = vadd.f32 %v3294_v50, %v510_v53 }
 0x1b3   :  { %v608_v54 = vpop.f32.mrf.mxu1 }
 0x1b4   :  { %v627_v10 = vadd.f32 %v3332_v51, %v608_v54 }
 0x1b7   :  { %v3297_v56 = vpop.f32.mrf.mxu0 }
 0x1b9   :  { %v520_v8 = vpop.f32.mrf.mxu0  ;;  %v3335_v9 = vpop.f32.mrf.mxu1 }
 0x1ba   :  { %v530_v11 = vadd.f32 %v529_v58, %v520_v8 }
 0x1bb   :  { %v618_v12 = vpop.f32.mrf.mxu1 }
 0x1bc   :  { %v531_v13 = vadd.f32 %v3297_v56, %v530_v11  ;;  %v628_v14 = vadd.f32 %v627_v10, %v618_v12 }
 0x1be   :  { %v532_v15 = vrot.slane %v531_v13, 4  ;;  %v629_v17 = vadd.f32 %v3335_v9, %v628_v14 }
 0x1c0   :  { %v533_v18 = vadd.f32 %v532_v15, %v531_v13  ;;  %v630_v19 = vrot.slane %v629_v17, 4  ;;  %v3535_v15 = vld [vmem:[%s6400_s2 + $0x30] sm:$0xff]  }
 0x1c2   :  { %v534_v20 = vrot.slane %v533_v18, 2  ;;  %v631_v21 = vadd.f32 %v630_v19, %v629_v17  ;;  %v3536_v17 = vld [vmem:[%s6400_s2 + $0x28] sm:$0xff]   ;;  %v3540_v19 = vld [vmem:[%s6400_s2 + $0x18] sm:$0xff]  }
 0x1c4   :  { %v535_v22 = vadd.f32 %v534_v20, %v533_v18  ;;  %v632_v23 = vrot.slane %v631_v21, 2  ;;  %v3538_v18 = vld [vmem:[%s6400_s2 + $0x20] sm:$0xff]   ;;  %v3541_v20 = vld [vmem:[%s6400_s2 + $0xa8] sm:$0xff]  }
 0x1c6   :  { %v536_v25 = vrot.slane %v535_v22, 1  ;;  %v633_v26 = vadd.f32 %v632_v23, %v631_v21  ;;  %v3542_v21 = vld [vmem:[%s6400_s2 + $0x10] sm:$0xff]   ;;  %v3544_v23 = vld [vmem:[%s6400_s2 + $0x8] sm:$0xff]  }
 0x1c8   :  { %v537_v27 = vadd.f32 %v536_v25, %v535_v22  ;;  %v634_v28 = vrot.slane %v633_v26, 1  ;;  %v3543_v22 = vld [vmem:[%s6400_s2 + $0xa0] sm:$0xff]   ;;  %v3545_v25 = vld [vmem:[%s6400_s2 + $0x98] sm:$0xff]  }
 0x1ca   :  { %v636_v29 = vmul.f32 0.001953125, %v537_v27  ;;  %v635_v30 = vadd.f32 %v634_v28, %v633_v26  ;;  %v3546_v26 = vld [vmem:[%s6400_s2] sm:$0xff]   ;;  %v3547_v27 = vld [vmem:[%s6400_s2 + $0x90] sm:$0xff]   ;;  %v3548_v28 = vld [vmem:[%s6400_s2 + $0x88] sm:$0xff]  }
 0x1cc   :  { %v638_v31 = vmul.f32 %v636_v29, %v636_v29  ;;  %v637_v33 = vmul.f32 0.001953125, %v635_v30 }
 0x1ce   :  { %v639_v34 = vsub.f32 %v637_v33, %v638_v31 }
 0x1d0   :  { %v640_v35 = vadd.f32 0.001, %v639_v34 }
 0x1d2   :  { %3598 = vrsqrt.f32 %v640_v35 }
 0x1df   :  { %v3599_v41 = vpop.eup %3598 }
 0x1e0   :  { %v642_v42 = vmul.f32 %v3599_v41, %v426_v39 }
 0x1e2   :  { %v643_v44 = vmul.f32 %v642_v42, %v636_v29  ;;  %v649_v45 = vrot.slane %v642_v42, %v4109_v40  ;;  %v3549_v29 = vld [vmem:[%s6400_s2 + $0x80] sm:$0xff]  }
 0x1e4   :  { %v644_v46 = vsub.f32 %v427_v43, %v643_v44  ;;  %v653_v47 = vmul.f32 %v649_v45, %v4059_v32  ;;  %v654_v48 = vmul.f32 %v649_v45, %v4064_v38  ;;  %v651_v51 = vmul.f32 %v649_v45, %v4049_v16  ;;  %v3539_v32 = vld [vmem:[%s6400_s2 + $0xb0] sm:$0xff]   ;;  %v3531_v16 = vld [vmem:[%s6401_s3 + $0x8] sm:$0xff]   ;;  %v3534_v38 = vld [vmem:[%s6400_s2 + $0x38] sm:$0xff]  }
 0x1e5   :  { %v652_v53 = vmul.f32 %v649_v45, %v4054_v24  ;;  %v3532_v24 = vld [vmem:[%s6402_s4] sm:$0xff]  }
 0x1e6   :  { %v659_v50 = vrot.slane %v644_v46, %v4109_v40 }
 0x1e8   :  { %v663_v54 = vadd.f32 %v659_v50, %v653_v47  ;;  %v664_v56 = vadd.f32 %v659_v50, %v654_v48  ;;  %v661_v58 = vadd.f32 %v659_v50, %v651_v51  ;;  %v662_v8 = vadd.f32 %v659_v50, %v652_v53 }
 0x1ea   :  { %v667_v9 = vmax.f32 %v663_v54, 0.0  ;;  %v668_v10 = vmax.f32 %v664_v56, 0.0  ;;  %v665_v11 = vmax.f32 %v661_v58, 0.0  ;;  %v666_v12 = vmax.f32 %v662_v8, 0.0  ;;  %v3550_v58 = vld [vmem:[%s6405_s5 + $0xe0] ss:$16 sps:$4 sm:$0xff]  }
 0x1eb   :  { %v3552_v8 = vld [vmem:[%s6405_s5 + $0xe4] ss:$16 sps:$4 sm:$0xff]  }
 0x1ec   :  { %v670_v13 = vpack.c.bf16 %v668_v10, %v667_v9  ;;  %v669_v14 = vpack.c.bf16 %v666_v12, %v665_v11  ;;  %v3553_v9 = vld [vmem:[%s6405_s5 + $0xe8] ss:$16 sps:$4 sm:$0xff]   ;;  %v3555_v10 = vld [vmem:[%s6405_s5 + $0xec] ss:$16 sps:$4 sm:$0xff]   ;;  %v3558_v11 = vld [vmem:[%s6405_s5 + $0xc4] ss:$16 sps:$4 sm:$0xff]  }
 0x1ed   :  { %v3561_v12 = vld [vmem:[%s6405_s5 + $0xcc] ss:$16 sps:$4 sm:$0xff]  }
 0x1ee   :  { %3336 = vmatprep.subr.bf16.mxu1 %v670_v13  ;;  %3368 = vmatprep.mubr.bf16.mxu0 %v669_v14 }
 0x1ef   :  { %3337 = vmatpush3.bf16.msra.mxu1 %v670_v13  ;;  %3369 = vmatmul.mubr.bf16.vlgmr.msra.gmra.mxu0 %v670_v13 }
 0x1f0   :  { %3338 = vmatprep.subr.bf16.mxu1 %v669_v14  ;;  %3393 = vmatpush3.bf16.msra.mxu0 %v4100_v49  ;;  %v3533_v49 = vld [vmem:[%s6402_s4 + $0x8] sm:$0xff]  }
 0x1f1   :  { %3394 = vmatprep.subr.bf16.mxu0 %v3539_v32 }
 0x1f3   :  { %3339 = vmatpush3.bf16.msra.mxu1 %v669_v14 }
 0x1f4   :  { %3344 = vmatprep.subr.bf16.mxu1 %v670_v13  ;;  %3395 = vmatpush3.bf16.msra.mxu0 %v3539_v32  ;;  %v3564_v32 = vld [vmem:[%s6405_s5 + $0xa4] ss:$16 sps:$4 sm:$0xff]  }
 0x1f5   :  { %3396 = vmatprep.subr.bf16.mxu0 %v3541_v20 }
 0x1f6   :  { %3341 = vmatmul.mubr.msk.bf16.vlgmr.msra.gmra.mxu1 %vm685_vm0, %v3531_v16  ;;  %v3567_v16 = vld [vmem:[%s6405_s5 + $0xac] ss:$16 sps:$4 sm:$0xff]  }
 0x1f7   :  { %3345 = vmatpush3.bf16.msra.mxu1 %v670_v13  ;;  %3348 = vmatprep.mubr.msk.bf16.mxu1 %vm685_vm0, %v3532_v24  ;;  %v3556_v13 = vld [vmem:[%s6405_s5 + $0xc0] ss:$16 sps:$4 sm:$0xff]  }
 0x1f8   :  { %3346 = vmatprep.subr.bf16.mxu1 %v669_v14  ;;  %3397 = vmatpush3.bf16.msra.mxu0 %v3541_v20  ;;  %v3562_v24 = vld [vmem:[%s6405_s5 + $0xa0] ss:$16 sps:$4 sm:$0xff]   ;;  %v3579_v20 = vld [vmem:[%s6405_s5 + $0x6c] ss:$16 sps:$4 sm:$0xff]  }
 0x1f9   :  { %3398 = vmatprep.subr.bf16.mxu0 %v3543_v22 }
 0x1fb   :  { %3347 = vmatpush3.bf16.msra.mxu1 %v669_v14  ;;  %v3559_v14 = vld [vmem:[%s6405_s5 + $0xc8] ss:$16 sps:$4 sm:$0xff]  }
 0x1fc   :  { %3372 = vmatprep.subr.bf16.mxu1 %v3534_v38  ;;  %3399 = vmatpush3.bf16.msra.mxu0 %v3543_v22  ;;  %v3577_v22 = vld [vmem:[%s6405_s5 + $0x68] ss:$16 sps:$4 sm:$0xff]  }
 0x1fd   :  { %3400 = vmatprep.subr.bf16.mxu0 %v3545_v25 }
 0x1fe   :  { %3349 = vmatmul.mubr.msk.bf16.vlgmr.msra.gmra.mxu1 %vm685_vm0, %v3533_v49  ;;  %v3570_v49 = vld [vmem:[%s6405_s5 + $0x84] ss:$16 sps:$4 sm:$0xff]  }
 0x1ff   :  { %3373 = vmatpush3.bf16.msra.mxu1 %v3534_v38  ;;  %v3565_v38 = vld [vmem:[%s6405_s5 + $0xa8] ss:$16 sps:$4 sm:$0xff]  }
 0x200   :  { %3374 = vmatprep.subr.bf16.mxu1 %v3535_v15  ;;  %3401 = vmatpush3.bf16.msra.mxu0 %v3545_v25  ;;  %v3580_v25 = vld [vmem:[%s6405_s5 + $0x40] ss:$16 sps:$4 sm:$0xff]  }
 0x201   :  { %3402 = vmatprep.subr.bf16.mxu0 %v3547_v27 }
 0x203   :  { %3375 = vmatpush3.bf16.msra.mxu1 %v3535_v15  ;;  %v3573_v15 = vld [vmem:[%s6405_s5 + $0x8c] ss:$16 sps:$4 sm:$0xff]  }
 0x204   :  { %3376 = vmatprep.subr.bf16.mxu1 %v3536_v17  ;;  %3403 = vmatpush3.bf16.msra.mxu0 %v3547_v27  ;;  %v3583_v27 = vld [vmem:[%s6405_s5 + $0x48] ss:$16 sps:$4 sm:$0xff]  }
 0x205   :  { %3404 = vmatprep.subr.bf16.mxu0 %v3548_v28 }
 0x207   :  { %3377 = vmatpush3.bf16.msra.mxu1 %v3536_v17  ;;  %v3568_v17 = vld [vmem:[%s6405_s5 + $0x80] ss:$16 sps:$4 sm:$0xff]  }
 0x208   :  { %3378 = vmatprep.subr.bf16.mxu1 %v3538_v18  ;;  %3405 = vmatpush3.bf16.msra.mxu0 %v3548_v28  ;;  %v3588_v28 = vld [vmem:[%s6405_s5 + $0x24] ss:$16 sps:$4 sm:$0xff]  }
 0x209   :  { %3406 = vmatprep.subr.bf16.mxu0 %v3549_v29 }
 0x20b   :  { %3379 = vmatpush3.bf16.msra.mxu1 %v3538_v18  ;;  %v3571_v18 = vld [vmem:[%s6405_s5 + $0x88] ss:$16 sps:$4 sm:$0xff]  }
 0x20c   :  { %3380 = vmatprep.subr.bf16.mxu1 %v3540_v19  ;;  %3407 = vmatpush3.bf16.msra.mxu0 %v3549_v29  ;;  %v3591_v29 = vld [vmem:[%s6405_s5 + $0x2c] ss:$16 sps:$4 sm:$0xff]  }
 0x20d   :  { %3450 = vmatprep.subr.mxu0 %v3902_v52 }
 0x20f   :  { %3381 = vmatpush3.bf16.msra.mxu1 %v3540_v19  ;;  %v3576_v19 = vld [vmem:[%s6405_s5 + $0x64] ss:$16 sps:$4 sm:$0xff]  }
 0x210   :  { %3382 = vmatprep.subr.bf16.mxu1 %v3542_v21 }
 0x213   :  { %3383 = vmatpush3.bf16.msra.mxu1 %v3542_v21  ;;  %v3574_v21 = vld [vmem:[%s6405_s5 + $0x60] ss:$16 sps:$4 sm:$0xff]  }
 0x214   :  { %3384 = vmatprep.subr.bf16.mxu1 %v3544_v23 }
 0x217   :  { %3385 = vmatpush3.bf16.msra.mxu1 %v3544_v23  ;;  %v3582_v23 = vld [vmem:[%s6405_s5 + $0x44] ss:$16 sps:$4 sm:$0xff]  }
 0x218   :  { %3386 = vmatprep.subr.bf16.mxu1 %v3546_v26 }
 0x21b   :  { %3387 = vmatpush3.bf16.msra.mxu1 %v3546_v26  ;;  %v3585_v26 = vld [vmem:[%s6405_s5 + $0x4c] ss:$16 sps:$4 sm:$0xff]  }
 0x21c   :  { %3412 = vmatprep.subr.mxu1 %v3902_v52 }
 0x2b6   :  { %v3342_v30 = vpop.f32.mrf.mxu1 }
 0x2b8   :  { %v726_v31 = vpop.f32.mrf.mxu1 }
 0x2ba   :  { %v3343_v33 = vpop.f32.mrf.mxu1 }
 0x2bb   :  { %v742_v36 = vpack.c.bf16 %v3343_v33, %v3342_v30  ;;  %v3586_v30 = vld [vmem:[%s6405_s5 + $0x20] ss:$16 sps:$4 sm:$0xff]   ;;  %v3589_v33 = vld [vmem:[%s6405_s5 + $0x28] ss:$16 sps:$4 sm:$0xff]  }
 0x2bc   :  { %v729_v34 = vpop.f32.mrf.mxu1 }
 0x2bd   :  { %v741_v35 = vpack.c.bf16 %v729_v34, %v726_v31  ;;  %v3684_v31 = vmov 0   ;;  %v3594_v34 = vld [vmem:[%s6405_s5 + $0x4] ss:$16 sps:$4 sm:$0xff]  }
 0x2be   :  { %v3350_v39 = vpop.f32.mrf.mxu1 }
 0x2bf   :  { %3388 = vmatprep.mubr.bf16.mxu1 %v741_v35  ;;  %v3597_v35 = vld [vmem:[%s6405_s5 + $0xc] ss:$16 sps:$4 sm:$0xff]  }
 0x2c0   :  { %v797_v41 = vpop.f32.mrf.mxu1  ;;  %3389 = vmatmul.mubr.bf16.vlgmr.msra.gmra.mxu1 %v742_v36  ;;  %v3592_v36 = vld [vmem:[%s6405_s5] ss:$16 sps:$4 sm:$0xff]  }
 0x2c1   :  { %3413 = vmatpush3.msra.mxu1 %v3902_v52 }
 0x2c2   :  { %v3351_v42 = vpop.f32.mrf.mxu1  ;;  %3414 = vmatprep.subr.mxu1 %v3913_v55 }
 0x2c3   :  { %3415 = vmatpush3.msra.mxu1 %v3913_v55  ;;  %v813_v45 = vpack.c.bf16 %v3351_v42, %v3350_v39  ;;  %v3595_v39 = vld [vmem:[%s6405_s5 + $0x8] ss:$16 sps:$4 sm:$0xff]  }
 0x2c4   :  { %v800_v43 = vpop.f32.mrf.mxu1  ;;  %3416 = vmatprep.subr.mxu1 %v3922_v57  ;;  %v1877_v42 = vld [vmem:[%s6406_s7 + $0x5e8] sm:$0xff] }
 0x2c5   :  { %v812_v44 = vpack.c.bf16 %v800_v43, %v797_v41  ;;  %3417 = vmatpush3.msra.mxu1 %v3922_v57  ;;  %v1749_v41 = vld [vmem:[%s6406_s7 + $0x1e8] sm:$0xff] }
 0x2c6   :  { %3418 = vmatprep.subr.mxu1 %v3932_v59 }
 0x2c7   :  { %3408 = vmatprep.mubr.bf16.mxu0 %v812_v44  ;;  %3419 = vmatpush3.msra.mxu1 %v3932_v59 }
 0x2c8   :  { %3409 = vmatmul.mubr.bf16.vlgmr.msra.gmra.mxu0 %v813_v45  ;;  %3420 = vmatprep.subr.mxu1 %v3940_v60 }
 0x2c9   :  { %3451 = vmatpush3.msra.mxu0 %v3902_v52  ;;  %3421 = vmatpush3.msra.mxu1 %v3940_v60  ;;  %v3370_v52 = vpop.f32.mrf.mxu0 }
 0x2ca   :  { %3452 = vmatprep.subr.mxu0 %v3913_v55  ;;  %3422 = vmatprep.subr.mxu1 %v3949_v61 }
 0x2cb   :  { %3453 = vmatpush3.msra.mxu0 %v3913_v55  ;;  %3423 = vmatpush3.msra.mxu1 %v3949_v61  ;;  %v929_v55 = vpop.f32.mrf.mxu0 }
 0x2cc   :  { %3454 = vmatprep.subr.mxu0 %v3922_v57  ;;  %3424 = vmatprep.subr.mxu1 %v3958_v62 }
 0x2cd   :  { %3455 = vmatpush3.msra.mxu0 %v3922_v57  ;;  %3425 = vmatpush3.msra.mxu1 %v3958_v62 }
 0x2ce   :  { %3456 = vmatprep.subr.mxu0 %v3932_v59  ;;  %3426 = vmatprep.subr.mxu1 %v3967_v63 }
 0x2cf   :  { %3457 = vmatpush3.msra.mxu0 %v3932_v59  ;;  %3427 = vmatpush3.msra.mxu1 %v3967_v63  ;;  %v3371_v59 = vpop.f32.mrf.mxu0 }
 0x2d0   :  { %3458 = vmatprep.subr.mxu0 %v3940_v60  ;;  %3428 = vmatprep.subr.mxu1 %v3976_v0 }
 0x2d1   :  { %3459 = vmatpush3.msra.mxu0 %v3940_v60  ;;  %3429 = vmatpush3.msra.mxu1 %v3976_v0 }
 0x2d2   :  { %3460 = vmatprep.subr.mxu0 %v3949_v61  ;;  %3430 = vmatprep.subr.mxu1 %v3985_v1 }
 0x2d3   :  { %3461 = vmatpush3.msra.mxu0 %v3949_v61  ;;  %3431 = vmatpush3.msra.mxu1 %v3985_v1  ;;  %v932_v61 = vpop.f32.mrf.mxu0 }
 0x2d4   :  { %3462 = vmatprep.subr.mxu0 %v3958_v62  ;;  %3432 = vmatprep.subr.mxu1 %v3994_v2 }
 0x2d5   :  { %3463 = vmatpush3.msra.mxu0 %v3958_v62  ;;  %3433 = vmatpush3.msra.mxu1 %v3994_v2 }
 0x2d6   :  { %3464 = vmatprep.subr.mxu0 %v3967_v63  ;;  %3434 = vmatprep.subr.mxu1 %v4007_v3 }
 0x2d7   :  { %3465 = vmatpush3.msra.mxu0 %v3967_v63  ;;  %3435 = vmatpush3.msra.mxu1 %v4007_v3 }
 0x2d8   :  { %3466 = vmatprep.subr.mxu0 %v3976_v0  ;;  %3436 = vmatprep.subr.mxu1 %v4015_v4 }
 0x2d9   :  { %3467 = vmatpush3.msra.mxu0 %v3976_v0  ;;  %3437 = vmatpush3.msra.mxu1 %v4015_v4 }
 0x2da   :  { %3468 = vmatprep.subr.mxu0 %v3985_v1  ;;  %3438 = vmatprep.subr.mxu1 %v4024_v5 }
 0x2db   :  { %3469 = vmatpush3.msra.mxu0 %v3985_v1  ;;  %3439 = vmatpush3.msra.mxu1 %v4024_v5 }
 0x2dc   :  { %3470 = vmatprep.subr.mxu0 %v3994_v2  ;;  %3440 = vmatprep.subr.mxu1 %v4033_v6 }
 0x2dd   :  { %3471 = vmatpush3.msra.mxu0 %v3994_v2  ;;  %3441 = vmatpush3.msra.mxu1 %v4033_v6 }
 0x2de   :  { %3472 = vmatprep.subr.mxu0 %v4007_v3  ;;  %3442 = vmatprep.subr.mxu1 %v4042_v7 }
 0x2df   :  { %3473 = vmatpush3.msra.mxu0 %v4007_v3  ;;  %3443 = vmatpush3.msra.mxu1 %v4042_v7 }
 0x2e0   :  { %3474 = vmatprep.subr.mxu0 %v4015_v4  ;;  %1580 = vmatprep.subr.bf16.mxu1 %v3552_v8 }
 0x2e1   :  { %3475 = vmatpush3.msra.mxu0 %v4015_v4 }
 0x2e2   :  { %3476 = vmatprep.subr.mxu0 %v4024_v5 }
 0x2e3   :  { %3477 = vmatpush3.msra.mxu0 %v4024_v5 }
 0x2e4   :  { %3478 = vmatprep.subr.mxu0 %v4033_v6 }
 0x2e5   :  { %3479 = vmatpush3.msra.mxu0 %v4033_v6 }
 0x2e6   :  { %3480 = vmatprep.subr.mxu0 %v4042_v7 }
 0x2e7   :  { %3481 = vmatpush3.msra.mxu0 %v4042_v7 }
 0x2e8   :  { %1633 = vmatprep.subr.bf16.mxu0 %v3555_v10 }
 0x380   :  { %v3390_v57 = vpop.f32.mrf.mxu1 }
 0x381   :  { %v1035_v4 = vadd.f32 %v3390_v57, %v3370_v52 }
 0x382   :  { %v1026_v60 = vpop.f32.mrf.mxu1 }
 0x383   :  { %v1027_v0 = vadd.f32 %v1026_v60, %v929_v55 }
 0x384   :  { %v3391_v62 = vpop.f32.mrf.mxu1 }
 0x385   :  { %v1038_v48 = vadd.f32 %v3391_v62, %v3371_v59 }
 0x386   :  { %v1029_v1 = vpop.f32.mrf.mxu1 }
 0x387   :  { %v1030_v6 = vadd.f32 %v1029_v1, %v932_v61 }
 0x388   :  { %v3410_v63 = vpop.f32.mrf.mxu0 }
 0x389   :  { %v4247_v46 = vadd.f32 %v3410_v63, %v1035_v4 }
 0x38a   :  { %v1140_v2 = vpop.f32.mrf.mxu0 }
 0x38b   :  { %v4242_v3 = vadd.f32 %v1140_v2, %v1027_v0  ;;  %v1257_v54 = vmul.f32 %v4247_v46, %v4247_v46 }
 0x38c   :  { %v3411_v5 = vpop.f32.mrf.mxu0 }
 0x38d   :  { %3444 = vmatprep.mubr.f32.mxu1 %v4242_v3  ;;  %v1255_v7 = vmul.f32 %v4242_v3, %v4242_v3  ;;  %v4251_v51 = vadd.f32 %v3411_v5, %v1038_v48 }
 0x38e   :  { %v1143_v47 = vpop.f32.mrf.mxu0 }
 0x38f   :  { %v4249_v50 = vadd.f32 %v1143_v47, %v1030_v6  ;;  %3482 = vmatprep.mubr.f32.mxu0 %v1255_v7  ;;  %v1258_v56 = vmul.f32 %v4251_v51, %v4251_v51 }
 0x391   :  { %v1256_v53 = vmul.f32 %v4249_v50, %v4249_v50  ;;  %3445 = vmatmul.mubr.f32.vlgmr.msra.gmra.mxu1 %v4249_v50 }
 0x392   :  { %3447 = vmatprep.mubr.f32.mxu1 %v4247_v46  ;;  %1581 = vmatpush1.bf16.msra.mxu1 %v3550_v58 }
 0x393   :  { %3483 = vmatmul.mubr.f32.vlgmr.msra.gmra.mxu0 %v1256_v53  ;;  %1582 = vmatprep.subr.bf16.mxu1 %v3558_v11 }
 0x394   :  { %3485 = vmatprep.mubr.f32.mxu0 %v1257_v54  ;;  %1634 = vmatpush1.bf16.msra.mxu0 %v3553_v9 }
 0x395   :  { %3448 = vmatmul.mubr.f32.gmra.mxu1 %v4251_v51  ;;  %1635 = vmatprep.subr.bf16.mxu0 %v3561_v12 }
 0x396   :  { %1583 = vmatpush1.bf16.msra.mxu1 %v3556_v13  ;;  %1612 = vmatprep.mubr.bf16.mxu1 %v3684_v31 }
 0x397   :  { %3486 = vmatmul.mubr.f32.gmra.mxu0 %v1258_v56  ;;  %1584 = vmatprep.subr.bf16.mxu1 %v3564_v32  ;;  %v1159_v32 = vld [vmem:[%s6407_s10] sm:$0x1] }
 0x398   :  { %1636 = vmatpush1.bf16.msra.mxu0 %v3559_v14  ;;  %1665 = vmatprep.mubr.bf16.mxu0 %v3684_v31 }
 0x399   :  { %1637 = vmatprep.subr.bf16.mxu0 %v3567_v16 }
 0x39a   :  { %1585 = vmatpush1.bf16.msra.mxu1 %v3562_v24 }
 0x39b   :  { %1586 = vmatprep.subr.bf16.mxu1 %v3570_v49 }
 0x39c   :  { %1638 = vmatpush1.bf16.msra.mxu0 %v3565_v38  ;;  %v1160_v38 = vld [vmem:[%s6408_s11] sm:$0x1] }
 0x39d   :  { %1639 = vmatprep.subr.bf16.mxu0 %v3573_v15 }
 0x39e   :  { %1587 = vmatpush1.bf16.msra.mxu1 %v3568_v17 }
 0x39f   :  { %1588 = vmatprep.subr.bf16.mxu1 %v3576_v19 }
 0x3a0   :  { %1640 = vmatpush1.bf16.msra.mxu0 %v3571_v18 }
 0x3a1   :  { %1641 = vmatprep.subr.bf16.mxu0 %v3579_v20 }
 0x3a2   :  { %1589 = vmatpush1.bf16.msra.mxu1 %v3574_v21 }
 0x3a3   :  { %1590 = vmatprep.subr.bf16.mxu1 %v3582_v23 }
 0x3a4   :  { %1642 = vmatpush1.bf16.msra.mxu0 %v3577_v22 }
 0x3a5   :  { %1643 = vmatprep.subr.bf16.mxu0 %v3585_v26 }
 0x3a6   :  { %1591 = vmatpush1.bf16.msra.mxu1 %v3580_v25 }
 0x3a7   :  { %1592 = vmatprep.subr.bf16.mxu1 %v3588_v28 }
 0x3a8   :  { %1644 = vmatpush1.bf16.msra.mxu0 %v3583_v27 }
 0x3a9   :  { %1645 = vmatprep.subr.bf16.mxu0 %v3591_v29 }
 0x3aa   :  { %1593 = vmatpush1.bf16.msra.mxu1 %v3586_v30 }
 0x3ab   :  { %1594 = vmatprep.subr.bf16.mxu1 %v3594_v34  ;;  %v1872_v34 = vld [vmem:[%s6406_s7 + $0x5c0] sm:$0xff] }
 0x3ac   :  { %1646 = vmatpush1.bf16.msra.mxu0 %v3589_v33  ;;  %v1748_v33 = vld [vmem:[%s6406_s7 + $0x1e0] sm:$0xff] }
 0x3ad   :  { %1647 = vmatprep.subr.bf16.mxu0 %v3597_v35 }
 0x3ae   :  { %1595 = vmatpush1.bf16.msra.mxu1 %v3592_v36 }
 0x3af   :  { %1944 = vmatprep.subr.mxu1 %v1749_v41  ;;  %v1740_v41 = vld [vmem:[%s6406_s7 + $0x1a0] sm:$0xff] }
 0x3b0   :  { %1648 = vmatpush1.bf16.msra.mxu0 %v3595_v39  ;;  %v1741_v39 = vld [vmem:[%s6406_s7 + $0x1a8] sm:$0xff] }
 0x3b1   :  { %2033 = vmatprep.subr.mxu0 %v1877_v42  ;;  %v1868_v42 = vld [vmem:[%s6406_s7 + $0x5a0] sm:$0xff] }
 0x451   :  { %v3446_v43 = vpop.f32.mrf.mxu1 }
 0x453   :  { %v1227_v44 = vpop.f32.mrf.mxu1  ;;  %v3484_v45 = vpop.f32.mrf.mxu0 }
 0x454   :  { %v1246_v57 = vadd.f32 %v3446_v43, %v1227_v44  ;;  %v1737_v43 = vld [vmem:[%s6406_s7 + $0x188] sm:$0xff] }
 0x455   :  { %v3449_v52 = vpop.f32.mrf.mxu1  ;;  %v1325_v55 = vpop.f32.mrf.mxu0  ;;  %v1865_v44 = vld [vmem:[%s6406_s7 + $0x588] sm:$0xff] }
 0x456   :  { %v1344_v61 = vadd.f32 %v3484_v45, %v1325_v55  ;;  %v1864_v55 = vld [vmem:[%s6406_s7 + $0x580] sm:$0xff] }
 0x457   :  { %v1237_v59 = vpop.f32.mrf.mxu1  ;;  %v3487_v60 = vpop.f32.mrf.mxu0 }
 0x458   :  { %v1247_v62 = vadd.f32 %v1246_v57, %v1237_v59  ;;  %v1733_v57 = vld [vmem:[%s6406_s7 + $0x168] sm:$0xff] }
 0x459   :  { %v1335_v63 = vpop.f32.mrf.mxu0  ;;  %v1861_v59 = vld [vmem:[%s6406_s7 + $0x568] sm:$0xff] }
 0x45a   :  { %v1248_v0 = vadd.f32 %v3449_v52, %v1247_v62  ;;  %v1345_v1 = vadd.f32 %v1344_v61, %v1335_v63  ;;  %v1736_v52 = vld [vmem:[%s6406_s7 + $0x180] sm:$0xff]  ;;  %v1729_v62 = vld [vmem:[%s6406_s7 + $0x148] sm:$0xff] }
 0x45b   :  { %v1860_v61 = vld [vmem:[%s6406_s7 + $0x560] sm:$0xff]  ;;  %v1857_v63 = vld [vmem:[%s6406_s7 + $0x548] sm:$0xff] }
 0x45c   :  { %v1249_v2 = vrot.slane %v1248_v0, 4  ;;  %v1346_v4 = vadd.f32 %v3487_v60, %v1345_v1  ;;  %v1732_v60 = vld [vmem:[%s6406_s7 + $0x160] sm:$0xff] }
 0x45d   :  { %v1856_v1 = vld [vmem:[%s6406_s7 + $0x540] sm:$0xff] }
 0x45e   :  { %v1250_v5 = vadd.f32 %v1249_v2, %v1248_v0  ;;  %v1347_v6 = vrot.slane %v1346_v4, 4  ;;  %v1728_v0 = vld [vmem:[%s6406_s7 + $0x140] sm:$0xff]  ;;  %v1725_v2 = vld [vmem:[%s6406_s7 + $0x128] sm:$0xff] }
 0x460   :  { %v1251_v7 = vrot.slane %v1250_v5, 2  ;;  %v1348_v47 = vadd.f32 %v1347_v6, %v1346_v4  ;;  %v1853_v4 = vld [vmem:[%s6406_s7 + $0x528] sm:$0xff]  ;;  %v1852_v6 = vld [vmem:[%s6406_s7 + $0x520] sm:$0xff] }
 0x462   :  { %v1252_v48 = vadd.f32 %v1251_v7, %v1250_v5  ;;  %v1349_v53 = vrot.slane %v1348_v47, 2  ;;  %v1724_v5 = vld [vmem:[%s6406_s7 + $0x120] sm:$0xff]  ;;  %v1721_v7 = vld [vmem:[%s6406_s7 + $0x108] sm:$0xff] }
 0x464   :  { %v1253_v54 = vrot.slane %v1252_v48, 1  ;;  %v1350_v56 = vadd.f32 %v1349_v53, %v1348_v47  ;;  %v1849_v47 = vld [vmem:[%s6406_s7 + $0x508] sm:$0xff]  ;;  %v1848_v53 = vld [vmem:[%s6406_s7 + $0x500] sm:$0xff] }
 0x466   :  { %v1254_v58 = vadd.f32 %v1253_v54, %v1252_v48  ;;  %v1351_v8 = vrot.slane %v1350_v56, 1  ;;  %v1720_v48 = vld [vmem:[%s6406_s7 + $0x100] sm:$0xff]  ;;  %v1717_v54 = vld [vmem:[%s6406_s7 + $0xe8] sm:$0xff] }
 0x468   :  { %v1353_v9 = vmul.f32 0.001953125, %v1254_v58  ;;  %v1352_v10 = vadd.f32 %v1351_v8, %v1350_v56  ;;  %v1845_v56 = vld [vmem:[%s6406_s7 + $0x4e8] sm:$0xff]  ;;  %v1716_v58 = vld [vmem:[%s6406_s7 + $0xe0] sm:$0xff] }
 0x469   :  { %v1844_v8 = vld [vmem:[%s6406_s7 + $0x4e0] sm:$0xff] }
 0x46a   :  { %v1355_v11 = vmul.f32 %v1353_v9, %v1353_v9  ;;  %v1354_v12 = vmul.f32 0.001953125, %v1352_v10  ;;  %v1841_v10 = vld [vmem:[%s6406_s7 + $0x4c8] sm:$0xff] }
 0x46c   :  { %v1356_v13 = vsub.f32 %v1354_v12, %v1355_v11  ;;  %v1712_v11 = vld [vmem:[%s6406_s7 + $0xc0] sm:$0xff] }
 0x46d   :  { %v1840_v12 = vld [vmem:[%s6406_s7 + $0x4c0] sm:$0xff] }
 0x46e   :  { %v1357_v14 = vadd.f32 0.001, %v1356_v13  ;;  %v1709_v13 = vld [vmem:[%s6406_s7 + $0xa8] sm:$0xff] }
 0x470   :  { %3600 = vrsqrt.f32 %v1357_v14  ;;  %v1837_v14 = vld [vmem:[%s6406_s7 + $0x4a8] sm:$0xff] }
 0x47d   :  { %v3601_v16 = vpop.eup %3600 }
 0x47e   :  { %v1359_v24 = vmul.f32 %v3601_v16, %v1159_v32  ;;  %v1708_v32 = vld [vmem:[%s6406_s7 + $0xa0] sm:$0xff] }
 0x47f   :  { %v1836_v16 = vld [vmem:[%s6406_s7 + $0x4a0] sm:$0xff] }
 0x480   :  { %v1360_v49 = vmul.f32 %v1359_v24, %v1353_v9  ;;  %v1366_v15 = vrot.slane %v1359_v24, %v4109_v40  ;;  %v1713_v9 = vld [vmem:[%s6406_s7 + $0xc8] sm:$0xff] }
 0x481   :  { %v1705_v24 = vld [vmem:[%s6406_s7 + $0x88] sm:$0xff] }
 0x482   :  { %v1361_v17 = vsub.f32 %v1160_v38, %v1360_v49  ;;  %v1368_v18 = vmul.f32 %v1366_v15, %v4242_v3  ;;  %v1369_v19 = vmul.f32 %v1366_v15, %v4249_v50  ;;  %v1370_v26 = vmul.f32 %v1366_v15, %v4247_v46  ;;  %v1876_v3 = vld [vmem:[%s6406_s7 + $0x5e0] sm:$0xff]  ;;  %v1745_v50 = vld [vmem:[%s6406_s7 + $0x1c8] sm:$0xff] }
 0x483   :  { %v1371_v27 = vmul.f32 %v1366_v15, %v4251_v51  ;;  %v1873_v46 = vld [vmem:[%s6406_s7 + $0x5c8] sm:$0xff]  ;;  %v1744_v51 = vld [vmem:[%s6406_s7 + $0x1c0] sm:$0xff] }
 0x484   :  { %v1376_v20 = vrot.slane %v1361_v17, %v4109_v40  ;;  %v1833_v38 = vld [vmem:[%s6406_s7 + $0x488] sm:$0xff]  ;;  %v1704_v49 = vld [vmem:[%s6406_s7 + $0x80] sm:$0xff] }
 0x485   :  { %v1832_v15 = vld [vmem:[%s6406_s7 + $0x480] sm:$0xff]  ;;  %v1701_v17 = vld [vmem:[%s6406_s7 + $0x68] sm:$0xff] }
 0x486   :  { %v1378_v21 = vadd.f32 %v1376_v20, %v1368_v18  ;;  %v1379_v22 = vadd.f32 %v1376_v20, %v1369_v19  ;;  %v1380_v29 = vadd.f32 %v1376_v20, %v1370_v26  ;;  %v1381_v30 = vadd.f32 %v1376_v20, %v1371_v27  ;;  %v1829_v18 = vld [vmem:[%s6406_s7 + $0x468] sm:$0xff]  ;;  %v1700_v19 = vld [vmem:[%s6406_s7 + $0x60] sm:$0xff] }
 0x487   :  { %v1828_v20 = vld [vmem:[%s6406_s7 + $0x460] sm:$0xff]  ;;  %v1693_v26 = vld [vmem:[%s6406_s7 + $0x28] sm:$0xff] }
 0x488   :  { %v1382_v23 = vmax.f32 %v1378_v21, 0.0  ;;  %v1383_v25 = vmax.f32 %v1379_v22, 0.0  ;;  %v1384_v35 = vmax.f32 %v1380_v29, 0.0  ;;  %v1385_v36 = vmax.f32 %v1381_v30, 0.0  ;;  %v1697_v21 = vld [vmem:[%s6406_s7 + $0x48] sm:$0xff]  ;;  %v4556_v29 = vld [vmem:[%s6406_s7 + $0x420] sm:$0xff] }
 0x489   :  { %v1825_v22 = vld [vmem:[%s6406_s7 + $0x448] sm:$0xff] }
 0x48a   :  { %v1386_v28 = vpack.c.bf16 %v1383_v25, %v1382_v23  ;;  %v1387_v45 = vpack.c.bf16 %v1385_v36, %v1384_v35  ;;  %v1696_v23 = vld [vmem:[%s6406_s7 + $0x40] sm:$0xff]  ;;  %v1821_v27 = vld [vmem:[%s6406_s7 + $0x428] sm:$0xff] }
 0x48b   :  { %v1824_v25 = vld [vmem:[%s6406_s7 + $0x440] sm:$0xff]  ;;  %v4561_v30 = vld [vmem:[%s6406_s7 + $0x8] sm:$0xff] }
 0x48c   :  { %1613 = vmatmul.mubr.bf16.vlgmr.msra.gmra.mxu1 %v1386_v28  ;;  %1666 = vmatmul.mubr.bf16.vlgmr.msra.gmra.mxu0 %v1386_v28  ;;  %v4551_v28 = vld [vmem:[%s6406_s7 + $0x20] sm:$0xff]  ;;  %v4607_v36 = vld [vmem:[%s6406_s7 + $0x3c8] sm:$0xff] }
 0x48d   :  { %1622 = vmatprep.mubr.bf16.mxu1 %v3684_v31  ;;  %1675 = vmatprep.mubr.bf16.mxu0 %v3684_v31  ;;  %v1869_v31 = vld [vmem:[%s6406_s7 + $0x5a8] sm:$0xff]  ;;  %v4600_v35 = vld [vmem:[%s6406_s7 + $0x7e0] sm:$0xff] }
 0x48e   :  { %1945 = vmatpush1.msra.mxu1 %v1748_v33  ;;  %2034 = vmatpush1.msra.mxu0 %v1876_v3  ;;  %v4566_v33 = vld [vmem:[%s6406_s7 + $0x408] sm:$0xff]  ;;  %v4571_v3 = vld [vmem:[%s6406_s7] sm:$0xff] }
 0x48f   :  { %1946 = vmatprep.subr.mxu1 %v1745_v50  ;;  %2035 = vmatprep.subr.mxu0 %v1873_v46  ;;  %v4576_v50 = vld [vmem:[%s6406_s7 + $0x400] sm:$0xff]  ;;  %v4583_v46 = vld [vmem:[%s6406_s7 + $0x3e8] sm:$0xff] }
 0x490   :  { %1947 = vmatpush1.msra.mxu1 %v1744_v51  ;;  %2036 = vmatpush1.msra.mxu0 %v1872_v34  ;;  %v4588_v51 = vld [vmem:[%s6406_s7 + $0x7e8] sm:$0xff]  ;;  %v4595_v34 = vld [vmem:[%s6406_s7 + $0x3e0] sm:$0xff] }
 0x491   :  { %1948 = vmatprep.subr.mxu1 %v1741_v39  ;;  %2037 = vmatprep.subr.mxu0 %v1869_v31  ;;  %v4612_v39 = vld [vmem:[%s6406_s7 + $0x7c8] sm:$0xff]  ;;  %v4619_v31 = vld [vmem:[%s6406_s7 + $0x3c0] sm:$0xff] }
 0x492   :  { %1949 = vmatpush1.msra.mxu1 %v1740_v41  ;;  %2038 = vmatpush1.msra.mxu0 %v1868_v42  ;;  %v4624_v41 = vld [vmem:[%s6406_s7 + $0x7c0] sm:$0xff]  ;;  %v4631_v42 = vld [vmem:[%s6406_s7 + $0x3a8] sm:$0xff] }
 0x493   :  { %1950 = vmatprep.subr.mxu1 %v1737_v43  ;;  %2039 = vmatprep.subr.mxu0 %v1865_v44  ;;  %v4636_v43 = vld [vmem:[%s6406_s7 + $0x7a8] sm:$0xff]  ;;  %v4643_v44 = vld [vmem:[%s6406_s7 + $0x3a0] sm:$0xff] }
 0x494   :  { %1623 = vmatmul.mubr.bf16.gmra.mxu1 %v1387_v45  ;;  %1676 = vmatmul.mubr.bf16.gmra.mxu0 %v1387_v45  ;;  %v4648_v45 = vld [vmem:[%s6406_s7 + $0x7a0] sm:$0xff]  ;;  %v4919_v40 = vld [vmem:[%s6406_s7 + $0x228] sm:$0xff] }
 0x495   :  { %1951 = vmatpush1.msra.mxu1 %v1736_v52  ;;  %2040 = vmatpush1.msra.mxu0 %v1864_v55  ;;  %v4655_v52 = vld [vmem:[%s6406_s7 + $0x388] sm:$0xff]  ;;  %6611 = vst [vmem:[#allocation26_spill] sm:$0xff] %v4919_v40 }
 0x496   :  { %1952 = vmatprep.subr.mxu1 %v1733_v57  ;;  %2041 = vmatprep.subr.mxu0 %v1861_v59  ;;  %v4660_v55 = vld [vmem:[%s6406_s7 + $0x788] sm:$0xff]  ;;  %v4667_v57 = vld [vmem:[%s6406_s7 + $0x380] sm:$0xff] }
 0x497   :  { %1953 = vmatpush1.msra.mxu1 %v1732_v60  ;;  %2042 = vmatpush1.msra.mxu0 %v1860_v61  ;;  %v4672_v59 = vld [vmem:[%s6406_s7 + $0x780] sm:$0xff]  ;;  %v4679_v60 = vld [vmem:[%s6406_s7 + $0x368] sm:$0xff] }
 0x498   :  { %1954 = vmatprep.subr.mxu1 %v1729_v62  ;;  %2043 = vmatprep.subr.mxu0 %v1857_v63  ;;  %v4684_v61 = vld [vmem:[%s6406_s7 + $0x768] sm:$0xff]  ;;  %v4691_v62 = vld [vmem:[%s6406_s7 + $0x360] sm:$0xff] }
 0x499   :  { %1955 = vmatpush1.msra.mxu1 %v1728_v0  ;;  %2044 = vmatpush1.msra.mxu0 %v1856_v1  ;;  %v4696_v63 = vld [vmem:[%s6406_s7 + $0x760] sm:$0xff]  ;;  %v4703_v0 = vld [vmem:[%s6406_s7 + $0x348] sm:$0xff] }
 0x49a   :  { %1956 = vmatprep.subr.mxu1 %v1725_v2  ;;  %2045 = vmatprep.subr.mxu0 %v1853_v4  ;;  %v4708_v1 = vld [vmem:[%s6406_s7 + $0x748] sm:$0xff]  ;;  %v4715_v2 = vld [vmem:[%s6406_s7 + $0x340] sm:$0xff] }
 0x49b   :  { %1957 = vmatpush1.msra.mxu1 %v1724_v5  ;;  %2046 = vmatpush1.msra.mxu0 %v1852_v6  ;;  %v4720_v4 = vld [vmem:[%s6406_s7 + $0x740] sm:$0xff]  ;;  %v4727_v5 = vld [vmem:[%s6406_s7 + $0x328] sm:$0xff] }
 0x49c   :  { %1958 = vmatprep.subr.mxu1 %v1721_v7  ;;  %2047 = vmatprep.subr.mxu0 %v1849_v47  ;;  %v4732_v6 = vld [vmem:[%s6406_s7 + $0x728] sm:$0xff]  ;;  %v4739_v7 = vld [vmem:[%s6406_s7 + $0x320] sm:$0xff] }
 0x49d   :  { %1959 = vmatpush1.msra.mxu1 %v1720_v48  ;;  %2048 = vmatpush1.msra.mxu0 %v1848_v53  ;;  %v4744_v47 = vld [vmem:[%s6406_s7 + $0x720] sm:$0xff]  ;;  %v4751_v48 = vld [vmem:[%s6406_s7 + $0x308] sm:$0xff] }
 0x49e   :  { %1960 = vmatprep.subr.mxu1 %v1717_v54  ;;  %2049 = vmatprep.subr.mxu0 %v1845_v56  ;;  %v4756_v53 = vld [vmem:[%s6406_s7 + $0x708] sm:$0xff]  ;;  %v4763_v54 = vld [vmem:[%s6406_s7 + $0x300] sm:$0xff] }
 0x49f   :  { %1961 = vmatpush1.msra.mxu1 %v1716_v58  ;;  %2050 = vmatpush1.msra.mxu0 %v1844_v8  ;;  %v4768_v56 = vld [vmem:[%s6406_s7 + $0x700] sm:$0xff]  ;;  %v4775_v58 = vld [vmem:[%s6406_s7 + $0x2e8] sm:$0xff] }
 0x4a0   :  { %1962 = vmatprep.subr.mxu1 %v1713_v9  ;;  %2051 = vmatprep.subr.mxu0 %v1841_v10  ;;  %v4780_v8 = vld [vmem:[%s6406_s7 + $0x6e8] sm:$0xff]  ;;  %v4787_v9 = vld [vmem:[%s6406_s7 + $0x2e0] sm:$0xff] }
 0x4a1   :  { %1963 = vmatpush1.msra.mxu1 %v1712_v11  ;;  %2052 = vmatpush1.msra.mxu0 %v1840_v12  ;;  %6589 = vst [vmem:[#allocation4_spill] sm:$0xff] %v4787_v9  ;;  %v4792_v10 = vld [vmem:[%s6406_s7 + $0x6e0] sm:$0xff]  ;;  %v4799_v11 = vld [vmem:[%s6406_s7 + $0x2c8] sm:$0xff] }
 0x4a2   :  { %1964 = vmatprep.subr.mxu1 %v1709_v13  ;;  %2053 = vmatprep.subr.mxu0 %v1837_v14  ;;  %6590 = vst [vmem:[#allocation5_spill] sm:$0xff] %v4792_v10  ;;  %6591 = vst [vmem:[#allocation6_spill] sm:$0xff] %v4799_v11  ;;  %v4804_v12 = vld [vmem:[%s6406_s7 + $0x6c8] sm:$0xff]  ;;  %v4811_v13 = vld [vmem:[%s6406_s7 + $0x2c0] sm:$0xff] }
 0x4a3   :  { %1965 = vmatpush1.msra.mxu1 %v1708_v32  ;;  %2054 = vmatpush1.msra.mxu0 %v1836_v16  ;;  %6592 = vst [vmem:[#allocation7_spill] sm:$0xff] %v4804_v12  ;;  %6593 = vst [vmem:[#allocation8_spill] sm:$0xff] %v4811_v13  ;;  %v4816_v14 = vld [vmem:[%s6406_s7 + $0x6c0] sm:$0xff]  ;;  %v4823_v32 = vld [vmem:[%s6406_s7 + $0x2a8] sm:$0xff] }
 0x4a4   :  { %1966 = vmatprep.subr.mxu1 %v1705_v24  ;;  %2055 = vmatprep.subr.mxu0 %v1833_v38  ;;  %6594 = vst [vmem:[#allocation9_spill] sm:$0xff] %v4816_v14  ;;  %6595 = vst [vmem:[#allocation10_spill] sm:$0xff] %v4823_v32  ;;  %v4828_v16 = vld [vmem:[%s6406_s7 + $0x6a8] sm:$0xff]  ;;  %v4835_v24 = vld [vmem:[%s6406_s7 + $0x2a0] sm:$0xff] }
 0x4a5   :  { %1967 = vmatpush1.msra.mxu1 %v1704_v49  ;;  %2056 = vmatpush1.msra.mxu0 %v1832_v15  ;;  %6596 = vst [vmem:[#allocation11_spill] sm:$0xff] %v4828_v16  ;;  %6597 = vst [vmem:[#allocation12_spill] sm:$0xff] %v4835_v24  ;;  %v4840_v38 = vld [vmem:[%s6406_s7 + $0x6a0] sm:$0xff]  ;;  %v4847_v49 = vld [vmem:[%s6406_s7 + $0x288] sm:$0xff] }
 0x4a6   :  { %1968 = vmatprep.subr.mxu1 %v1701_v17  ;;  %2057 = vmatprep.subr.mxu0 %v1829_v18  ;;  %6598 = vst [vmem:[#allocation13_spill] sm:$0xff] %v4840_v38  ;;  %6599 = vst [vmem:[#allocation14_spill] sm:$0xff] %v4847_v49  ;;  %v4852_v15 = vld [vmem:[%s6406_s7 + $0x688] sm:$0xff]  ;;  %v4859_v17 = vld [vmem:[%s6406_s7 + $0x280] sm:$0xff] }
 0x4a7   :  { %1969 = vmatpush1.msra.mxu1 %v1700_v19  ;;  %2058 = vmatpush1.msra.mxu0 %v1828_v20  ;;  %6600 = vst [vmem:[#allocation15_spill] sm:$0xff] %v4852_v15  ;;  %6601 = vst [vmem:[#allocation16_spill] sm:$0xff] %v4859_v17  ;;  %v4864_v18 = vld [vmem:[%s6406_s7 + $0x680] sm:$0xff]  ;;  %v4871_v19 = vld [vmem:[%s6406_s7 + $0x268] sm:$0xff] }
 0x4a8   :  { %1970 = vmatprep.subr.mxu1 %v1697_v21  ;;  %2059 = vmatprep.subr.mxu0 %v1825_v22  ;;  %6602 = vst [vmem:[#allocation17_spill] sm:$0xff] %v4864_v18  ;;  %6603 = vst [vmem:[#allocation18_spill] sm:$0xff] %v4871_v19  ;;  %v4876_v20 = vld [vmem:[%s6406_s7 + $0x668] sm:$0xff]  ;;  %v4883_v21 = vld [vmem:[%s6406_s7 + $0x260] sm:$0xff] }
 0x4a9   :  { %1971 = vmatpush1.msra.mxu1 %v1696_v23  ;;  %2060 = vmatpush1.msra.mxu0 %v1824_v25  ;;  %6604 = vst [vmem:[#allocation19_spill] sm:$0xff] %v4876_v20  ;;  %6605 = vst [vmem:[#allocation20_spill] sm:$0xff] %v4883_v21  ;;  %v4888_v22 = vld [vmem:[%s6406_s7 + $0x660] sm:$0xff]  ;;  %v4895_v23 = vld [vmem:[%s6406_s7 + $0x248] sm:$0xff] }
 0x4aa   :  { %1972 = vmatprep.subr.mxu1 %v1693_v26  ;;  %2061 = vmatprep.subr.mxu0 %v1821_v27  ;;  %6606 = vst [vmem:[#allocation21_spill] sm:$0xff] %v4888_v22  ;;  %6607 = vst [vmem:[#allocation22_spill] sm:$0xff] %v4895_v23  ;;  %v4900_v25 = vld [vmem:[%s6406_s7 + $0x648] sm:$0xff]  ;;  %v4907_v26 = vld [vmem:[%s6406_s7 + $0x240] sm:$0xff] }
 0x4ab   :  { %1973 = vmatpush1.msra.mxu1 %v4551_v28  ;;  %2062 = vmatpush1.msra.mxu0 %v4556_v29  ;;  %6608 = vst [vmem:[#allocation23_spill] sm:$0xff] %v4900_v25  ;;  %6609 = vst [vmem:[#allocation24_spill] sm:$0xff] %v4907_v26  ;;  %v4912_v27 = vld [vmem:[%s6406_s7 + $0x640] sm:$0xff] }
 0x4ac   :  { %1974 = vmatprep.subr.mxu1 %v4561_v30  ;;  %2063 = vmatprep.subr.mxu0 %v4566_v33  ;;  %6610 = vst [vmem:[#allocation25_spill] sm:$0xff] %v4912_v27 }
 0x4ad   :  { %1975 = vmatpush1.msra.mxu1 %v4571_v3  ;;  %2064 = vmatpush1.msra.mxu0 %v4576_v50 }
 0x4ae   :  { %1976 = vmatprep.subr.mxu1 %v4583_v46  ;;  %2065 = vmatprep.subr.mxu0 %v4588_v51 }
 0x4af   :  { %1977 = vmatpush2.msra.mxu1 %v4595_v34  ;;  %2066 = vmatpush2.msra.mxu0 %v4600_v35 }
 0x4b0   :  { %1978 = vmatprep.subr.mxu1 %v4607_v36  ;;  %2067 = vmatprep.subr.mxu0 %v4612_v39 }
 0x4b1   :  { %1979 = vmatpush2.msra.mxu1 %v4619_v31  ;;  %2068 = vmatpush2.msra.mxu0 %v4624_v41 }
 0x4b2   :  { %1980 = vmatprep.subr.mxu1 %v4631_v42  ;;  %2069 = vmatprep.subr.mxu0 %v4636_v43 }
 0x4b3   :  { %1981 = vmatpush2.msra.mxu1 %v4643_v44  ;;  %2070 = vmatpush2.msra.mxu0 %v4648_v45 }
 0x4b4   :  { %1982 = vmatprep.subr.mxu1 %v4655_v52  ;;  %2071 = vmatprep.subr.mxu0 %v4660_v55 }
 0x4b5   :  { %1983 = vmatpush2.msra.mxu1 %v4667_v57  ;;  %2072 = vmatpush2.msra.mxu0 %v4672_v59 }
 0x4b6   :  { %1984 = vmatprep.subr.mxu1 %v4679_v60  ;;  %2073 = vmatprep.subr.mxu0 %v4684_v61 }
 0x4b7   :  { %1985 = vmatpush2.msra.mxu1 %v4691_v62  ;;  %2074 = vmatpush2.msra.mxu0 %v4696_v63 }
 0x4b8   :  { %1986 = vmatprep.subr.mxu1 %v4703_v0  ;;  %2075 = vmatprep.subr.mxu0 %v4708_v1 }
 0x4b9   :  { %1987 = vmatpush2.msra.mxu1 %v4715_v2  ;;  %2076 = vmatpush2.msra.mxu0 %v4720_v4 }
 0x4ba   :  { %1988 = vmatprep.subr.mxu1 %v4727_v5  ;;  %2077 = vmatprep.subr.mxu0 %v4732_v6 }
 0x4bb   :  { %1989 = vmatpush2.msra.mxu1 %v4739_v7  ;;  %2078 = vmatpush2.msra.mxu0 %v4744_v47 }
 0x4bc   :  { %1990 = vmatprep.subr.mxu1 %v4751_v48  ;;  %2079 = vmatprep.subr.mxu0 %v4756_v53 }
 0x4bd   :  { %1991 = vmatpush2.msra.mxu1 %v4763_v54  ;;  %2080 = vmatpush2.msra.mxu0 %v4768_v56 }
 0x4be   :  { %1992 = vmatprep.subr.mxu1 %v4775_v58  ;;  %2081 = vmatprep.subr.mxu0 %v4780_v8 }
 0x4bf   :  { %1993 = vmatpush2.msra.mxu1 %v4787_v9  ;;  %2082 = vmatpush2.msra.mxu0 %v4792_v10  ;;  %v5157_v10 = vld [vmem:[%s6406_s7 + $0x138] sm:$0xff] }
 0x4c0   :  { %1994 = vmatprep.subr.mxu1 %v4799_v11  ;;  %2083 = vmatprep.subr.mxu0 %v4804_v12  ;;  %6659 = vst [vmem:[#allocation74_spill] sm:$0xff] %v5157_v10  ;;  %v5162_v9 = vld [vmem:[%s6406_s7 + $0x538] sm:$0xff] }
 0x4c1   :  { %1995 = vmatpush2.msra.mxu1 %v4811_v13  ;;  %2084 = vmatpush2.msra.mxu0 %v4816_v14  ;;  %v5097_v14 = vld [vmem:[%s6406_s7 + $0x178] sm:$0xff]  ;;  %6660 = vst [vmem:[#allocation75_spill] sm:$0xff] %v5162_v9 }
 0x4c2   :  { %1996 = vmatprep.subr.mxu1 %v4823_v32  ;;  %2085 = vmatprep.subr.mxu0 %v4828_v16  ;;  %6647 = vst [vmem:[#allocation62_spill] sm:$0xff] %v5097_v14  ;;  %v5102_v13 = vld [vmem:[%s6406_s7 + $0x578] sm:$0xff] }
 0x4c3   :  { %1997 = vmatpush2.msra.mxu1 %v4835_v24  ;;  %2086 = vmatpush2.msra.mxu0 %v4840_v38  ;;  %v5037_v38 = vld [vmem:[%s6406_s7 + $0x1b8] sm:$0xff]  ;;  %6648 = vst [vmem:[#allocation63_spill] sm:$0xff] %v5102_v13 }
 0x4c4   :  { %1998 = vmatprep.subr.mxu1 %v4847_v49  ;;  %2087 = vmatprep.subr.mxu0 %v4852_v15  ;;  %6635 = vst [vmem:[#allocation50_spill] sm:$0xff] %v5037_v38  ;;  %v5042_v24 = vld [vmem:[%s6406_s7 + $0x5b8] sm:$0xff] }
 0x4c5   :  { %1999 = vmatpush2.msra.mxu1 %v4859_v17  ;;  %2088 = vmatpush2.msra.mxu0 %v4864_v18  ;;  %v5019_v18 = vld [vmem:[%s6406_s7 + $0x1d0] sm:$0xff]  ;;  %6636 = vst [vmem:[#allocation51_spill] sm:$0xff] %v5042_v24 }
 0x4c6   :  { %2000 = vmatprep.subr.mxu1 %v4871_v19  ;;  %2089 = vmatprep.subr.mxu0 %v4876_v20  ;;  %6631 = vst [vmem:[#allocation46_spill] sm:$0xff] %v5019_v18  ;;  %v5024_v17 = vld [vmem:[%s6406_s7 + $0x5d0] sm:$0xff] }
 0x4c7   :  { %2001 = vmatpush2.msra.mxu1 %v4883_v21  ;;  %2090 = vmatpush2.msra.mxu0 %v4888_v22  ;;  %v4935_v22 = vld [vmem:[%s6406_s7 + $0x220] sm:$0xff]  ;;  %6632 = vst [vmem:[#allocation47_spill] sm:$0xff] %v5024_v17 }
 0x4c8   :  { %2002 = vmatprep.subr.mxu1 %v4895_v23  ;;  %2091 = vmatprep.subr.mxu0 %v4900_v25  ;;  %6613 = vst [vmem:[#allocation28_spill] sm:$0xff] %v4935_v22  ;;  %v4940_v21 = vld [vmem:[%s6406_s7 + $0x620] sm:$0xff]  ;;  %v4991_v25 = vld [vmem:[%s6406_s7 + $0x1f0] sm:$0xff] }
 0x4c9   :  { %2003 = vmatpush2.msra.mxu1 %v4907_v26  ;;  %2092 = vmatpush2.msra.mxu0 %v4912_v27  ;;  %6614 = vst [vmem:[#allocation29_spill] sm:$0xff] %v4940_v21  ;;  %6625 = vst [vmem:[#allocation40_spill] sm:$0xff] %v4991_v25  ;;  %v4996_v23 = vld [vmem:[%s6406_s7 + $0x5f0] sm:$0xff] }
 0x4ca   :  { %2004 = vmatprep.subr.mxu1 %v4919_v40  ;;  %2093 = vmatprep.subr.mxu0 %v4924_v37  ;;  %v4947_v40 = vld [vmem:[%s6406_s7 + $0x208] sm:$0xff]  ;;  %6626 = vst [vmem:[#allocation41_spill] sm:$0xff] %v4996_v23 }
 0x4cb   :  { %2005 = vmatpush2.msra.mxu1 %v4935_v22  ;;  %2094 = vmatpush2.msra.mxu0 %v4940_v21  ;;  %6615 = vst [vmem:[#allocation30_spill] sm:$0xff] %v4947_v40  ;;  %v4952_v37 = vld [vmem:[%s6406_s7 + $0x608] sm:$0xff]  ;;  %v4959_v22 = vld [vmem:[%s6406_s7 + $0x200] sm:$0xff] }
 0x4cc   :  { %6616 = vst [vmem:[#allocation31_spill] sm:$0xff] %v4952_v37  ;;  %2006 = vmatprep.subr.mxu1 %v4947_v40  ;;  %2095 = vmatprep.subr.mxu0 %v4952_v37  ;;  %6617 = vst [vmem:[#allocation32_spill] sm:$0xff] %v4959_v22  ;;  %v4964_v21 = vld [vmem:[%s6406_s7 + $0x600] sm:$0xff]  ;;  %v4971_v40 = vld [vmem:[%s6406_s7 + $0x1f8] sm:$0xff] }
 0x4cd   :  { %6618 = vst [vmem:[#allocation33_spill] sm:$0xff] %v4964_v21  ;;  %2007 = vmatpush2.msra.mxu1 %v4959_v22  ;;  %2096 = vmatpush2.msra.mxu0 %v4964_v21  ;;  %6619 = vst [vmem:[#allocation34_spill] sm:$0xff] %v4971_v40  ;;  %v4976_v37 = vld [vmem:[%s6406_s7 + $0x5f8] sm:$0xff] }
 0x4ce   :  { %6620 = vst [vmem:[#allocation35_spill] sm:$0xff] %v4976_v37  ;;  %2122 = vmatprep.subr.mxu1 %v4971_v40  ;;  %2211 = vmatprep.subr.mxu0 %v4976_v37  ;;  %v5003_v37 = vld [vmem:[%s6406_s7 + $0x1d8] sm:$0xff] }
 0x4cf   :  { %6627 = vst [vmem:[#allocation42_spill] sm:$0xff] %v5003_v37  ;;  %v5008_v40 = vld [vmem:[%s6406_s7 + $0x5d8] sm:$0xff] }
 0x4d0   :  { %6628 = vst [vmem:[#allocation43_spill] sm:$0xff] %v5008_v40 }
 0x54c   :  { %v4980_v27 = vpop.f32.mrf.mxu1  ;;  %v4982_v26 = vpop.f32.mrf.mxu0 }
 0x54d   :  { %6621 = vst [vmem:[#allocation36_spill] sm:$0xff] %v4980_v27  ;;  %6622 = vst [vmem:[#allocation37_spill] sm:$0xff] %v4982_v26 }
 0x54e   :  { %v4984_v22 = vpop.f32.mrf.mxu1  ;;  %v4986_v21 = vpop.f32.mrf.mxu0 }
 0x54f   :  { %6623 = vst [vmem:[#allocation38_spill] sm:$0xff] %v4984_v22  ;;  %6624 = vst [vmem:[#allocation39_spill] sm:$0xff] %v4986_v21  ;;  %2008 = vmatprep.mubr.f32.mxu1 %v4984_v22  ;;  %2097 = vmatprep.mubr.f32.mxu0 %v4986_v21 }
 0x550   :  { %v5010_v20 = vpop.f32.mrf.mxu1  ;;  %v5012_v19 = vpop.f32.mrf.mxu0  ;;  %2009 = vmatmul.mubr.f32.vlgmr.msra.gmra.mxu1 %v4980_v27  ;;  %2098 = vmatmul.mubr.f32.vlgmr.msra.gmra.mxu0 %v4982_v26 }
 0x551   :  { %6629 = vst [vmem:[#allocation44_spill] sm:$0xff] %v5010_v20  ;;  %6630 = vst [vmem:[#allocation45_spill] sm:$0xff] %v5012_v19  ;;  %2123 = vmatpush1.msra.mxu1 %v4991_v25  ;;  %2212 = vmatpush1.msra.mxu0 %v4996_v23  ;;  %v5055_v23 = vld [vmem:[%s6406_s7 + $0x1b0] sm:$0xff] }
 0x552   :  { %2124 = vmatprep.subr.mxu1 %v5003_v37  ;;  %2213 = vmatprep.subr.mxu0 %v5008_v40  ;;  %v5030_v15 = vpop.f32.mrf.mxu1  ;;  %v5032_v49 = vpop.f32.mrf.mxu0  ;;  %6639 = vst [vmem:[#allocation54_spill] sm:$0xff] %v5055_v23  ;;  %v5060_v25 = vld [vmem:[%s6406_s7 + $0x5b0] sm:$0xff] }
 0x553   :  { %6633 = vst [vmem:[#allocation48_spill] sm:$0xff] %v5030_v15  ;;  %6634 = vst [vmem:[#allocation49_spill] sm:$0xff] %v5032_v49  ;;  %2125 = vmatpush1.msra.mxu1 %v5019_v18  ;;  %2214 = vmatpush1.msra.mxu0 %v5024_v17  ;;  %v5067_v17 = vld [vmem:[%s6406_s7 + $0x198] sm:$0xff] }
 0x554   :  { %2014 = vmatprep.mubr.f32.mxu1 %v5030_v15  ;;  %2103 = vmatprep.mubr.f32.mxu0 %v5032_v49  ;;  %v5048_v40 = vpop.f32.mrf.mxu1  ;;  %v5050_v37 = vpop.f32.mrf.mxu0  ;;  %6640 = vst [vmem:[#allocation55_spill] sm:$0xff] %v5060_v25  ;;  %6641 = vst [vmem:[#allocation56_spill] sm:$0xff] %v5067_v17  ;;  %v5072_v18 = vld [vmem:[%s6406_s7 + $0x598] sm:$0xff] }
 0x555   :  { %6637 = vst [vmem:[#allocation52_spill] sm:$0xff] %v5048_v40  ;;  %6638 = vst [vmem:[#allocation53_spill] sm:$0xff] %v5050_v37  ;;  %2126 = vmatprep.subr.mxu1 %v5037_v38  ;;  %2215 = vmatprep.subr.mxu0 %v5042_v24  ;;  %v5083_v24 = vld [vmem:[%s6406_s7 + $0x190] sm:$0xff] }
 0x556   :  { %6642 = vst [vmem:[#allocation57_spill] sm:$0xff] %v5072_v18  ;;  %2015 = vmatmul.mubr.f32.gmra.mxu1 %v5010_v20  ;;  %2104 = vmatmul.mubr.f32.gmra.mxu0 %v5012_v19  ;;  %v5076_v16 = vpop.f32.mrf.mxu1  ;;  %v5078_v32 = vpop.f32.mrf.mxu0  ;;  %6645 = vst [vmem:[#allocation60_spill] sm:$0xff] %v5083_v24  ;;  %v5088_v38 = vld [vmem:[%s6406_s7 + $0x590] sm:$0xff] }
 0x557   :  { %6643 = vst [vmem:[#allocation58_spill] sm:$0xff] %v5076_v16  ;;  %6644 = vst [vmem:[#allocation59_spill] sm:$0xff] %v5078_v32  ;;  %2127 = vmatpush1.msra.mxu1 %v5055_v23  ;;  %2216 = vmatpush1.msra.mxu0 %v5060_v25 }
 0x558   :  { %6646 = vst [vmem:[#allocation61_spill] sm:$0xff] %v5088_v38  ;;  %2128 = vmatprep.subr.mxu1 %v5067_v17  ;;  %2217 = vmatprep.subr.mxu0 %v5072_v18  ;;  %v5106_v23 = vpop.f32.mrf.mxu1  ;;  %v5108_v25 = vpop.f32.mrf.mxu0  ;;  %v5115_v18 = vld [vmem:[%s6406_s7 + $0x170] sm:$0xff] }
 0x559   :  { %2129 = vmatpush1.msra.mxu1 %v5083_v24  ;;  %2218 = vmatpush1.msra.mxu0 %v5088_v38  ;;  %6649 = vst [vmem:[#allocation64_spill] sm:$0xff] %v5106_v23  ;;  %6650 = vst [vmem:[#allocation65_spill] sm:$0xff] %v5108_v25  ;;  %v5120_v17 = vld [vmem:[%s6406_s7 + $0x570] sm:$0xff]  ;;  %v5127_v38 = vld [vmem:[%s6406_s7 + $0x158] sm:$0xff] }
 0x55a   :  { %2020 = vmatprep.mubr.f32.mxu1 %v5076_v16  ;;  %2109 = vmatprep.mubr.f32.mxu0 %v5078_v32  ;;  %6651 = vst [vmem:[#allocation66_spill] sm:$0xff] %v5115_v18  ;;  %6652 = vst [vmem:[#allocation67_spill] sm:$0xff] %v5120_v17  ;;  %v5132_v24 = vld [vmem:[%s6406_s7 + $0x558] sm:$0xff]  ;;  %v5148_v12 = vpop.f32.mrf.mxu1  ;;  %v5150_v11 = vpop.f32.mrf.mxu0 }
 0x55b   :  { %2130 = vmatprep.subr.mxu1 %v5097_v14  ;;  %2219 = vmatprep.subr.mxu0 %v5102_v13  ;;  %6653 = vst [vmem:[#allocation68_spill] sm:$0xff] %v5127_v38  ;;  %6654 = vst [vmem:[#allocation69_spill] sm:$0xff] %v5132_v24  ;;  %v5139_v14 = vld [vmem:[%s6406_s7 + $0x150] sm:$0xff] }
 0x55c   :  { %2021 = vmatmul.mubr.f32.gmra.mxu1 %v5048_v40  ;;  %2110 = vmatmul.mubr.f32.gmra.mxu0 %v5050_v37  ;;  %6655 = vst [vmem:[#allocation70_spill] sm:$0xff] %v5139_v14  ;;  %v5144_v13 = vld [vmem:[%s6406_s7 + $0x550] sm:$0xff]  ;;  %6657 = vst [vmem:[#allocation72_spill] sm:$0xff] %v5148_v12 }
 0x55d   :  { %6656 = vst [vmem:[#allocation71_spill] sm:$0xff] %v5144_v13  ;;  %2131 = vmatpush1.msra.mxu1 %v5115_v18  ;;  %2220 = vmatpush1.msra.mxu0 %v5120_v17  ;;  %6658 = vst [vmem:[#allocation73_spill] sm:$0xff] %v5150_v11  ;;  %v5226_v17 = vld [vmem:[%s6406_s7 + $0x4f0] sm:$0xff]  ;;  %v5238_v18 = vld [vmem:[%s6406_s7 + $0x4d8] sm:$0xff] }
 0x55e   :  { %2132 = vmatprep.subr.mxu1 %v5127_v38  ;;  %2221 = vmatprep.subr.mxu0 %v5132_v24  ;;  %v5171_v24 = vld [vmem:[%s6406_s7 + $0x130] sm:$0xff]  ;;  %6670 = vst [vmem:[#allocation85_spill] sm:$0xff] %v5226_v17  ;;  %6672 = vst [vmem:[#allocation87_spill] sm:$0xff] %v5238_v18 }
 0x55f   :  { %2133 = vmatpush1.msra.mxu1 %v5139_v14  ;;  %2222 = vmatpush1.msra.mxu0 %v5144_v13  ;;  %6661 = vst [vmem:[#allocation76_spill] sm:$0xff] %v5171_v24  ;;  %v5176_v38 = vld [vmem:[%s6406_s7 + $0x530] sm:$0xff]  ;;  %v5183_v13 = vld [vmem:[%s6406_s7 + $0x118] sm:$0xff] }
 0x560   :  { %2026 = vmatprep.mubr.f32.mxu1 %v5148_v12  ;;  %2115 = vmatprep.mubr.f32.mxu0 %v5150_v11  ;;  %6662 = vst [vmem:[#allocation77_spill] sm:$0xff] %v5176_v38  ;;  %6663 = vst [vmem:[#allocation78_spill] sm:$0xff] %v5183_v13  ;;  %v5190_v14 = vld [vmem:[%s6406_s7 + $0x518] sm:$0xff] }
 0x561   :  { %2134 = vmatprep.subr.mxu1 %v5157_v10  ;;  %2223 = vmatprep.subr.mxu0 %v5162_v9  ;;  %6664 = vst [vmem:[#allocation79_spill] sm:$0xff] %v5190_v14  ;;  %v5197_v9 = vld [vmem:[%s6406_s7 + $0x110] sm:$0xff] }
 0x562   :  { %2027 = vmatmul.mubr.f32.gmra.mxu1 %v5106_v23  ;;  %2116 = vmatmul.mubr.f32.gmra.mxu0 %v5108_v25  ;;  %6665 = vst [vmem:[#allocation80_spill] sm:$0xff] %v5197_v9  ;;  %v5202_v10 = vld [vmem:[%s6406_s7 + $0x510] sm:$0xff] }
 0x563   :  { %2135 = vmatpush1.msra.mxu1 %v5171_v24  ;;  %2224 = vmatpush1.msra.mxu0 %v5176_v38  ;;  %6666 = vst [vmem:[#allocation81_spill] sm:$0xff] %v5202_v10  ;;  %v5209_v24 = vld [vmem:[%s6406_s7 + $0xf8] sm:$0xff] }
 0x564   :  { %2136 = vmatprep.subr.mxu1 %v5183_v13  ;;  %2186 = vmatprep.mubr.f32.mxu1 %v4984_v22  ;;  %6667 = vst [vmem:[#allocation82_spill] sm:$0xff] %v5209_v24  ;;  %v5214_v38 = vld [vmem:[%s6406_s7 + $0x4f8] sm:$0xff]  ;;  %v5221_v13 = vld [vmem:[%s6406_s7 + $0xf0] sm:$0xff] }
 0x565   :  { %6668 = vst [vmem:[#allocation83_spill] sm:$0xff] %v5214_v38  ;;  %2225 = vmatprep.subr.mxu0 %v5190_v14  ;;  %2275 = vmatprep.mubr.f32.mxu0 %v4986_v21  ;;  %6669 = vst [vmem:[#allocation84_spill] sm:$0xff] %v5221_v13  ;;  %v5233_v14 = vld [vmem:[%s6406_s7 + $0xd8] sm:$0xff] }
 0x566   :  { %2137 = vmatpush1.msra.mxu1 %v5197_v9  ;;  %2226 = vmatpush1.msra.mxu0 %v5202_v10  ;;  %6671 = vst [vmem:[#allocation86_spill] sm:$0xff] %v5233_v14  ;;  %v5245_v9 = vld [vmem:[%s6406_s7 + $0xd0] sm:$0xff] }
 0x567   :  { %2138 = vmatprep.subr.mxu1 %v5209_v24  ;;  %2227 = vmatprep.subr.mxu0 %v5214_v38  ;;  %6673 = vst [vmem:[#allocation88_spill] sm:$0xff] %v5245_v9  ;;  %v5250_v10 = vld [vmem:[%s6406_s7 + $0x4d0] sm:$0xff]  ;;  %v5257_v24 = vld [vmem:[%s6406_s7 + $0xb8] sm:$0xff] }
 0x568   :  { %6674 = vst [vmem:[#allocation89_spill] sm:$0xff] %v5250_v10  ;;  %2139 = vmatpush1.msra.mxu1 %v5221_v13  ;;  %2228 = vmatpush1.msra.mxu0 %v5226_v17  ;;  %6675 = vst [vmem:[#allocation90_spill] sm:$0xff] %v5257_v24  ;;  %v5262_v38 = vld [vmem:[%s6406_s7 + $0x4b8] sm:$0xff]  ;;  %v5269_v13 = vld [vmem:[%s6406_s7 + $0xb0] sm:$0xff] }
 0x569   :  { %6676 = vst [vmem:[#allocation91_spill] sm:$0xff] %v5262_v38  ;;  %2140 = vmatprep.subr.mxu1 %v5233_v14  ;;  %2229 = vmatprep.subr.mxu0 %v5238_v18  ;;  %6677 = vst [vmem:[#allocation92_spill] sm:$0xff] %v5269_v13  ;;  %v5274_v17 = vld [vmem:[%s6406_s7 + $0x4b0] sm:$0xff]  ;;  %v5281_v14 = vld [vmem:[%s6406_s7 + $0x98] sm:$0xff] }
 0x56a   :  { %6678 = vst [vmem:[#allocation93_spill] sm:$0xff] %v5274_v17  ;;  %2141 = vmatpush1.msra.mxu1 %v5245_v9  ;;  %2230 = vmatpush1.msra.mxu0 %v5250_v10  ;;  %6679 = vst [vmem:[#allocation94_spill] sm:$0xff] %v5281_v14  ;;  %v5286_v18 = vld [vmem:[%s6406_s7 + $0x498] sm:$0xff]  ;;  %v5293_v9 = vld [vmem:[%s6406_s7 + $0x90] sm:$0xff] }
 0x56b   :  { %6680 = vst [vmem:[#allocation95_spill] sm:$0xff] %v5286_v18  ;;  %2142 = vmatprep.subr.mxu1 %v5257_v24  ;;  %2231 = vmatprep.subr.mxu0 %v5262_v38  ;;  %6681 = vst [vmem:[#allocation96_spill] sm:$0xff] %v5293_v9  ;;  %v5298_v10 = vld [vmem:[%s6406_s7 + $0x490] sm:$0xff]  ;;  %v5305_v24 = vld [vmem:[%s6406_s7 + $0x78] sm:$0xff] }
 0x56c   :  { %6682 = vst [vmem:[#allocation97_spill] sm:$0xff] %v5298_v10  ;;  %2143 = vmatpush1.msra.mxu1 %v5269_v13  ;;  %2232 = vmatpush1.msra.mxu0 %v5274_v17  ;;  %6683 = vst [vmem:[#allocation98_spill] sm:$0xff] %v5305_v24  ;;  %v5310_v38 = vld [vmem:[%s6406_s7 + $0x478] sm:$0xff]  ;;  %v5317_v13 = vld [vmem:[%s6406_s7 + $0x70] sm:$0xff] }
 0x56d   :  { %6684 = vst [vmem:[#allocation99_spill] sm:$0xff] %v5310_v38  ;;  %2144 = vmatprep.subr.mxu1 %v5281_v14  ;;  %2233 = vmatprep.subr.mxu0 %v5286_v18  ;;  %6685 = vst [vmem:[#allocation100_spill] sm:$0xff] %v5317_v13  ;;  %v5322_v17 = vld [vmem:[%s6406_s7 + $0x470] sm:$0xff]  ;;  %v5329_v14 = vld [vmem:[%s6406_s7 + $0x58] sm:$0xff] }
 0x56e   :  { %6686 = vst [vmem:[#allocation101_spill] sm:$0xff] %v5322_v17  ;;  %2145 = vmatpush1.msra.mxu1 %v5293_v9  ;;  %2234 = vmatpush1.msra.mxu0 %v5298_v10  ;;  %6687 = vst [vmem:[#allocation102_spill] sm:$0xff] %v5329_v14  ;;  %v5334_v18 = vld [vmem:[%s6406_s7 + $0x458] sm:$0xff]  ;;  %v5341_v9 = vld [vmem:[%s6406_s7 + $0x50] sm:$0xff] }
 0x56f   :  { %6688 = vst [vmem:[#allocation103_spill] sm:$0xff] %v5334_v18  ;;  %2146 = vmatprep.subr.mxu1 %v5305_v24  ;;  %2235 = vmatprep.subr.mxu0 %v5310_v38  ;;  %6689 = vst [vmem:[#allocation104_spill] sm:$0xff] %v5341_v9  ;;  %v5346_v10 = vld [vmem:[%s6406_s7 + $0x450] sm:$0xff]  ;;  %v5353_v24 = vld [vmem:[%s6406_s7 + $0x38] sm:$0xff] }
 0x570   :  { %6690 = vst [vmem:[#allocation105_spill] sm:$0xff] %v5346_v10  ;;  %2147 = vmatpush1.msra.mxu1 %v5317_v13  ;;  %2236 = vmatpush1.msra.mxu0 %v5322_v17  ;;  %6691 = vst [vmem:[#allocation106_spill] sm:$0xff] %v5353_v24  ;;  %v5358_v38 = vld [vmem:[%s6406_s7 + $0x438] sm:$0xff]  ;;  %v5365_v13 = vld [vmem:[%s6406_s7 + $0x30] sm:$0xff] }
 0x571   :  { %6692 = vst [vmem:[#allocation107_spill] sm:$0xff] %v5358_v38  ;;  %2148 = vmatprep.subr.mxu1 %v5329_v14  ;;  %2237 = vmatprep.subr.mxu0 %v5334_v18  ;;  %6693 = vst [vmem:[#allocation108_spill] sm:$0xff] %v5365_v13  ;;  %v5370_v17 = vld [vmem:[%s6406_s7 + $0x430] sm:$0xff]  ;;  %v5377_v14 = vld [vmem:[%s6406_s7 + $0x18] sm:$0xff] }
 0x572   :  { %6694 = vst [vmem:[#allocation109_spill] sm:$0xff] %v5370_v17  ;;  %2149 = vmatpush1.msra.mxu1 %v5341_v9  ;;  %2238 = vmatpush1.msra.mxu0 %v5346_v10  ;;  %6695 = vst [vmem:[#allocation110_spill] sm:$0xff] %v5377_v14  ;;  %v5382_v18 = vld [vmem:[%s6406_s7 + $0x418] sm:$0xff]  ;;  %v5389_v9 = vld [vmem:[%s6406_s7 + $0x10] sm:$0xff] }
 0x573   :  { %6696 = vst [vmem:[#allocation111_spill] sm:$0xff] %v5382_v18  ;;  %2150 = vmatprep.subr.mxu1 %v5353_v24  ;;  %2239 = vmatprep.subr.mxu0 %v5358_v38  ;;  %6697 = vst [vmem:[#allocation112_spill] sm:$0xff] %v5389_v9  ;;  %v5394_v10 = vld [vmem:[%s6406_s7 + $0x410] sm:$0xff]  ;;  %v5401_v24 = vld [vmem:[%s6406_s7 + $0x3f8] sm:$0xff] }
 0x574   :  { %6698 = vst [vmem:[#allocation113_spill] sm:$0xff] %v5394_v10  ;;  %2151 = vmatpush1.msra.mxu1 %v5365_v13  ;;  %2240 = vmatpush1.msra.mxu0 %v5370_v17  ;;  %6699 = vst [vmem:[#allocation114_spill] sm:$0xff] %v5401_v24  ;;  %v5406_v38 = vld [vmem:[%s6406_s7 + $0x7f8] sm:$0xff]  ;;  %v5413_v13 = vld [vmem:[%s6406_s7 + $0x3f0] sm:$0xff] }
 0x575   :  { %6700 = vst [vmem:[#allocation115_spill] sm:$0xff] %v5406_v38  ;;  %2152 = vmatprep.subr.mxu1 %v5377_v14  ;;  %2241 = vmatprep.subr.mxu0 %v5382_v18  ;;  %6701 = vst [vmem:[#allocation116_spill] sm:$0xff] %v5413_v13  ;;  %v5418_v17 = vld [vmem:[%s6406_s7 + $0x7f0] sm:$0xff]  ;;  %v5425_v14 = vld [vmem:[%s6406_s7 + $0x3d8] sm:$0xff] }
 0x576   :  { %6702 = vst [vmem:[#allocation117_spill] sm:$0xff] %v5418_v17  ;;  %2153 = vmatpush1.msra.mxu1 %v5389_v9  ;;  %2242 = vmatpush1.msra.mxu0 %v5394_v10  ;;  %6703 = vst [vmem:[#allocation118_spill] sm:$0xff] %v5425_v14  ;;  %v5430_v18 = vld [vmem:[%s6406_s7 + $0x7d8] sm:$0xff]  ;;  %v5437_v9 = vld [vmem:[%s6406_s7 + $0x3d0] sm:$0xff] }
 0x577   :  { %6704 = vst [vmem:[#allocation119_spill] sm:$0xff] %v5430_v18  ;;  %2154 = vmatprep.subr.mxu1 %v5401_v24  ;;  %2243 = vmatprep.subr.mxu0 %v5406_v38  ;;  %6705 = vst [vmem:[#allocation120_spill] sm:$0xff] %v5437_v9  ;;  %v5442_v10 = vld [vmem:[%s6406_s7 + $0x7d0] sm:$0xff]  ;;  %v5449_v24 = vld [vmem:[%s6406_s7 + $0x3b8] sm:$0xff] }
 0x578   :  { %6706 = vst [vmem:[#allocation121_spill] sm:$0xff] %v5442_v10  ;;  %2155 = vmatpush2.msra.mxu1 %v5413_v13  ;;  %2244 = vmatpush2.msra.mxu0 %v5418_v17  ;;  %6707 = vst [vmem:[#allocation122_spill] sm:$0xff] %v5449_v24  ;;  %v5454_v38 = vld [vmem:[%s6406_s7 + $0x7b8] sm:$0xff]  ;;  %v5461_v13 = vld [vmem:[%s6406_s7 + $0x3b0] sm:$0xff] }
 0x579   :  { %6708 = vst [vmem:[#allocation123_spill] sm:$0xff] %v5454_v38  ;;  %2156 = vmatprep.subr.mxu1 %v5425_v14  ;;  %2245 = vmatprep.subr.mxu0 %v5430_v18  ;;  %6709 = vst [vmem:[#allocation124_spill] sm:$0xff] %v5461_v13  ;;  %v5466_v17 = vld [vmem:[%s6406_s7 + $0x7b0] sm:$0xff]  ;;  %v5473_v14 = vld [vmem:[%s6406_s7 + $0x398] sm:$0xff] }
 0x57a   :  { %6710 = vst [vmem:[#allocation125_spill] sm:$0xff] %v5466_v17  ;;  %2157 = vmatpush2.msra.mxu1 %v5437_v9  ;;  %2246 = vmatpush2.msra.mxu0 %v5442_v10  ;;  %6711 = vst [vmem:[#allocation126_spill] sm:$0xff] %v5473_v14  ;;  %v5478_v18 = vld [vmem:[%s6406_s7 + $0x798] sm:$0xff]  ;;  %v5485_v9 = vld [vmem:[%s6406_s7 + $0x390] sm:$0xff] }
 0x57b   :  { %6712 = vst [vmem:[#allocation127_spill] sm:$0xff] %v5478_v18  ;;  %2158 = vmatprep.subr.mxu1 %v5449_v24  ;;  %2247 = vmatprep.subr.mxu0 %v5454_v38  ;;  %6713 = vst [vmem:[#allocation128_spill] sm:$0xff] %v5485_v9  ;;  %v5490_v10 = vld [vmem:[%s6406_s7 + $0x790] sm:$0xff]  ;;  %v5497_v24 = vld [vmem:[%s6406_s7 + $0x378] sm:$0xff] }
 0x57c   :  { %6714 = vst [vmem:[#allocation129_spill] sm:$0xff] %v5490_v10  ;;  %2159 = vmatpush2.msra.mxu1 %v5461_v13  ;;  %2248 = vmatpush2.msra.mxu0 %v5466_v17  ;;  %6715 = vst [vmem:[#allocation130_spill] sm:$0xff] %v5497_v24  ;;  %v5502_v38 = vld [vmem:[%s6406_s7 + $0x778] sm:$0xff]  ;;  %v5509_v13 = vld [vmem:[%s6406_s7 + $0x370] sm:$0xff] }
 0x57d   :  { %6716 = vst [vmem:[#allocation131_spill] sm:$0xff] %v5502_v38  ;;  %2160 = vmatprep.subr.mxu1 %v5473_v14  ;;  %2249 = vmatprep.subr.mxu0 %v5478_v18  ;;  %6717 = vst [vmem:[#allocation132_spill] sm:$0xff] %v5509_v13  ;;  %v5514_v17 = vld [vmem:[%s6406_s7 + $0x770] sm:$0xff]  ;;  %v5521_v14 = vld [vmem:[%s6406_s7 + $0x358] sm:$0xff] }
 0x57e   :  { %6718 = vst [vmem:[#allocation133_spill] sm:$0xff] %v5514_v17  ;;  %2161 = vmatpush2.msra.mxu1 %v5485_v9  ;;  %2250 = vmatpush2.msra.mxu0 %v5490_v10  ;;  %6719 = vst [vmem:[#allocation134_spill] sm:$0xff] %v5521_v14  ;;  %v5526_v18 = vld [vmem:[%s6406_s7 + $0x758] sm:$0xff]  ;;  %v5533_v9 = vld [vmem:[%s6406_s7 + $0x350] sm:$0xff] }
 0x57f   :  { %6720 = vst [vmem:[#allocation135_spill] sm:$0xff] %v5526_v18  ;;  %2162 = vmatprep.subr.mxu1 %v5497_v24  ;;  %2251 = vmatprep.subr.mxu0 %v5502_v38  ;;  %6721 = vst [vmem:[#allocation136_spill] sm:$0xff] %v5533_v9  ;;  %v5538_v10 = vld [vmem:[%s6406_s7 + $0x750] sm:$0xff]  ;;  %v5545_v24 = vld [vmem:[%s6406_s7 + $0x338] sm:$0xff] }
 0x580   :  { %6722 = vst [vmem:[#allocation137_spill] sm:$0xff] %v5538_v10  ;;  %2163 = vmatpush2.msra.mxu1 %v5509_v13  ;;  %2252 = vmatpush2.msra.mxu0 %v5514_v17  ;;  %6723 = vst [vmem:[#allocation138_spill] sm:$0xff] %v5545_v24  ;;  %v5550_v38 = vld [vmem:[%s6406_s7 + $0x738] sm:$0xff]  ;;  %v5557_v13 = vld [vmem:[%s6406_s7 + $0x330] sm:$0xff] }
 0x581   :  { %6724 = vst [vmem:[#allocation139_spill] sm:$0xff] %v5550_v38  ;;  %2164 = vmatprep.subr.mxu1 %v5521_v14  ;;  %2253 = vmatprep.subr.mxu0 %v5526_v18  ;;  %6725 = vst [vmem:[#allocation140_spill] sm:$0xff] %v5557_v13  ;;  %v5562_v17 = vld [vmem:[%s6406_s7 + $0x730] sm:$0xff]  ;;  %v5569_v14 = vld [vmem:[%s6406_s7 + $0x318] sm:$0xff] }
 0x582   :  { %6726 = vst [vmem:[#allocation141_spill] sm:$0xff] %v5562_v17  ;;  %2165 = vmatpush2.msra.mxu1 %v5533_v9  ;;  %2254 = vmatpush2.msra.mxu0 %v5538_v10  ;;  %6727 = vst [vmem:[#allocation142_spill] sm:$0xff] %v5569_v14  ;;  %v5574_v18 = vld [vmem:[%s6406_s7 + $0x718] sm:$0xff]  ;;  %v5581_v9 = vld [vmem:[%s6406_s7 + $0x310] sm:$0xff] }
 0x583   :  { %6728 = vst [vmem:[#allocation143_spill] sm:$0xff] %v5574_v18  ;;  %2166 = vmatprep.subr.mxu1 %v5545_v24  ;;  %2255 = vmatprep.subr.mxu0 %v5550_v38  ;;  %6729 = vst [vmem:[#allocation144_spill] sm:$0xff] %v5581_v9  ;;  %v5586_v10 = vld [vmem:[%s6406_s7 + $0x710] sm:$0xff]  ;;  %v5593_v24 = vld [vmem:[%s6406_s7 + $0x2f8] sm:$0xff] }
 0x584   :  { %6730 = vst [vmem:[#allocation145_spill] sm:$0xff] %v5586_v10  ;;  %2167 = vmatpush2.msra.mxu1 %v5557_v13  ;;  %2256 = vmatpush2.msra.mxu0 %v5562_v17  ;;  %6731 = vst [vmem:[#allocation146_spill] sm:$0xff] %v5593_v24  ;;  %v5598_v38 = vld [vmem:[%s6406_s7 + $0x6f8] sm:$0xff]  ;;  %v5605_v13 = vld [vmem:[%s6406_s7 + $0x2f0] sm:$0xff] }
 0x585   :  { %6732 = vst [vmem:[#allocation147_spill] sm:$0xff] %v5598_v38  ;;  %2168 = vmatprep.subr.mxu1 %v5569_v14  ;;  %2257 = vmatprep.subr.mxu0 %v5574_v18  ;;  %6733 = vst [vmem:[#allocation148_spill] sm:$0xff] %v5605_v13  ;;  %v5610_v17 = vld [vmem:[%s6406_s7 + $0x6f0] sm:$0xff]  ;;  %v5617_v14 = vld [vmem:[%s6406_s7 + $0x2d8] sm:$0xff] }
 0x586   :  { %6734 = vst [vmem:[#allocation149_spill] sm:$0xff] %v5610_v17  ;;  %2169 = vmatpush2.msra.mxu1 %v5581_v9  ;;  %2258 = vmatpush2.msra.mxu0 %v5586_v10  ;;  %6735 = vst [vmem:[#allocation150_spill] sm:$0xff] %v5617_v14  ;;  %v5622_v18 = vld [vmem:[%s6406_s7 + $0x6d8] sm:$0xff]  ;;  %v5629_v9 = vld [vmem:[%s6406_s7 + $0x2d0] sm:$0xff] }
 0x587   :  { %6736 = vst [vmem:[#allocation151_spill] sm:$0xff] %v5622_v18  ;;  %2170 = vmatprep.subr.mxu1 %v5593_v24  ;;  %2259 = vmatprep.subr.mxu0 %v5598_v38  ;;  %6737 = vst [vmem:[#allocation152_spill] sm:$0xff] %v5629_v9  ;;  %v5634_v10 = vld [vmem:[%s6406_s7 + $0x6d0] sm:$0xff]  ;;  %v5641_v24 = vld [vmem:[%s6406_s7 + $0x2b8] sm:$0xff] }
 0x588   :  { %6738 = vst [vmem:[#allocation153_spill] sm:$0xff] %v5634_v10  ;;  %2171 = vmatpush2.msra.mxu1 %v5605_v13  ;;  %2260 = vmatpush2.msra.mxu0 %v5610_v17  ;;  %6739 = vst [vmem:[#allocation154_spill] sm:$0xff] %v5641_v24  ;;  %v5646_v38 = vld [vmem:[%s6406_s7 + $0x6b8] sm:$0xff]  ;;  %v5653_v13 = vld [vmem:[%s6406_s7 + $0x2b0] sm:$0xff] }
 0x589   :  { %6740 = vst [vmem:[#allocation155_spill] sm:$0xff] %v5646_v38  ;;  %2172 = vmatprep.subr.mxu1 %v5617_v14  ;;  %2261 = vmatprep.subr.mxu0 %v5622_v18  ;;  %6741 = vst [vmem:[#allocation156_spill] sm:$0xff] %v5653_v13  ;;  %v5658_v17 = vld [vmem:[%s6406_s7 + $0x6b0] sm:$0xff]  ;;  %v5665_v14 = vld [vmem:[%s6406_s7 + $0x298] sm:$0xff] }
 0x58a   :  { %6742 = vst [vmem:[#allocation157_spill] sm:$0xff] %v5658_v17  ;;  %2173 = vmatpush2.msra.mxu1 %v5629_v9  ;;  %2262 = vmatpush2.msra.mxu0 %v5634_v10  ;;  %6743 = vst [vmem:[#allocation158_spill] sm:$0xff] %v5665_v14  ;;  %v5670_v18 = vld [vmem:[%s6406_s7 + $0x698] sm:$0xff]  ;;  %v5677_v9 = vld [vmem:[%s6406_s7 + $0x290] sm:$0xff] }
 0x58b   :  { %6744 = vst [vmem:[#allocation159_spill] sm:$0xff] %v5670_v18  ;;  %2174 = vmatprep.subr.mxu1 %v5641_v24  ;;  %2263 = vmatprep.subr.mxu0 %v5646_v38  ;;  %6745 = vst [vmem:[#allocation160_spill] sm:$0xff] %v5677_v9  ;;  %v5682_v10 = vld [vmem:[%s6406_s7 + $0x690] sm:$0xff]  ;;  %v5689_v24 = vld [vmem:[%s6406_s7 + $0x278] sm:$0xff] }
 0x58c   :  { %6746 = vst [vmem:[#allocation161_spill] sm:$0xff] %v5682_v10  ;;  %2175 = vmatpush2.msra.mxu1 %v5653_v13  ;;  %2264 = vmatpush2.msra.mxu0 %v5658_v17  ;;  %6747 = vst [vmem:[#allocation162_spill] sm:$0xff] %v5689_v24  ;;  %v5694_v38 = vld [vmem:[%s6406_s7 + $0x678] sm:$0xff]  ;;  %v5701_v13 = vld [vmem:[%s6406_s7 + $0x270] sm:$0xff] }
 0x58d   :  { %6748 = vst [vmem:[#allocation163_spill] sm:$0xff] %v5694_v38  ;;  %2176 = vmatprep.subr.mxu1 %v5665_v14  ;;  %2265 = vmatprep.subr.mxu0 %v5670_v18  ;;  %6749 = vst [vmem:[#allocation164_spill] sm:$0xff] %v5701_v13  ;;  %v5706_v17 = vld [vmem:[%s6406_s7 + $0x670] sm:$0xff]  ;;  %v5713_v14 = vld [vmem:[%s6406_s7 + $0x258] sm:$0xff] }
 0x58e   :  { %6750 = vst [vmem:[#allocation165_spill] sm:$0xff] %v5706_v17  ;;  %2177 = vmatpush2.msra.mxu1 %v5677_v9  ;;  %2266 = vmatpush2.msra.mxu0 %v5682_v10  ;;  %6751 = vst [vmem:[#allocation166_spill] sm:$0xff] %v5713_v14  ;;  %v5718_v18 = vld [vmem:[%s6406_s7 + $0x658] sm:$0xff]  ;;  %v5725_v9 = vld [vmem:[%s6406_s7 + $0x250] sm:$0xff] }
 0x58f   :  { %6752 = vst [vmem:[#allocation167_spill] sm:$0xff] %v5718_v18  ;;  %2178 = vmatprep.subr.mxu1 %v5689_v24  ;;  %2267 = vmatprep.subr.mxu0 %v5694_v38  ;;  %6753 = vst [vmem:[#allocation168_spill] sm:$0xff] %v5725_v9  ;;  %v5730_v10 = vld [vmem:[%s6406_s7 + $0x650] sm:$0xff]  ;;  %v5737_v24 = vld [vmem:[%s6406_s7 + $0x238] sm:$0xff] }
 0x590   :  { %6754 = vst [vmem:[#allocation169_spill] sm:$0xff] %v5730_v10  ;;  %2179 = vmatpush2.msra.mxu1 %v5701_v13  ;;  %2268 = vmatpush2.msra.mxu0 %v5706_v17  ;;  %v5742_v38 = vld [vmem:[%s6406_s7 + $0x638] sm:$0xff]  ;;  %v5749_v13 = vld [vmem:[%s6406_s7 + $0x230] sm:$0xff] }
 0x591   :  { %6755 = vst [vmem:[#allocation170_spill] sm:$0xff] %v5742_v38  ;;  %2180 = vmatprep.subr.mxu1 %v5713_v14  ;;  %2269 = vmatprep.subr.mxu0 %v5718_v18  ;;  %v5754_v17 = vld [vmem:[%s6406_s7 + $0x630] sm:$0xff]  ;;  %v5761_v14 = vld [vmem:[%s6406_s7 + $0x218] sm:$0xff] }
 0x592   :  { %6756 = vst [vmem:[#allocation171_spill] sm:$0xff] %v5754_v17  ;;  %2181 = vmatpush2.msra.mxu1 %v5725_v9  ;;  %2270 = vmatpush2.msra.mxu0 %v5730_v10  ;;  %v5766_v18 = vld [vmem:[%s6406_s7 + $0x618] sm:$0xff]  ;;  %v5773_v9 = vld [vmem:[%s6406_s7 + $0x210] sm:$0xff] }
 0x593   :  { %6757 = vst [vmem:[#allocation172_spill] sm:$0xff] %v5766_v18  ;;  %2182 = vmatprep.subr.mxu1 %v5737_v24  ;;  %2271 = vmatprep.subr.mxu0 %v5742_v38  ;;  %6758 = vst [vmem:[#allocation173_spill] sm:$0xff] %v5773_v9  ;;  %v5778_v10 = vld [vmem:[%s6406_s7 + $0x610] sm:$0xff]  ;;  %v3610_v38 = vld [vmem:[%s6406_s7 + $0x1e8] sm:$0xff] }
 0x594   :  { %6759 = vst [vmem:[#allocation174_spill] sm:$0xff] %v5778_v10  ;;  %2183 = vmatpush2.msra.mxu1 %v5749_v13  ;;  %2272 = vmatpush2.msra.mxu0 %v5754_v17  ;;  %v3611_v17 = vld [vmem:[%s6406_s7 + $0x5e8] sm:$0xff] }
 0x595   :  { %2184 = vmatprep.subr.mxu1 %v5761_v14  ;;  %2273 = vmatprep.subr.mxu0 %v5766_v18  ;;  %v3616_v18 = vld [vmem:[%s6406_s7 + $0x1c0] sm:$0xff] }
 0x596   :  { %2185 = vmatpush2.msra.mxu1 %v5773_v9  ;;  %2274 = vmatpush2.msra.mxu0 %v5778_v10  ;;  %v3612_v10 = vld [vmem:[%s6406_s7 + $0x1e0] sm:$0xff] }
 0x597   :  { %2187 = vmatmul.mubr.f32.vlgmr.msra.gmra.mxu1 %v4980_v27  ;;  %2276 = vmatmul.mubr.f32.vlgmr.msra.gmra.mxu0 %v4982_v26  ;;  %v3613_v9 = vld [vmem:[%s6406_s7 + $0x5e0] sm:$0xff] }
 0x598   :  { %2352 = vmatprep.subr.mxu1 %v3610_v38  ;;  %2441 = vmatprep.subr.mxu0 %v3611_v17  ;;  %v3614_v38 = vld [vmem:[%s6406_s7 + $0x1c8] sm:$0xff] }
 0x599   :  { %2192 = vmatprep.mubr.f32.mxu1 %v5030_v15  ;;  %2281 = vmatprep.mubr.f32.mxu0 %v5032_v49  ;;  %v3615_v17 = vld [vmem:[%s6406_s7 + $0x5c8] sm:$0xff] }
 0x59a   :  { %2353 = vmatpush1.msra.mxu1 %v3612_v10  ;;  %2442 = vmatpush1.msra.mxu0 %v3613_v9  ;;  %v3617_v10 = vld [vmem:[%s6406_s7 + $0x5c0] sm:$0xff]  ;;  %v3618_v9 = vld [vmem:[%s6406_s7 + $0x1a8] sm:$0xff] }
 0x59b   :  { %2354 = vmatprep.subr.mxu1 %v3614_v38  ;;  %2443 = vmatprep.subr.mxu0 %v3615_v17  ;;  %v3619_v38 = vld [vmem:[%s6406_s7 + $0x5a8] sm:$0xff]  ;;  %v3621_v17 = vld [vmem:[%s6406_s7 + $0x5a0] sm:$0xff] }
 0x59c   :  { %2355 = vmatpush1.msra.mxu1 %v3616_v18  ;;  %2444 = vmatpush1.msra.mxu0 %v3617_v10  ;;  %v3620_v18 = vld [vmem:[%s6406_s7 + $0x1a0] sm:$0xff]  ;;  %v3622_v10 = vld [vmem:[%s6406_s7 + $0x188] sm:$0xff] }
 0x59d   :  { %2193 = vmatmul.mubr.f32.gmra.mxu1 %v5010_v20  ;;  %2282 = vmatmul.mubr.f32.gmra.mxu0 %v5012_v19 }
 0x59e   :  { %2356 = vmatprep.subr.mxu1 %v3618_v9  ;;  %2445 = vmatprep.subr.mxu0 %v3619_v38  ;;  %v3623_v9 = vld [vmem:[%s6406_s7 + $0x588] sm:$0xff]  ;;  %v3624_v38 = vld [vmem:[%s6406_s7 + $0x180] sm:$0xff] }
 0x59f   :  { %2198 = vmatprep.mubr.f32.mxu1 %v5076_v16  ;;  %2287 = vmatprep.mubr.f32.mxu0 %v5078_v32 }
 0x5a0   :  { %2357 = vmatpush1.msra.mxu1 %v3620_v18  ;;  %2446 = vmatpush1.msra.mxu0 %v3621_v17  ;;  %v3625_v18 = vld [vmem:[%s6406_s7 + $0x580] sm:$0xff]  ;;  %v3626_v17 = vld [vmem:[%s6406_s7 + $0x168] sm:$0xff] }
 0x5a1   :  { %2358 = vmatprep.subr.mxu1 %v3622_v10  ;;  %2447 = vmatprep.subr.mxu0 %v3623_v9  ;;  %v3627_v10 = vld [vmem:[%s6406_s7 + $0x568] sm:$0xff]  ;;  %v3628_v9 = vld [vmem:[%s6406_s7 + $0x160] sm:$0xff] }
 0x5a2   :  { %2359 = vmatpush1.msra.mxu1 %v3624_v38  ;;  %2448 = vmatpush1.msra.mxu0 %v3625_v18  ;;  %v3629_v38 = vld [vmem:[%s6406_s7 + $0x560] sm:$0xff]  ;;  %v3630_v18 = vld [vmem:[%s6406_s7 + $0x148] sm:$0xff] }
 0x5a3   :  { %2199 = vmatmul.mubr.f32.gmra.mxu1 %v5048_v40  ;;  %2288 = vmatmul.mubr.f32.gmra.mxu0 %v5050_v37 }
 0x5a4   :  { %2360 = vmatprep.subr.mxu1 %v3626_v17  ;;  %2449 = vmatprep.subr.mxu0 %v3627_v10  ;;  %v3631_v17 = vld [vmem:[%s6406_s7 + $0x548] sm:$0xff]  ;;  %v3632_v10 = vld [vmem:[%s6406_s7 + $0x140] sm:$0xff] }
 0x5a5   :  { %2204 = vmatprep.mubr.f32.mxu1 %v5148_v12  ;;  %2293 = vmatprep.mubr.f32.mxu0 %v5150_v11 }
 0x5a6   :  { %2361 = vmatpush1.msra.mxu1 %v3628_v9  ;;  %2450 = vmatpush1.msra.mxu0 %v3629_v38  ;;  %v3633_v9 = vld [vmem:[%s6406_s7 + $0x540] sm:$0xff]  ;;  %v5874_v38 = vmul.f32 %v4984_v22, %v4984_v22  ;;  %v3642_v22 = vld [vmem:[%s6406_s7 + $0xe8] sm:$0xff] }
 0x5a7   :  { %2362 = vmatprep.subr.mxu1 %v3630_v18  ;;  %2451 = vmatprep.subr.mxu0 %v3631_v17  ;;  %v3634_v18 = vld [vmem:[%s6406_s7 + $0x128] sm:$0xff] }
 0x5a8   :  { %2363 = vmatpush1.msra.mxu1 %v3632_v10  ;;  %2452 = vmatpush1.msra.mxu0 %v3633_v9  ;;  %v3635_v17 = vld [vmem:[%s6406_s7 + $0x528] sm:$0xff]  ;;  %v5884_v10 = vmul.f32 %v4986_v21, %v4986_v21  ;;  %v3636_v9 = vld [vmem:[%s6406_s7 + $0x120] sm:$0xff] }
 0x5a9   :  { %2205 = vmatmul.mubr.f32.gmra.mxu1 %v5106_v23  ;;  %2294 = vmatmul.mubr.f32.gmra.mxu0 %v5108_v25  ;;  %v3639_v21 = vld [vmem:[%s6406_s7 + $0x508] sm:$0xff] }
 0x5aa   :  { %2364 = vmatprep.subr.mxu1 %v3634_v18  ;;  %2453 = vmatprep.subr.mxu0 %v3635_v17  ;;  %v3637_v18 = vld [vmem:[%s6406_s7 + $0x520] sm:$0xff]  ;;  %v3638_v17 = vld [vmem:[%s6406_s7 + $0x108] sm:$0xff] }
 0x5ab   :  { %2365 = vmatpush1.msra.mxu1 %v3636_v9  ;;  %2416 = vmatprep.mubr.f32.mxu1 %v5874_v38  ;;  %v3640_v9 = vld [vmem:[%s6406_s7 + $0x100] sm:$0xff] }
 0x5ac   :  { %2454 = vmatpush1.msra.mxu0 %v3637_v18  ;;  %2505 = vmatprep.mubr.f32.mxu0 %v5884_v10  ;;  %v3641_v18 = vld [vmem:[%s6406_s7 + $0x500] sm:$0xff] }
 0x5ad   :  { %2366 = vmatprep.subr.mxu1 %v3638_v17  ;;  %2455 = vmatprep.subr.mxu0 %v3639_v21  ;;  %v3643_v17 = vld [vmem:[%s6406_s7 + $0x4e8] sm:$0xff]  ;;  %v3644_v21 = vld [vmem:[%s6406_s7 + $0xe0] sm:$0xff] }
 0x5ae   :  { %2367 = vmatpush1.msra.mxu1 %v3640_v9  ;;  %2456 = vmatpush1.msra.mxu0 %v3641_v18  ;;  %v3645_v9 = vld [vmem:[%s6406_s7 + $0x4e0] sm:$0xff]  ;;  %v3646_v18 = vld [vmem:[%s6406_s7 + $0xc8] sm:$0xff] }
 0x5af   :  { %2368 = vmatprep.subr.mxu1 %v3642_v22  ;;  %2457 = vmatprep.subr.mxu0 %v3643_v17  ;;  %v3647_v22 = vld [vmem:[%s6406_s7 + $0x4c8] sm:$0xff]  ;;  %v3648_v17 = vld [vmem:[%s6406_s7 + $0xc0] sm:$0xff] }
 0x5b0   :  { %2369 = vmatpush1.msra.mxu1 %v3644_v21  ;;  %2458 = vmatpush1.msra.mxu0 %v3645_v9  ;;  %v3649_v21 = vld [vmem:[%s6406_s7 + $0x4c0] sm:$0xff]  ;;  %v3650_v9 = vld [vmem:[%s6406_s7 + $0xa8] sm:$0xff] }
 0x5b1   :  { %2370 = vmatprep.subr.mxu1 %v3646_v18  ;;  %2459 = vmatprep.subr.mxu0 %v3647_v22  ;;  %v3651_v18 = vld [vmem:[%s6406_s7 + $0x4a8] sm:$0xff]  ;;  %v3652_v22 = vld [vmem:[%s6406_s7 + $0xa0] sm:$0xff] }
 0x5b2   :  { %2371 = vmatpush1.msra.mxu1 %v3648_v17  ;;  %2460 = vmatpush1.msra.mxu0 %v3649_v21  ;;  %v3653_v17 = vld [vmem:[%s6406_s7 + $0x4a0] sm:$0xff]  ;;  %v3654_v21 = vld [vmem:[%s6406_s7 + $0x88] sm:$0xff] }
 0x5b3   :  { %2372 = vmatprep.subr.mxu1 %v3650_v9  ;;  %2461 = vmatprep.subr.mxu0 %v3651_v18  ;;  %v3655_v9 = vld [vmem:[%s6406_s7 + $0x488] sm:$0xff]  ;;  %v3656_v18 = vld [vmem:[%s6406_s7 + $0x80] sm:$0xff] }
 0x5b4   :  { %2373 = vmatpush1.msra.mxu1 %v3652_v22  ;;  %2462 = vmatpush1.msra.mxu0 %v3653_v17  ;;  %v3657_v22 = vld [vmem:[%s6406_s7 + $0x480] sm:$0xff]  ;;  %v3658_v17 = vld [vmem:[%s6406_s7 + $0x68] sm:$0xff] }
 0x5b5   :  { %2374 = vmatprep.subr.mxu1 %v3654_v21  ;;  %2463 = vmatprep.subr.mxu0 %v3655_v9  ;;  %v3659_v21 = vld [vmem:[%s6406_s7 + $0x468] sm:$0xff]  ;;  %v3660_v9 = vld [vmem:[%s6406_s7 + $0x60] sm:$0xff] }
 0x5b6   :  { %2375 = vmatpush1.msra.mxu1 %v3656_v18  ;;  %2464 = vmatpush1.msra.mxu0 %v3657_v22  ;;  %v3661_v18 = vld [vmem:[%s6406_s7 + $0x460] sm:$0xff]  ;;  %v3662_v22 = vld [vmem:[%s6406_s7 + $0x48] sm:$0xff] }
 0x5b7   :  { %2376 = vmatprep.subr.mxu1 %v3658_v17  ;;  %2465 = vmatprep.subr.mxu0 %v3659_v21  ;;  %v3663_v17 = vld [vmem:[%s6406_s7 + $0x448] sm:$0xff]  ;;  %v3664_v21 = vld [vmem:[%s6406_s7 + $0x40] sm:$0xff] }
 0x5b8   :  { %2377 = vmatpush1.msra.mxu1 %v3660_v9  ;;  %2466 = vmatpush1.msra.mxu0 %v3661_v18  ;;  %v3665_v9 = vld [vmem:[%s6406_s7 + $0x440] sm:$0xff]  ;;  %v3666_v18 = vld [vmem:[%s6406_s7 + $0x28] sm:$0xff] }
 0x5b9   :  { %2378 = vmatprep.subr.mxu1 %v3662_v22  ;;  %2467 = vmatprep.subr.mxu0 %v3663_v17  ;;  %v3667_v22 = vld [vmem:[%s6406_s7 + $0x428] sm:$0xff]  ;;  %v6082_v17 = vmul.f32 %v5010_v20, %v5010_v20 }
 0x5ba   :  { %2379 = vmatpush1.msra.mxu1 %v3664_v21  ;;  %2468 = vmatpush1.msra.mxu0 %v3665_v9  ;;  %v6086_v21 = vmul.f32 %v5012_v19, %v5012_v19  ;;  %v6796_v9 = vld [vmem:[#allocation46_spill] sm:$0xff] }
 0x5bb   :  { %2380 = vmatprep.subr.mxu1 %v3666_v18  ;;  %2469 = vmatprep.subr.mxu0 %v3667_v22  ;;  %v6797_v18 = vld [vmem:[#allocation47_spill] sm:$0xff]  ;;  %v6094_v22 = vmul.f32 %v5076_v16, %v5076_v16 }
 0x5bc   :  { %2381 = vmatpush1.msra.mxu1 %v4551_v28  ;;  %2470 = vmatpush1.msra.mxu0 %v4556_v29  ;;  %v6760_v28 = vld [vmem:[#allocation4_spill] sm:$0xff]  ;;  %v6761_v29 = vld [vmem:[#allocation5_spill] sm:$0xff] }
 0x5bd   :  { %2382 = vmatprep.subr.mxu1 %v4561_v30  ;;  %2471 = vmatprep.subr.mxu0 %v4566_v33  ;;  %v6762_v30 = vld [vmem:[#allocation6_spill] sm:$0xff]  ;;  %v6763_v33 = vld [vmem:[#allocation7_spill] sm:$0xff] }
 0x5be   :  { %2383 = vmatpush1.msra.mxu1 %v4571_v3  ;;  %2472 = vmatpush1.msra.mxu0 %v4576_v50  ;;  %v6764_v3 = vld [vmem:[#allocation8_spill] sm:$0xff]  ;;  %v6765_v50 = vld [vmem:[#allocation9_spill] sm:$0xff] }
 0x5bf   :  { %2384 = vmatprep.subr.mxu1 %v4583_v46  ;;  %2473 = vmatprep.subr.mxu0 %v4588_v51  ;;  %v6766_v46 = vld [vmem:[#allocation10_spill] sm:$0xff]  ;;  %v6767_v51 = vld [vmem:[#allocation11_spill] sm:$0xff] }
 0x5c0   :  { %2385 = vmatpush2.msra.mxu1 %v4595_v34  ;;  %2474 = vmatpush2.msra.mxu0 %v4600_v35  ;;  %v6768_v34 = vld [vmem:[#allocation12_spill] sm:$0xff]  ;;  %v6769_v35 = vld [vmem:[#allocation13_spill] sm:$0xff] }
 0x5c1   :  { %2386 = vmatprep.subr.mxu1 %v4607_v36  ;;  %2475 = vmatprep.subr.mxu0 %v4612_v39  ;;  %v6770_v36 = vld [vmem:[#allocation14_spill] sm:$0xff]  ;;  %v6771_v39 = vld [vmem:[#allocation15_spill] sm:$0xff] }
 0x5c2   :  { %2387 = vmatpush2.msra.mxu1 %v4619_v31  ;;  %2476 = vmatpush2.msra.mxu0 %v4624_v41  ;;  %v6772_v31 = vld [vmem:[#allocation16_spill] sm:$0xff]  ;;  %v6773_v41 = vld [vmem:[#allocation17_spill] sm:$0xff] }
 0x5c3   :  { %2388 = vmatprep.subr.mxu1 %v4631_v42  ;;  %2477 = vmatprep.subr.mxu0 %v4636_v43  ;;  %v6774_v42 = vld [vmem:[#allocation18_spill] sm:$0xff]  ;;  %v6775_v43 = vld [vmem:[#allocation19_spill] sm:$0xff] }
 0x5c4   :  { %2389 = vmatpush2.msra.mxu1 %v4643_v44  ;;  %2478 = vmatpush2.msra.mxu0 %v4648_v45  ;;  %v6776_v44 = vld [vmem:[#allocation20_spill] sm:$0xff]  ;;  %v6777_v45 = vld [vmem:[#allocation21_spill] sm:$0xff] }
 0x5c5   :  { %2390 = vmatprep.subr.mxu1 %v4655_v52  ;;  %2479 = vmatprep.subr.mxu0 %v4660_v55  ;;  %v6778_v52 = vld [vmem:[#allocation22_spill] sm:$0xff]  ;;  %v6779_v55 = vld [vmem:[#allocation23_spill] sm:$0xff] }
 0x5c6   :  { %2391 = vmatpush2.msra.mxu1 %v4667_v57  ;;  %2480 = vmatpush2.msra.mxu0 %v4672_v59  ;;  %v6780_v57 = vld [vmem:[#allocation24_spill] sm:$0xff]  ;;  %v6781_v59 = vld [vmem:[#allocation25_spill] sm:$0xff] }
 0x5c7   :  { %2392 = vmatprep.subr.mxu1 %v4679_v60  ;;  %2481 = vmatprep.subr.mxu0 %v4684_v61  ;;  %v6782_v60 = vld [vmem:[#allocation26_spill] sm:$0xff]  ;;  %v6783_v61 = vld [vmem:[#allocation27_spill] sm:$0xff] }
 0x5c8   :  { %2393 = vmatpush2.msra.mxu1 %v4691_v62  ;;  %2482 = vmatpush2.msra.mxu0 %v4696_v63  ;;  %v6784_v62 = vld [vmem:[#allocation28_spill] sm:$0xff]  ;;  %v6785_v63 = vld [vmem:[#allocation29_spill] sm:$0xff] }
 0x5c9   :  { %2394 = vmatprep.subr.mxu1 %v4703_v0  ;;  %2483 = vmatprep.subr.mxu0 %v4708_v1  ;;  %v6052_v0 = vmul.f32 %v4980_v27, %v4980_v27  ;;  %v6056_v1 = vmul.f32 %v4982_v26, %v4982_v26 }
 0x5ca   :  { %2395 = vmatpush2.msra.mxu1 %v4715_v2  ;;  %2484 = vmatpush2.msra.mxu0 %v4720_v4  ;;  %v6786_v2 = vld [vmem:[#allocation30_spill] sm:$0xff]  ;;  %v6787_v4 = vld [vmem:[#allocation31_spill] sm:$0xff] }
 0x5cb   :  { %2396 = vmatprep.subr.mxu1 %v4727_v5  ;;  %2485 = vmatprep.subr.mxu0 %v4732_v6  ;;  %v6788_v5 = vld [vmem:[#allocation32_spill] sm:$0xff]  ;;  %v6789_v6 = vld [vmem:[#allocation33_spill] sm:$0xff] }
 0x5cc   :  { %2397 = vmatpush2.msra.mxu1 %v4739_v7  ;;  %2486 = vmatpush2.msra.mxu0 %v4744_v47  ;;  %v6066_v7 = vmul.f32 %v5030_v15, %v5030_v15  ;;  %v6070_v47 = vmul.f32 %v5032_v49, %v5032_v49 }
 0x5cd   :  { %2398 = vmatprep.subr.mxu1 %v4751_v48  ;;  %2487 = vmatprep.subr.mxu0 %v4756_v53  ;;  %v6790_v48 = vld [vmem:[#allocation34_spill] sm:$0xff]  ;;  %v6791_v53 = vld [vmem:[#allocation35_spill] sm:$0xff] }
 0x5ce   :  { %2399 = vmatpush2.msra.mxu1 %v4763_v54  ;;  %2488 = vmatpush2.msra.mxu0 %v4768_v56  ;;  %v6792_v54 = vld [vmem:[#allocation40_spill] sm:$0xff]  ;;  %v6793_v56 = vld [vmem:[#allocation41_spill] sm:$0xff] }
 0x5cf   :  { %2400 = vmatprep.subr.mxu1 %v4775_v58  ;;  %2489 = vmatprep.subr.mxu0 %v4780_v8  ;;  %v6794_v58 = vld [vmem:[#allocation42_spill] sm:$0xff]  ;;  %v6795_v8 = vld [vmem:[#allocation43_spill] sm:$0xff] }
 0x5d0   :  { %2401 = vmatpush2.msra.mxu1 %v6760_v28  ;;  %2490 = vmatpush2.msra.mxu0 %v6761_v29  ;;  %v6098_v28 = vmul.f32 %v5078_v32, %v5078_v32  ;;  %v6798_v29 = vld [vmem:[#allocation50_spill] sm:$0xff] }
 0x5d1   :  { %2402 = vmatprep.subr.mxu1 %v6762_v30  ;;  %2491 = vmatprep.subr.mxu0 %v6763_v33  ;;  %v6799_v30 = vld [vmem:[#allocation51_spill] sm:$0xff]  ;;  %v6800_v33 = vld [vmem:[#allocation54_spill] sm:$0xff] }
 0x5d2   :  { %2403 = vmatpush2.msra.mxu1 %v6764_v3  ;;  %2492 = vmatpush2.msra.mxu0 %v6765_v50  ;;  %v6801_v3 = vld [vmem:[#allocation55_spill] sm:$0xff]  ;;  %v6802_v50 = vld [vmem:[#allocation56_spill] sm:$0xff] }
 0x5d3   :  { %2404 = vmatprep.subr.mxu1 %v6766_v46  ;;  %2493 = vmatprep.subr.mxu0 %v6767_v51  ;;  %v6803_v46 = vld [vmem:[#allocation57_spill] sm:$0xff]  ;;  %v6110_v51 = vmul.f32 %v5048_v40, %v5048_v40 }
 0x5d4   :  { %2405 = vmatpush2.msra.mxu1 %v6768_v34  ;;  %2494 = vmatpush2.msra.mxu0 %v6769_v35  ;;  %v6114_v34 = vmul.f32 %v5050_v37, %v5050_v37  ;;  %v6804_v35 = vld [vmem:[#allocation60_spill] sm:$0xff] }
 0x5d5   :  { %2406 = vmatprep.subr.mxu1 %v6770_v36  ;;  %2495 = vmatprep.subr.mxu0 %v6771_v39  ;;  %v6805_v36 = vld [vmem:[#allocation61_spill] sm:$0xff]  ;;  %v6122_v39 = vmul.f32 %v5148_v12, %v5148_v12 }
 0x5d6   :  { %2407 = vmatpush2.msra.mxu1 %v6772_v31  ;;  %2496 = vmatpush2.msra.mxu0 %v6773_v41  ;;  %v6126_v31 = vmul.f32 %v5150_v11, %v5150_v11  ;;  %v6806_v41 = vld [vmem:[#allocation62_spill] sm:$0xff] }
 0x5d7   :  { %2408 = vmatprep.subr.mxu1 %v6774_v42  ;;  %2497 = vmatprep.subr.mxu0 %v6775_v43  ;;  %v6807_v42 = vld [vmem:[#allocation63_spill] sm:$0xff]  ;;  %v6808_v43 = vld [vmem:[#allocation66_spill] sm:$0xff] }
 0x5d8   :  { %2409 = vmatpush2.msra.mxu1 %v6776_v44  ;;  %2498 = vmatpush2.msra.mxu0 %v6777_v45  ;;  %v6809_v44 = vld [vmem:[#allocation67_spill] sm:$0xff]  ;;  %v6810_v45 = vld [vmem:[#allocation68_spill] sm:$0xff] }
 0x5d9   :  { %2410 = vmatprep.subr.mxu1 %v6778_v52  ;;  %2499 = vmatprep.subr.mxu0 %v6779_v55  ;;  %v6811_v52 = vld [vmem:[#allocation69_spill] sm:$0xff]  ;;  %v6138_v55 = vmul.f32 %v5106_v23, %v5106_v23 }
 0x5da   :  { %2411 = vmatpush2.msra.mxu1 %v6780_v57  ;;  %2500 = vmatpush2.msra.mxu0 %v6781_v59  ;;  %v6142_v57 = vmul.f32 %v5108_v25, %v5108_v25  ;;  %v6812_v59 = vld [vmem:[#allocation70_spill] sm:$0xff] }
 0x5db   :  { %2412 = vmatprep.subr.mxu1 %v6782_v60  ;;  %2501 = vmatprep.subr.mxu0 %v6783_v61  ;;  %v6813_v60 = vld [vmem:[#allocation71_spill] sm:$0xff]  ;;  %v6814_v61 = vld [vmem:[#allocation74_spill] sm:$0xff] }
 0x5dc   :  { %2413 = vmatpush2.msra.mxu1 %v6784_v62  ;;  %2502 = vmatpush2.msra.mxu0 %v6785_v63  ;;  %v6815_v62 = vld [vmem:[#allocation75_spill] sm:$0xff]  ;;  %v6816_v63 = vld [vmem:[#allocation76_spill] sm:$0xff] }
 0x5dd   :  { %2414 = vmatprep.subr.mxu1 %v6786_v2  ;;  %2503 = vmatprep.subr.mxu0 %v6787_v4  ;;  %v6817_v2 = vld [vmem:[#allocation77_spill] sm:$0xff]  ;;  %v6818_v4 = vld [vmem:[#allocation78_spill] sm:$0xff] }
 0x5de   :  { %2415 = vmatpush2.msra.mxu1 %v6788_v5  ;;  %2504 = vmatpush2.msra.mxu0 %v6789_v6  ;;  %v6819_v5 = vld [vmem:[#allocation79_spill] sm:$0xff]  ;;  %v6820_v6 = vld [vmem:[#allocation80_spill] sm:$0xff] }
 0x5df   :  { %2417 = vmatmul.mubr.f32.vlgmr.msra.gmra.mxu1 %v6052_v0  ;;  %2506 = vmatmul.mubr.f32.vlgmr.msra.gmra.mxu0 %v6056_v1 }
 0x5e0   :  { %2530 = vmatprep.subr.mxu1 %v6790_v48  ;;  %2619 = vmatprep.subr.mxu0 %v6791_v53  ;;  %v6821_v48 = vld [vmem:[#allocation81_spill] sm:$0xff]  ;;  %v6822_v53 = vld [vmem:[#allocation82_spill] sm:$0xff] }
 0x5e1   :  { %2422 = vmatprep.mubr.f32.mxu1 %v6066_v7  ;;  %2511 = vmatprep.mubr.f32.mxu0 %v6070_v47 }
 0x5e2   :  { %2531 = vmatpush1.msra.mxu1 %v6792_v54  ;;  %2620 = vmatpush1.msra.mxu0 %v6793_v56  ;;  %v6823_v54 = vld [vmem:[#allocation83_spill] sm:$0xff]  ;;  %v6824_v56 = vld [vmem:[#allocation84_spill] sm:$0xff] }
 0x5e3   :  { %2532 = vmatprep.subr.mxu1 %v6794_v58  ;;  %2621 = vmatprep.subr.mxu0 %v6795_v8  ;;  %v6825_v58 = vld [vmem:[#allocation85_spill] sm:$0xff]  ;;  %v6827_v8 = vld [vmem:[#allocation87_spill] sm:$0xff] }
 0x5e4   :  { %2533 = vmatpush1.msra.mxu1 %v6796_v9  ;;  %2622 = vmatpush1.msra.mxu0 %v6797_v18  ;;  %v6829_v9 = vld [vmem:[#allocation89_spill] sm:$0xff]  ;;  %v6830_v18 = vld [vmem:[#allocation90_spill] sm:$0xff] }
 0x5e5   :  { %2423 = vmatmul.mubr.f32.gmra.mxu1 %v6082_v17  ;;  %2512 = vmatmul.mubr.f32.gmra.mxu0 %v6086_v21 }
 0x5e6   :  { %2534 = vmatprep.subr.mxu1 %v6798_v29  ;;  %2623 = vmatprep.subr.mxu0 %v6799_v30  ;;  %v6831_v29 = vld [vmem:[#allocation91_spill] sm:$0xff]  ;;  %v6832_v30 = vld [vmem:[#allocation92_spill] sm:$0xff] }
 0x5e7   :  { %2428 = vmatprep.mubr.f32.mxu1 %v6094_v22  ;;  %2517 = vmatprep.mubr.f32.mxu0 %v6098_v28 }
 0x5e8   :  { %2535 = vmatpush1.msra.mxu1 %v6800_v33  ;;  %2624 = vmatpush1.msra.mxu0 %v6801_v3  ;;  %v6833_v33 = vld [vmem:[#allocation93_spill] sm:$0xff]  ;;  %v6834_v3 = vld [vmem:[#allocation94_spill] sm:$0xff] }
 0x5e9   :  { %2536 = vmatprep.subr.mxu1 %v6802_v50  ;;  %2625 = vmatprep.subr.mxu0 %v6803_v46  ;;  %v6835_v50 = vld [vmem:[#allocation95_spill] sm:$0xff]  ;;  %v6836_v46 = vld [vmem:[#allocation96_spill] sm:$0xff] }
 0x5ea   :  { %2537 = vmatpush1.msra.mxu1 %v6804_v35  ;;  %2626 = vmatpush1.msra.mxu0 %v6805_v36  ;;  %v6837_v35 = vld [vmem:[#allocation97_spill] sm:$0xff]  ;;  %v6838_v36 = vld [vmem:[#allocation98_spill] sm:$0xff] }
 0x5eb   :  { %2429 = vmatmul.mubr.f32.gmra.mxu1 %v6110_v51  ;;  %2518 = vmatmul.mubr.f32.gmra.mxu0 %v6114_v34 }
 0x5ec   :  { %2538 = vmatprep.subr.mxu1 %v6806_v41  ;;  %2627 = vmatprep.subr.mxu0 %v6807_v42  ;;  %v6839_v41 = vld [vmem:[#allocation99_spill] sm:$0xff]  ;;  %v6840_v42 = vld [vmem:[#allocation100_spill] sm:$0xff] }
 0x5ed   :  { %2434 = vmatprep.mubr.f32.mxu1 %v6122_v39  ;;  %2523 = vmatprep.mubr.f32.mxu0 %v6126_v31 }
 0x5ee   :  { %2539 = vmatpush1.msra.mxu1 %v6808_v43  ;;  %2628 = vmatpush1.msra.mxu0 %v6809_v44  ;;  %v6841_v43 = vld [vmem:[#allocation101_spill] sm:$0xff]  ;;  %v6842_v44 = vld [vmem:[#allocation102_spill] sm:$0xff] }
 0x5ef   :  { %2540 = vmatprep.subr.mxu1 %v6810_v45  ;;  %2629 = vmatprep.subr.mxu0 %v6811_v52  ;;  %v6843_v45 = vld [vmem:[#allocation103_spill] sm:$0xff]  ;;  %v6844_v52 = vld [vmem:[#allocation104_spill] sm:$0xff] }
 0x5f0   :  { %2541 = vmatpush1.msra.mxu1 %v6812_v59  ;;  %2630 = vmatpush1.msra.mxu0 %v6813_v60  ;;  %v6845_v59 = vld [vmem:[#allocation105_spill] sm:$0xff]  ;;  %v6846_v60 = vld [vmem:[#allocation106_spill] sm:$0xff] }
 0x5f1   :  { %2435 = vmatmul.mubr.f32.gmra.mxu1 %v6138_v55  ;;  %2524 = vmatmul.mubr.f32.gmra.mxu0 %v6142_v57 }
 0x5f2   :  { %2542 = vmatprep.subr.mxu1 %v6814_v61  ;;  %2631 = vmatprep.subr.mxu0 %v6815_v62  ;;  %v6847_v61 = vld [vmem:[#allocation107_spill] sm:$0xff]  ;;  %v6848_v62 = vld [vmem:[#allocation108_spill] sm:$0xff] }
 0x5f3   :  { %2543 = vmatpush1.msra.mxu1 %v6816_v63  ;;  %2594 = vmatprep.mubr.f32.mxu1 %v5874_v38  ;;  %v6826_v38 = vld [vmem:[#allocation86_spill] sm:$0xff]  ;;  %v6849_v63 = vld [vmem:[#allocation109_spill] sm:$0xff] }
 0x5f4   :  { %2632 = vmatpush1.msra.mxu0 %v6817_v2  ;;  %2683 = vmatprep.mubr.f32.mxu0 %v5884_v10  ;;  %v6828_v10 = vld [vmem:[#allocation88_spill] sm:$0xff]  ;;  %v6850_v2 = vld [vmem:[#allocation110_spill] sm:$0xff] }
 0x5f5   :  { %2544 = vmatprep.subr.mxu1 %v6818_v4  ;;  %2633 = vmatprep.subr.mxu0 %v6819_v5  ;;  %v6851_v4 = vld [vmem:[#allocation111_spill] sm:$0xff]  ;;  %v6852_v5 = vld [vmem:[#allocation112_spill] sm:$0xff] }
 0x5f6   :  { %2545 = vmatpush1.msra.mxu1 %v6820_v6  ;;  %2634 = vmatpush1.msra.mxu0 %v6821_v48  ;;  %v6853_v6 = vld [vmem:[#allocation113_spill] sm:$0xff]  ;;  %v6854_v48 = vld [vmem:[#allocation114_spill] sm:$0xff] }
 0x5f7   :  { %2546 = vmatprep.subr.mxu1 %v6822_v53  ;;  %2635 = vmatprep.subr.mxu0 %v6823_v54  ;;  %v6855_v53 = vld [vmem:[#allocation115_spill] sm:$0xff]  ;;  %v6856_v54 = vld [vmem:[#allocation116_spill] sm:$0xff] }
 0x5f8   :  { %2547 = vmatpush1.msra.mxu1 %v6824_v56  ;;  %2636 = vmatpush1.msra.mxu0 %v6825_v58  ;;  %v6857_v56 = vld [vmem:[#allocation117_spill] sm:$0xff]  ;;  %v6858_v58 = vld [vmem:[#allocation118_spill] sm:$0xff] }
 0x5f9   :  { %2548 = vmatprep.subr.mxu1 %v6826_v38  ;;  %2637 = vmatprep.subr.mxu0 %v6827_v8  ;;  %v6859_v38 = vld [vmem:[#allocation119_spill] sm:$0xff]  ;;  %v6860_v8 = vld [vmem:[#allocation120_spill] sm:$0xff] }
 0x5fa   :  { %2549 = vmatpush1.msra.mxu1 %v6828_v10  ;;  %2638 = vmatpush1.msra.mxu0 %v6829_v9  ;;  %v6861_v10 = vld [vmem:[#allocation121_spill] sm:$0xff]  ;;  %v6862_v9 = vld [vmem:[#allocation122_spill] sm:$0xff] }
 0x5fb   :  { %2550 = vmatprep.subr.mxu1 %v6830_v18  ;;  %2639 = vmatprep.subr.mxu0 %v6831_v29  ;;  %v6863_v18 = vld [vmem:[#allocation123_spill] sm:$0xff]  ;;  %v6864_v29 = vld [vmem:[#allocation124_spill] sm:$0xff] }
 0x5fc   :  { %2551 = vmatpush1.msra.mxu1 %v6832_v30  ;;  %2640 = vmatpush1.msra.mxu0 %v6833_v33  ;;  %v6865_v30 = vld [vmem:[#allocation125_spill] sm:$0xff]  ;;  %v6866_v33 = vld [vmem:[#allocation126_spill] sm:$0xff] }
 0x5fd   :  { %2552 = vmatprep.subr.mxu1 %v6834_v3  ;;  %2641 = vmatprep.subr.mxu0 %v6835_v50  ;;  %v6867_v3 = vld [vmem:[#allocation127_spill] sm:$0xff]  ;;  %v6868_v50 = vld [vmem:[#allocation128_spill] sm:$0xff] }
 0x5fe   :  { %2553 = vmatpush1.msra.mxu1 %v6836_v46  ;;  %2642 = vmatpush1.msra.mxu0 %v6837_v35  ;;  %v6869_v46 = vld [vmem:[#allocation129_spill] sm:$0xff]  ;;  %v6870_v35 = vld [vmem:[#allocation130_spill] sm:$0xff] }
 0x5ff   :  { %2554 = vmatprep.subr.mxu1 %v6838_v36  ;;  %2643 = vmatprep.subr.mxu0 %v6839_v41  ;;  %v6871_v36 = vld [vmem:[#allocation131_spill] sm:$0xff]  ;;  %v6872_v41 = vld [vmem:[#allocation132_spill] sm:$0xff] }
 0x600   :  { %2555 = vmatpush1.msra.mxu1 %v6840_v42  ;;  %2644 = vmatpush1.msra.mxu0 %v6841_v43  ;;  %v6873_v42 = vld [vmem:[#allocation133_spill] sm:$0xff]  ;;  %v6874_v43 = vld [vmem:[#allocation134_spill] sm:$0xff] }
 0x601   :  { %2556 = vmatprep.subr.mxu1 %v6842_v44  ;;  %2645 = vmatprep.subr.mxu0 %v6843_v45  ;;  %v6875_v44 = vld [vmem:[#allocation135_spill] sm:$0xff]  ;;  %v6876_v45 = vld [vmem:[#allocation136_spill] sm:$0xff] }
 0x602   :  { %2557 = vmatpush1.msra.mxu1 %v6844_v52  ;;  %2646 = vmatpush1.msra.mxu0 %v6845_v59  ;;  %v6877_v52 = vld [vmem:[#allocation137_spill] sm:$0xff]  ;;  %v6878_v59 = vld [vmem:[#allocation138_spill] sm:$0xff] }
 0x603   :  { %2558 = vmatprep.subr.mxu1 %v6846_v60  ;;  %2647 = vmatprep.subr.mxu0 %v6847_v61  ;;  %v6879_v60 = vld [vmem:[#allocation139_spill] sm:$0xff]  ;;  %v6880_v61 = vld [vmem:[#allocation140_spill] sm:$0xff] }
 0x604   :  { %2559 = vmatpush1.msra.mxu1 %v6848_v62  ;;  %2648 = vmatpush1.msra.mxu0 %v6849_v63  ;;  %v6881_v62 = vld [vmem:[#allocation141_spill] sm:$0xff]  ;;  %v6882_v63 = vld [vmem:[#allocation142_spill] sm:$0xff] }
 0x605   :  { %2560 = vmatprep.subr.mxu1 %v6850_v2  ;;  %2649 = vmatprep.subr.mxu0 %v6851_v4  ;;  %v6883_v2 = vld [vmem:[#allocation143_spill] sm:$0xff]  ;;  %v6884_v4 = vld [vmem:[#allocation144_spill] sm:$0xff] }
 0x606   :  { %2561 = vmatpush1.msra.mxu1 %v6852_v5  ;;  %2650 = vmatpush1.msra.mxu0 %v6853_v6  ;;  %v6885_v5 = vld [vmem:[#allocation145_spill] sm:$0xff]  ;;  %v6886_v6 = vld [vmem:[#allocation146_spill] sm:$0xff] }
 0x607   :  { %2562 = vmatprep.subr.mxu1 %v6854_v48  ;;  %2651 = vmatprep.subr.mxu0 %v6855_v53  ;;  %v6887_v48 = vld [vmem:[#allocation147_spill] sm:$0xff]  ;;  %v6888_v53 = vld [vmem:[#allocation148_spill] sm:$0xff] }
 0x608   :  { %2563 = vmatpush2.msra.mxu1 %v6856_v54  ;;  %2652 = vmatpush2.msra.mxu0 %v6857_v56  ;;  %v6889_v54 = vld [vmem:[#allocation149_spill] sm:$0xff]  ;;  %v6890_v56 = vld [vmem:[#allocation150_spill] sm:$0xff] }
 0x609   :  { %2564 = vmatprep.subr.mxu1 %v6858_v58  ;;  %2653 = vmatprep.subr.mxu0 %v6859_v38  ;;  %v6891_v58 = vld [vmem:[#allocation151_spill] sm:$0xff]  ;;  %v6892_v38 = vld [vmem:[#allocation152_spill] sm:$0xff] }
 0x60a   :  { %2565 = vmatpush2.msra.mxu1 %v6860_v8  ;;  %2654 = vmatpush2.msra.mxu0 %v6861_v10  ;;  %v6893_v8 = vld [vmem:[#allocation153_spill] sm:$0xff]  ;;  %v6894_v10 = vld [vmem:[#allocation154_spill] sm:$0xff] }
 0x60b   :  { %2566 = vmatprep.subr.mxu1 %v6862_v9  ;;  %2655 = vmatprep.subr.mxu0 %v6863_v18  ;;  %v6895_v9 = vld [vmem:[#allocation155_spill] sm:$0xff]  ;;  %v6896_v18 = vld [vmem:[#allocation156_spill] sm:$0xff] }
 0x60c   :  { %2567 = vmatpush2.msra.mxu1 %v6864_v29  ;;  %2656 = vmatpush2.msra.mxu0 %v6865_v30  ;;  %v6897_v29 = vld [vmem:[#allocation157_spill] sm:$0xff]  ;;  %v6898_v30 = vld [vmem:[#allocation158_spill] sm:$0xff] }
 0x60d   :  { %2568 = vmatprep.subr.mxu1 %v6866_v33  ;;  %2657 = vmatprep.subr.mxu0 %v6867_v3  ;;  %v6899_v33 = vld [vmem:[#allocation159_spill] sm:$0xff]  ;;  %v6900_v3 = vld [vmem:[#allocation160_spill] sm:$0xff] }
 0x60e   :  { %2569 = vmatpush2.msra.mxu1 %v6868_v50  ;;  %2658 = vmatpush2.msra.mxu0 %v6869_v46  ;;  %v6901_v50 = vld [vmem:[#allocation161_spill] sm:$0xff]  ;;  %v6902_v46 = vld [vmem:[#allocation162_spill] sm:$0xff] }
 0x60f   :  { %2570 = vmatprep.subr.mxu1 %v6870_v35  ;;  %2659 = vmatprep.subr.mxu0 %v6871_v36  ;;  %v6903_v35 = vld [vmem:[#allocation163_spill] sm:$0xff]  ;;  %v6904_v36 = vld [vmem:[#allocation164_spill] sm:$0xff] }
 0x610   :  { %2571 = vmatpush2.msra.mxu1 %v6872_v41  ;;  %2660 = vmatpush2.msra.mxu0 %v6873_v42  ;;  %v6905_v41 = vld [vmem:[#allocation165_spill] sm:$0xff]  ;;  %v6906_v42 = vld [vmem:[#allocation166_spill] sm:$0xff] }
 0x611   :  { %2572 = vmatprep.subr.mxu1 %v6874_v43  ;;  %2661 = vmatprep.subr.mxu0 %v6875_v44  ;;  %v6907_v43 = vld [vmem:[#allocation167_spill] sm:$0xff]  ;;  %v6908_v44 = vld [vmem:[#allocation168_spill] sm:$0xff] }
 0x612   :  { %2573 = vmatpush2.msra.mxu1 %v6876_v45  ;;  %2662 = vmatpush2.msra.mxu0 %v6877_v52  ;;  %v6909_v45 = vld [vmem:[#allocation169_spill] sm:$0xff]  ;;  %v6910_v52 = vld [vmem:[#allocation170_spill] sm:$0xff] }
 0x613   :  { %2574 = vmatprep.subr.mxu1 %v6878_v59  ;;  %2663 = vmatprep.subr.mxu0 %v6879_v60  ;;  %v6911_v59 = vld [vmem:[#allocation171_spill] sm:$0xff]  ;;  %v6912_v60 = vld [vmem:[#allocation172_spill] sm:$0xff] }
 0x614   :  { %2575 = vmatpush2.msra.mxu1 %v6880_v61  ;;  %2664 = vmatpush2.msra.mxu0 %v6881_v62  ;;  %v6913_v61 = vld [vmem:[#allocation173_spill] sm:$0xff]  ;;  %v6914_v62 = vld [vmem:[#allocation174_spill] sm:$0xff] }
 0x615   :  { %2576 = vmatprep.subr.mxu1 %v6882_v63  ;;  %2665 = vmatprep.subr.mxu0 %v6883_v2 }
 0x616   :  { %2577 = vmatpush2.msra.mxu1 %v6884_v4  ;;  %2666 = vmatpush2.msra.mxu0 %v6885_v5 }
 0x617   :  { %2578 = vmatprep.subr.mxu1 %v6886_v6  ;;  %2667 = vmatprep.subr.mxu0 %v6887_v48 }
 0x618   :  { %2579 = vmatpush2.msra.mxu1 %v6888_v53  ;;  %2668 = vmatpush2.msra.mxu0 %v6889_v54 }
 0x619   :  { %2580 = vmatprep.subr.mxu1 %v6890_v56  ;;  %2669 = vmatprep.subr.mxu0 %v6891_v58 }
 0x61a   :  { %2581 = vmatpush2.msra.mxu1 %v6892_v38  ;;  %2670 = vmatpush2.msra.mxu0 %v6893_v8 }
 0x61b   :  { %2582 = vmatprep.subr.mxu1 %v6894_v10  ;;  %2671 = vmatprep.subr.mxu0 %v6895_v9 }
 0x61c   :  { %2583 = vmatpush2.msra.mxu1 %v6896_v18  ;;  %2672 = vmatpush2.msra.mxu0 %v6897_v29 }
 0x61d   :  { %2584 = vmatprep.subr.mxu1 %v6898_v30  ;;  %2673 = vmatprep.subr.mxu0 %v6899_v33 }
 0x61e   :  { %2585 = vmatpush2.msra.mxu1 %v6900_v3  ;;  %2674 = vmatpush2.msra.mxu0 %v6901_v50 }
 0x61f   :  { %2586 = vmatprep.subr.mxu1 %v6902_v46  ;;  %2675 = vmatprep.subr.mxu0 %v6903_v35 }
 0x620   :  { %2587 = vmatpush2.msra.mxu1 %v6904_v36  ;;  %2676 = vmatpush2.msra.mxu0 %v6905_v41 }
 0x621   :  { %2588 = vmatprep.subr.mxu1 %v6906_v42  ;;  %2677 = vmatprep.subr.mxu0 %v6907_v43 }
 0x622   :  { %2589 = vmatpush2.msra.mxu1 %v6908_v44  ;;  %2678 = vmatpush2.msra.mxu0 %v6909_v45 }
 0x623   :  { %2590 = vmatprep.subr.mxu1 %v5737_v24  ;;  %2679 = vmatprep.subr.mxu0 %v6910_v52 }
 0x624   :  { %2591 = vmatpush2.msra.mxu1 %v5749_v13  ;;  %2680 = vmatpush2.msra.mxu0 %v6911_v59  ;;  %v2010_v13 = vpop.f32.mrf.mxu1 }
 0x625   :  { %2592 = vmatprep.subr.mxu1 %v5761_v14  ;;  %2681 = vmatprep.subr.mxu0 %v6912_v60  ;;  %v2099_v14 = vpop.f32.mrf.mxu0 }
 0x626   :  { %2593 = vmatpush2.msra.mxu1 %v6913_v61  ;;  %2682 = vmatpush2.msra.mxu0 %v6914_v62  ;;  %v2012_v24 = vpop.f32.mrf.mxu1  ;;  %v2100_v61 = vadd.f32 %v2099_v14, %v2010_v13 }
 0x627   :  { %2595 = vmatmul.mubr.f32.vlgmr.msra.gmra.mxu1 %v6052_v0  ;;  %2684 = vmatmul.mubr.f32.vlgmr.msra.gmra.mxu0 %v6056_v1  ;;  %v2101_v0 = vpop.f32.mrf.mxu0 }
 0x628   :  { %2600 = vmatprep.mubr.f32.mxu1 %v6066_v7  ;;  %2689 = vmatprep.mubr.f32.mxu0 %v6070_v47  ;;  %v2016_v1 = vpop.f32.mrf.mxu1  ;;  %v2102_v62 = vadd.f32 %v2101_v0, %v2012_v24 }
 0x629   :  { %v2105_v7 = vpop.f32.mrf.mxu0 }
 0x62a   :  { %v2018_v47 = vpop.f32.mrf.mxu1  ;;  %v2106_v45 = vadd.f32 %v2105_v7, %v2016_v1 }
 0x62b   :  { %2601 = vmatmul.mubr.f32.gmra.mxu1 %v6082_v17  ;;  %2690 = vmatmul.mubr.f32.gmra.mxu0 %v6086_v21  ;;  %v2107_v17 = vpop.f32.mrf.mxu0 }
 0x62c   :  { %2606 = vmatprep.mubr.f32.mxu1 %v6094_v22  ;;  %2695 = vmatprep.mubr.f32.mxu0 %v6098_v28  ;;  %v2022_v21 = vpop.f32.mrf.mxu1  ;;  %v2108_v52 = vadd.f32 %v2107_v17, %v2018_v47  ;;  %v2300_v23 = vadd.f32 %v2106_v45, %v2100_v61 }
 0x62d   :  { %v2111_v22 = vpop.f32.mrf.mxu0 }
 0x62e   :  { %v2024_v28 = vpop.f32.mrf.mxu1  ;;  %v2112_v11 = vadd.f32 %v2111_v22, %v2022_v21  ;;  %v2309_v32 = vadd.f32 %v2108_v52, %v2102_v62 }
 0x62f   :  { %2607 = vmatmul.mubr.f32.gmra.mxu1 %v6110_v51  ;;  %2696 = vmatmul.mubr.f32.gmra.mxu0 %v6114_v34  ;;  %v2113_v51 = vpop.f32.mrf.mxu0 }
 0x630   :  { %2612 = vmatprep.mubr.f32.mxu1 %v6122_v39  ;;  %2701 = vmatprep.mubr.f32.mxu0 %v6126_v31  ;;  %v2028_v34 = vpop.f32.mrf.mxu1  ;;  %v2114_v25 = vadd.f32 %v2113_v51, %v2024_v28  ;;  %v2301_v26 = vadd.f32 %v2300_v23, %v2112_v11 }
 0x631   :  { %v2117_v39 = vpop.f32.mrf.mxu0 }
 0x632   :  { %v2030_v63 = vpop.f32.mrf.mxu1  ;;  %v2118_v49 = vadd.f32 %v2117_v39, %v2028_v34  ;;  %v2310_v27 = vadd.f32 %v2309_v32, %v2114_v25 }
 0x633   :  { %2613 = vmatmul.mubr.f32.gmra.mxu1 %v6138_v55  ;;  %2702 = vmatmul.mubr.f32.gmra.mxu0 %v6142_v57  ;;  %v2119_v31 = vpop.f32.mrf.mxu0 }
 0x634   :  { %v2120_v37 = vadd.f32 %v2119_v31, %v2030_v63  ;;  %v2302_v22 = vadd.f32 %v2301_v26, %v2118_v49 }
 0x636   :  { %v2311_v14 = vadd.f32 %v2310_v27, %v2120_v37 }
 0x638   :  { %v2312_v32 = vrot.slane %v2311_v14, 4 }
 0x657   :  { %v2188_v2 = vpop.f32.mrf.mxu1  ;;  %v2277_v55 = vpop.f32.mrf.mxu0 }
 0x658   :  { %v2278_v24 = vadd.f32 %v2277_v55, %v2188_v2  ;;  %v2313_v2 = vadd.f32 %v2312_v32, %v2311_v14 }
 0x659   :  { %v2190_v4 = vpop.f32.mrf.mxu1  ;;  %v2279_v57 = vpop.f32.mrf.mxu0 }
 0x65a   :  { %v2280_v31 = vadd.f32 %v2279_v57, %v2190_v4 }
 0x65d   :  { %v2194_v5 = vpop.f32.mrf.mxu1  ;;  %v2283_v6 = vpop.f32.mrf.mxu0 }
 0x65e   :  { %v2284_v1 = vadd.f32 %v2283_v6, %v2194_v5  ;;  %v2314_v5 = vrot.slane %v2313_v2, 2 }
 0x65f   :  { %v2196_v48 = vpop.f32.mrf.mxu1  ;;  %v2285_v53 = vpop.f32.mrf.mxu0 }
 0x660   :  { %v2286_v0 = vadd.f32 %v2285_v53, %v2196_v48  ;;  %v2318_v34 = vadd.f32 %v2284_v1, %v2278_v24 }
 0x662   :  { %v2327_v23 = vadd.f32 %v2286_v0, %v2280_v31 }
 0x663   :  { %v2200_v54 = vpop.f32.mrf.mxu1  ;;  %v2289_v56 = vpop.f32.mrf.mxu0 }
 0x664   :  { %v2290_v21 = vadd.f32 %v2289_v56, %v2200_v54 }
 0x665   :  { %v2202_v58 = vpop.f32.mrf.mxu1  ;;  %v2291_v38 = vpop.f32.mrf.mxu0 }
 0x666   :  { %v2292_v39 = vadd.f32 %v2291_v38, %v2202_v58  ;;  %v2319_v25 = vadd.f32 %v2318_v34, %v2290_v21 }
 0x668   :  { %v2328_v37 = vadd.f32 %v2327_v23, %v2292_v39 }
 0x669   :  { %v2206_v8 = vpop.f32.mrf.mxu1  ;;  %v2295_v10 = vpop.f32.mrf.mxu0 }
 0x66b   :  { %v2208_v9 = vpop.f32.mrf.mxu1  ;;  %v2297_v18 = vpop.f32.mrf.mxu0 }
 0x69f   :  { %v2418_v29 = vpop.f32.mrf.mxu1  ;;  %v2507_v30 = vpop.f32.mrf.mxu0 }
 0x6a0   :  { %v2508_v7 = vadd.f32 %v2507_v30, %v2418_v29 }
 0x6a1   :  { %v2420_v33 = vpop.f32.mrf.mxu1  ;;  %v2509_v3 = vpop.f32.mrf.mxu0 }
 0x6a2   :  { %v2510_v19 = vadd.f32 %v2509_v3, %v2420_v33  ;;  %v2296_v33 = vadd.f32 %v2295_v10, %v2206_v8 }
 0x6a5   :  { %v2424_v50 = vpop.f32.mrf.mxu1  ;;  %v2513_v46 = vpop.f32.mrf.mxu0 }
 0x6a6   :  { %v2514_v15 = vadd.f32 %v2513_v46, %v2424_v50 }
 0x6a7   :  { %v2426_v35 = vpop.f32.mrf.mxu1  ;;  %v2515_v36 = vpop.f32.mrf.mxu0 }
 0x6a8   :  { %v2516_v12 = vadd.f32 %v2515_v36, %v2426_v35  ;;  %v2708_v28 = vadd.f32 %v2514_v15, %v2508_v7 }
 0x6aa   :  { %v2717_v47 = vadd.f32 %v2516_v12, %v2510_v19  ;;  %v2298_v12 = vadd.f32 %v2297_v18, %v2208_v9  ;;  %v2315_v9 = vadd.f32 %v2314_v5, %v2313_v2 }
 0x6ab   :  { %v2430_v41 = vpop.f32.mrf.mxu1  ;;  %v2519_v42 = vpop.f32.mrf.mxu0 }
 0x6ac   :  { %v2520_v17 = vadd.f32 %v2519_v42, %v2430_v41  ;;  %v2329_v49 = vadd.f32 %v2328_v37, %v2298_v12 }
 0x6ad   :  { %v2432_v43 = vpop.f32.mrf.mxu1  ;;  %v2521_v44 = vpop.f32.mrf.mxu0 }
 0x6ae   :  { %v2522_v20 = vadd.f32 %v2521_v44, %v2432_v43  ;;  %v2709_v3 = vadd.f32 %v2708_v28, %v2520_v17  ;;  %v2330_v6 = vrot.slane %v2329_v49, 4 }
 0x6b0   :  { %v2718_v51 = vadd.f32 %v2717_v47, %v2522_v20  ;;  %v2331_v18 = vadd.f32 %v2330_v6, %v2329_v49 }
 0x6b1   :  { %v2436_v59 = vpop.f32.mrf.mxu1  ;;  %v2525_v60 = vpop.f32.mrf.mxu0 }
 0x6b2   :  { %v2526_v63 = vadd.f32 %v2525_v60, %v2436_v59  ;;  %v2316_v59 = vrot.slane %v2315_v9, 1  ;;  %v2332_v60 = vrot.slane %v2331_v18, 2 }
 0x6b3   :  { %v2438_v16 = vpop.f32.mrf.mxu1  ;;  %v2527_v40 = vpop.f32.mrf.mxu0 }
 0x6b4   :  { %v2528_v13 = vadd.f32 %v2527_v40, %v2438_v16  ;;  %v2710_v19 = vadd.f32 %v2709_v3, %v2526_v63  ;;  %v2303_v40 = vrot.slane %v2302_v22, 4  ;;  %v2320_v16 = vadd.f32 %v2319_v25, %v2296_v33 }
 0x6b5   :  { %v2317_v63 = vadd.f32 %v2316_v59, %v2315_v9  ;;  %v2333_v31 = vadd.f32 %v2332_v60, %v2331_v18  ;;  %v3685_v59 = vmov 1966171168  }
 0x6b6   :  { %v2719_v11 = vadd.f32 %v2718_v51, %v2528_v13  ;;  %v2711_v15 = vrot.slane %v2710_v19, 4  ;;  %v2304_v20 = vadd.f32 %v2303_v40, %v2302_v22  ;;  %v2321_v26 = vrot.slane %v2320_v16, 4 }
 0x6b7   :  { %v6268_v37 = vmul.f32 0.001953125, %v2317_v63  ;;  %v2775_v60 = vunpack.c.l.s4 %v3685_v59 }
 0x6b8   :  { %v2720_v27 = vrot.slane %v2719_v11, 4  ;;  %v2712_v54 = vadd.f32 %v2711_v15, %v2710_v19  ;;  %v2305_v56 = vrot.slane %v2304_v20, 2  ;;  %v2322_v58 = vadd.f32 %v2321_v26, %v2320_v16 }
 0x6b9   :  { %v2334_v16 = vrot.slane %v2333_v31, 1 }
 0x6ba   :  { %v2721_v57 = vadd.f32 %v2720_v27, %v2719_v11  ;;  %v2713_v50 = vrot.slane %v2712_v54, 2  ;;  %v2306_v35 = vadd.f32 %v2305_v56, %v2304_v20  ;;  %v2323_v36 = vrot.slane %v2322_v58, 2 }
 0x6bb   :  { %v2335_v5 = vadd.f32 %v2334_v16, %v2333_v31 }
 0x6bc   :  { %v2722_v10 = vrot.slane %v2721_v57, 2  ;;  %v2714_v1 = vadd.f32 %v2713_v50, %v2712_v54  ;;  %v2307_v13 = vrot.slane %v2306_v35, 1  ;;  %v2324_v14 = vadd.f32 %v2323_v36, %v2322_v58 }
 0x6be   :  { %v2723_v43 = vadd.f32 %v2722_v10, %v2721_v57  ;;  %v2715_v33 = vrot.slane %v2714_v1, 1  ;;  %v2308_v23 = vadd.f32 %v2307_v13, %v2306_v35  ;;  %v2325_v25 = vrot.slane %v2324_v14, 1 }
 0x6bf   :  { %v2753_v57 = vmul.f32 %v6268_v37, %v6268_v37  ;;  %v2747_v10 = vmul.f32 0.001953125, %v2335_v5  ;;  %v6918_v5 = vld [vmem:[#allocation38_spill] sm:$0xff] }
 0x6c0   :  { %v2724_v21 = vrot.slane %v2723_v43, 1  ;;  %v2716_v27 = vadd.f32 %v2715_v33, %v2714_v1  ;;  %v2744_v15 = vmul.f32 0.001953125, %v2308_v23  ;;  %v2326_v20 = vadd.f32 %v2325_v25, %v2324_v14  ;;  %v6916_v33 = vld [vmem:[#allocation3_spill] sm:$0xff] }
 0x6c1   :  { %v2755_v36 = vmul.f32 %v2747_v10, %v2747_v10 }
 0x6c2   :  { %v2725_v12 = vadd.f32 %v2724_v21, %v2723_v43  ;;  %v2748_v6 = vmul.f32 0.001953125, %v2716_v27  ;;  %v2752_v54 = vmul.f32 %v2744_v15, %v2744_v15  ;;  %v2746_v56 = vmul.f32 0.001953125, %v2326_v20 }
 0x6c4   :  { %v2749_v26 = vmul.f32 0.001953125, %v2725_v12  ;;  %v2756_v9 = vsub.f32 %v2748_v6, %v2752_v54  ;;  %v6921_v54 = vld [vmem:[#allocation44_spill] sm:$0xff] }
 0x6c6   :  { %v2757_v58 = vsub.f32 %v2749_v26, %v2753_v57  ;;  %v1687_v26 = vld [vmem:[%s6410_s13] sm:$0xf] }
 0x6c8   :  { %v2761_v50 = vadd.f32 0.001, %v2757_v58 }
 0x6ca   :  { %3602 = vrsqrt.f32 %v2761_v50 }
 0x6e7   :  { %v2596_v55 = vpop.f32.mrf.mxu1  ;;  %v2685_v4 = vpop.f32.mrf.mxu0 }
 0x6e8   :  { %v2686_v44 = vadd.f32 %v2685_v4, %v2596_v55 }
 0x6e9   :  { %v2598_v48 = vpop.f32.mrf.mxu1  ;;  %v2687_v53 = vpop.f32.mrf.mxu0 }
 0x6ea   :  { %v2688_v7 = vadd.f32 %v2687_v53, %v2598_v48 }
 0x6eb   :  { %v2602_v38 = vpop.f32.mrf.mxu1  ;;  %v2691_v8 = vpop.f32.mrf.mxu0 }
 0x6ec   :  { %v2692_v46 = vadd.f32 %v2691_v8, %v2602_v38 }
 0x6ed   :  { %v2604_v29 = vpop.f32.mrf.mxu1  ;;  %v2693_v30 = vpop.f32.mrf.mxu0 }
 0x6ee   :  { %v2694_v45 = vadd.f32 %v2693_v30, %v2604_v29  ;;  %v2726_v47 = vadd.f32 %v2692_v46, %v2686_v44  ;;  %v2754_v30 = vmul.f32 %v2746_v56, %v2746_v56 }
 0x6ef   :  { %v2608_v41 = vpop.f32.mrf.mxu1  ;;  %v2697_v42 = vpop.f32.mrf.mxu0 }
 0x6f0   :  { %v2698_v52 = vadd.f32 %v2697_v42, %v2608_v41  ;;  %v2735_v22 = vadd.f32 %v2694_v45, %v2688_v7  ;;  %v2760_v41 = vadd.f32 0.001, %v2756_v9 }
 0x6f1   :  { %v2610_v61 = vpop.f32.mrf.mxu1  ;;  %v2699_v62 = vpop.f32.mrf.mxu0 }
 0x6f2   :  { %v2700_v17 = vadd.f32 %v2699_v62, %v2610_v61  ;;  %v2727_v28 = vadd.f32 %v2726_v47, %v2698_v52  ;;  %3604 = vrsqrt.f32 %v2760_v41  ;;  %v2776_v61 = vunpack.c.0.s8 %v2775_v60  ;;  %v3603_v62 = vpop.eup %3602  ;;  %v6929_v60 = vld [vmem:[#allocation64_spill] sm:$0xff] }
 0x6f3   :  { %v2614_v24 = vpop.f32.mrf.mxu1  ;;  %v2703_v0 = vpop.f32.mrf.mxu0 }
 0x6f4   :  { %v2704_v51 = vadd.f32 %v2703_v0, %v2614_v24  ;;  %v2736_v3 = vadd.f32 %v2735_v22, %v2700_v17  ;;  %v6915_v17 = vld [vmem:[#allocation2_spill] sm:$0xff] }
 0x6f5   :  { %v2616_v34 = vpop.f32.mrf.mxu1  ;;  %v2705_v39 = vpop.f32.mrf.mxu0  ;;  %v2779_v13 = vsub.s32 %v2776_v61, %v6915_v17  ;;  %v2805_v63 = vsub.s32 1, %v6915_v17  ;;  %v2809_v31 = vsub.s32 2, %v6915_v17 }
 0x6f6   :  { %v2728_v11 = vadd.f32 %v2727_v28, %v2704_v51  ;;  %v2706_v32 = vadd.f32 %v2705_v39, %v2616_v34  ;;  %v1686_v28 = vld [vmem:[%s6409_s12] sm:$0xf]  ;;  %v2813_v34 = vsub.s32 3, %v6915_v17  ;;  %v6932_v17 = vld [vmem:[#allocation73_spill] sm:$0xff] }
 0x6f8   :  { %v2729_v19 = vrot.slane %v2728_v11, 4  ;;  %v2737_v40 = vadd.f32 %v2736_v3, %v2706_v32 }
 0x6fa   :  { %v2730_v2 = vadd.f32 %v2729_v19, %v2728_v11  ;;  %v2738_v49 = vrot.slane %v2737_v40, 4 }
 0x6fc   :  { %v2731_v55 = vrot.slane %v2730_v2, 2  ;;  %v2739_v4 = vadd.f32 %v2738_v49, %v2737_v40 }
 0x6fe   :  { %v2732_v48 = vadd.f32 %v2731_v55, %v2730_v2  ;;  %v2740_v53 = vrot.slane %v2739_v4, 2 }
 0x6ff   :  { %v3605_v1 = vpop.eup %3604 }
 0x700   :  { %v2733_v38 = vrot.slane %v2732_v48, 1  ;;  %v2741_v8 = vadd.f32 %v2740_v53, %v2739_v4  ;;  %v2772_v47 = vcombine.low %v3605_v1, %v3603_v62  ;;  %v6917_v4 = vld [vmem:[#allocation36_spill] sm:$0xff]  ;;  %v6920_v53 = vld [vmem:[#allocation39_spill] sm:$0xff] }
 0x701   :  { %v6930_v62 = vld [vmem:[#allocation72_spill] sm:$0xff] }
 0x702   :  { %v2734_v18 = vadd.f32 %v2733_v38, %v2732_v48  ;;  %v2742_v29 = vrot.slane %v2741_v8, 1  ;;  %v2780_v0 = vrot.slane %v2772_v47, %v2779_v13  ;;  %v6919_v48 = vld [vmem:[#allocation37_spill] sm:$0xff]  ;;  %v6922_v38 = vld [vmem:[#allocation48_spill] sm:$0xff] }
 0x704   :  { %v2750_v46 = vmul.f32 0.001953125, %v2734_v18  ;;  %v2743_v35 = vadd.f32 %v2742_v29, %v2741_v8  ;;  %v6924_v18 = vld [vmem:[#allocation49_spill] sm:$0xff] }
 0x706   :  { %v2758_v42 = vsub.f32 %v2750_v46, %v2754_v30  ;;  %v2751_v43 = vmul.f32 0.001953125, %v2743_v35  ;;  %v6925_v30 = vld [vmem:[#allocation52_spill] sm:$0xff]  ;;  %v6926_v46 = vld [vmem:[#allocation58_spill] sm:$0xff] }
 0x708   :  { %v2762_v44 = vadd.f32 0.001, %v2758_v42  ;;  %v2759_v45 = vsub.f32 %v2751_v43, %v2755_v36  ;;  %v6927_v36 = vld [vmem:[#allocation53_spill] sm:$0xff]  ;;  %v6928_v42 = vld [vmem:[#allocation59_spill] sm:$0xff] }
 0x70a   :  { %v2763_v52 = vadd.f32 0.001, %v2759_v45  ;;  %3606 = vrsqrt.f32 %v2762_v44 }
 0x70c   :  { %3608 = vrsqrt.f32 %v2763_v52 }
 0x717   :  { %v3607_v7 = vpop.eup %3606 }
 0x719   :  { %v3609_v14 = vpop.eup %3608 }
 0x71a   :  { %v2773_v24 = vcombine.low %v3607_v7, %v3609_v14  ;;  %v6931_v7 = vld [vmem:[#allocation65_spill] sm:$0xff] }
 0x71c   :  { %v2787_v21 = vrot.slane %v2773_v24, %v2779_v13 }
 0x71e   :  { %v2788_v22 = vcombine.low %v2780_v0, %v2787_v21 }
 0x720   :  { %v2795_v51 = vrot.slane %v2788_v22, %v2779_v13 }
 0x722   :  { %v2797_v39 = vmul.f32 %v2795_v51, %v1686_v28 }
 0x724   :  { %v2802_v3 = vrot.slane %v2797_v39, %v6916_v33  ;;  %v2806_v11 = vrot.slane %v2797_v39, %v2805_v63  ;;  %v2810_v32 = vrot.slane %v2797_v39, %v2809_v31  ;;  %v2814_v23 = vrot.slane %v2797_v39, %v2813_v34 }
 0x726   :  { %v2819_v25 = vmul.f32 %v2802_v3, %v2744_v15  ;;  %v2820_v12 = vmul.f32 %v2806_v11, %v6268_v37  ;;  %v2821_v19 = vmul.f32 %v2810_v32, %v2746_v56  ;;  %v2822_v40 = vmul.f32 %v2814_v23, %v2747_v10  ;;  %v6923_v10 = vld [vmem:[#allocation45_spill] sm:$0xff] }
 0x727   :  { %v2853_v57 = vmul.f32 %v2802_v3, %v6917_v4  ;;  %v2854_v6 = vmul.f32 %v2806_v11, %v6918_v5  ;;  %v2855_v15 = vmul.f32 %v2810_v32, %v6919_v48  ;;  %v2856_v37 = vmul.f32 %v2814_v23, %v6920_v53 }
 0x728   :  { %v2827_v16 = vcombine.low %v2819_v25, %v2820_v12  ;;  %v2828_v27 = vcombine.low %v2821_v19, %v2822_v40  ;;  %v2857_v56 = vmul.f32 %v2802_v3, %v6921_v54  ;;  %v2858_v8 = vmul.f32 %v2806_v11, %v6922_v38  ;;  %v3669_v19 = vld [vmem:[%s6398_s0 + $0x8] sm:$0xff]  ;;  %v3679_v38 = vld [vmem:[%s6398_s0 + $0x58] sm:$0xff] }
 0x729   :  { %v2859_v9 = vmul.f32 %v2810_v32, %v6923_v10  ;;  %v2860_v29 = vmul.f32 %v2814_v23, %v6924_v18  ;;  %v2861_v50 = vmul.f32 %v2802_v3, %v6925_v30  ;;  %v2862_v35 = vmul.f32 %v2806_v11, %v6926_v46  ;;  %v3680_v10 = vld [vmem:[%s6398_s0 + $0x60] sm:$0xff]  ;;  %v3681_v18 = vld [vmem:[%s6398_s0 + $0x68] sm:$0xff]  ;;  %v3682_v30 = vld [vmem:[%s6398_s0 + $0x70] sm:$0xff] }
 0x72a   :  { %v2835_v2 = vrot.slane %v2827_v16, %v2779_v13  ;;  %v2842_v49 = vrot.slane %v2828_v27, %v2779_v13  ;;  %v2863_v41 = vmul.f32 %v2810_v32, %v6927_v36  ;;  %v2864_v43 = vmul.f32 %v2814_v23, %v6928_v42  ;;  %v3670_v16 = vld [vmem:[%s6398_s0 + $0x10] sm:$0xff]  ;;  %v3683_v46 = vld [vmem:[%s6398_s0 + $0x78] sm:$0xff] }
 0x72b   :  { %v2865_v61 = vmul.f32 %v2802_v3, %v6929_v60  ;;  %v2866_v1 = vmul.f32 %v2806_v11, %v6930_v62  ;;  %v2867_v47 = vmul.f32 %v2810_v32, %v6931_v7  ;;  %v3668_v32 = vld [vmem:[%s6398_s0] sm:$0xff] }
 0x72c   :  { %v2843_v20 = vcombine.low %v2835_v2, %v2842_v49  ;;  %v3671_v2 = vld [vmem:[%s6398_s0 + $0x18] sm:$0xff] }
 0x72e   :  { %v2850_v55 = vrot.slane %v2843_v20, %v2779_v13  ;;  %v2868_v13 = vmul.f32 %v2814_v23, %v6932_v17  ;;  %v3672_v20 = vld [vmem:[%s6398_s0 + $0x20] sm:$0xff] }
 0x730   :  { %v2852_v58 = vsub.f32 %v1687_v26, %v2850_v55  ;;  %v3673_v55 = vld [vmem:[%s6398_s0 + $0x28] sm:$0xff] }
 0x732   :  { %v2873_v44 = vrot.slane %v2852_v58, %v6916_v33  ;;  %v2877_v45 = vrot.slane %v2852_v58, %v2805_v63  ;;  %v2881_v52 = vrot.slane %v2852_v58, %v2809_v31  ;;  %v2885_v59 = vrot.slane %v2852_v58, %v2813_v34 }
 0x734   :  { %v2890_v14 = vadd.f32 %v2873_v44, %v2853_v57  ;;  %v2891_v24 = vadd.f32 %v2877_v45, %v2854_v6  ;;  %v2892_v0 = vadd.f32 %v2881_v52, %v2855_v15  ;;  %v2893_v21 = vadd.f32 %v2885_v59, %v2856_v37  ;;  %v3674_v57 = vld [vmem:[%s6398_s0 + $0x30] sm:$0xff]  ;;  %v3675_v6 = vld [vmem:[%s6398_s0 + $0x38] sm:$0xff]  ;;  %v3676_v15 = vld [vmem:[%s6398_s0 + $0x40] sm:$0xff] }
 0x735   :  { %v2894_v22 = vadd.f32 %v2873_v44, %v2857_v56  ;;  %v2895_v28 = vadd.f32 %v2877_v45, %v2858_v8  ;;  %v2896_v51 = vadd.f32 %v2881_v52, %v2859_v9  ;;  %v2897_v39 = vadd.f32 %v2885_v59, %v2860_v29  ;;  %v3677_v37 = vld [vmem:[%s6398_s0 + $0x48] sm:$0xff]  ;;  %v3678_v56 = vld [vmem:[%s6398_s0 + $0x50] sm:$0xff] }
 0x736   :  { %v2898_v33 = vadd.f32 %v2873_v44, %v2861_v50  ;;  %v2899_v63 = vadd.f32 %v2877_v45, %v2862_v35  ;;  %v2900_v31 = vadd.f32 %v2881_v52, %v2863_v41  ;;  %v2901_v34 = vadd.f32 %v2885_v59, %v2864_v43 }
 0x737   :  { %v2902_v25 = vadd.f32 %v2873_v44, %v2865_v61  ;;  %v2903_v3 = vadd.f32 %v2877_v45, %v2866_v1  ;;  %v2904_v12 = vadd.f32 %v2881_v52, %v2867_v47  ;;  %v2905_v11 = vadd.f32 %v2885_v59, %v2868_v13 }
 0x738   :  { %v2906_v23 = vadd.f32 %v3668_v32, %v2890_v14  ;;  %v2907_v40 = vadd.f32 %v3669_v19, %v2891_v24  ;;  %v2908_v27 = vadd.f32 %v3670_v16, %v2892_v0  ;;  %v2909_v49 = vadd.f32 %v3671_v2, %v2893_v21 }
 0x739   :  { %v2910_v26 = vadd.f32 %v3672_v20, %v2894_v22  ;;  %v2911_v4 = vadd.f32 %v3673_v55, %v2895_v28  ;;  %v2912_v5 = vadd.f32 %v3674_v57, %v2896_v51  ;;  %v2913_v48 = vadd.f32 %v3675_v6, %v2897_v39 }
 0x73a   :  { %v2914_v53 = vadd.f32 %v3676_v15, %v2898_v33  ;;  %v2915_v54 = vadd.f32 %v3677_v37, %v2899_v63  ;;  %v2916_v58 = vadd.f32 %v3678_v56, %v2900_v31  ;;  %v2917_v8 = vadd.f32 %v3679_v38, %v2901_v34 }
 0x73b   :  { %v2918_v9 = vadd.f32 %v3680_v10, %v2902_v25  ;;  %v2919_v29 = vadd.f32 %v3681_v18, %v2903_v3  ;;  %v2920_v50 = vadd.f32 %v3682_v30, %v2904_v12  ;;  %v2921_v35 = vadd.f32 %v3683_v46, %v2905_v11 }
 0x73c   :  { %v2922_v36 = vmax.f32 %v2906_v23, 0.0  ;;  %v2923_v41 = vmax.f32 %v2907_v40, 0.0  ;;  %v2924_v42 = vmax.f32 %v2908_v27, 0.0  ;;  %v2925_v43 = vmax.f32 %v2909_v49, 0.0 }
 0x73d   :  { %v2926_v44 = vmax.f32 %v2910_v26, 0.0  ;;  %v2927_v45 = vmax.f32 %v2911_v4, 0.0  ;;  %v2928_v52 = vmax.f32 %v2912_v5, 0.0  ;;  %v2929_v59 = vmax.f32 %v2913_v48, 0.0 }
 0x73e   :  { %v2930_v60 = vmax.f32 %v2914_v53, 0.0  ;;  %v2931_v61 = vmax.f32 %v2915_v54, 0.0  ;;  %v2932_v62 = vmax.f32 %v2916_v58, 0.0  ;;  %v2933_v1 = vmax.f32 %v2917_v8, 0.0  ;;  %2938 = vst [vmem:[%s6411_s14] sm:$0xff] %v2922_v36  ;;  %2939 = vst [vmem:[%s6411_s14 + $0x8] sm:$0xff] %v2923_v41 }
 0x73f   :  { %2940 = vst [vmem:[%s6411_s14 + $0x10] sm:$0xff] %v2924_v42  ;;  %2941 = vst [vmem:[%s6411_s14 + $0x18] sm:$0xff] %v2925_v43  ;;  %v2934_v7 = vmax.f32 %v2918_v9, 0.0  ;;  %v2935_v47 = vmax.f32 %v2919_v29, 0.0  ;;  %v2936_v17 = vmax.f32 %v2920_v50, 0.0  ;;  %v2937_v13 = vmax.f32 %v2921_v35, 0.0 }
 0x740   :  { %2942 = vst [vmem:[%s6411_s14 + $0x20] sm:$0xff] %v2926_v44  ;;  %2943 = vst [vmem:[%s6411_s14 + $0x28] sm:$0xff] %v2927_v45 }
 0x741   :  { %2944 = vst [vmem:[%s6411_s14 + $0x30] sm:$0xff] %v2928_v52  ;;  %2945 = vst [vmem:[%s6411_s14 + $0x38] sm:$0xff] %v2929_v59 }
 0x742   :  { %2946 = vst [vmem:[%s6411_s14 + $0x40] sm:$0xff] %v2930_v60  ;;  %2947 = vst [vmem:[%s6411_s14 + $0x48] sm:$0xff] %v2931_v61 }
 0x743   :  { %2948 = vst [vmem:[%s6411_s14 + $0x50] sm:$0xff] %v2932_v62  ;;  %2949 = vst [vmem:[%s6411_s14 + $0x58] sm:$0xff] %v2933_v1 }
 0x744   :  { %2950 = vst [vmem:[%s6411_s14 + $0x60] sm:$0xff] %v2934_v7  ;;  %2951 = vst [vmem:[%s6411_s14 + $0x68] sm:$0xff] %v2935_v47 }
 0x745   :  { %2952 = vst [vmem:[%s6411_s14 + $0x70] sm:$0xff] %v2936_v17  ;;  %2953 = vst [vmem:[%s6411_s14 + $0x78] sm:$0xff] %v2937_v13 }

</bundles_post_ra>
